<compile_context>
chip_gen: v7x
topology: tpu7x:2x2x1
jax: 0.10.0
libtpu: 0.0.40
codegen_flags: <defaults>
</compile_context>

<pallas_src>
import functools

import jax
import jax.numpy as jnp
from jax.experimental import pallas as pl
from jax.experimental.pallas import tpu as pltpu


# ----------------------------------------------------------------------------
# Pallas kernels
# ----------------------------------------------------------------------------
def _mm_bias_act_kernel(x_ref, w_ref, b_ref, o_ref, *, apply_silu):
    # x: (tm, K) bf16   w: (K, N) bf16   b: (1, N) f32   o: (tm, N)
    z = jnp.dot(x_ref[...], w_ref[...], preferred_element_type=jnp.float32)
    y = z + b_ref[...]
    if apply_silu:
        y = y * jax.nn.sigmoid(y)            # SiLU(x) = x * sigmoid(x)
    o_ref[...] = y.astype(o_ref.dtype)


def _mm_silu_mm_kernel(x_ref, w1_ref, b1_ref, w2_ref, b2_ref, o_ref):
    # Fused: (conv-as-matmul + folded-BN bias + SiLU) followed by a 1x1
    # projection, without writing the intermediate activation to HBM.
    z = jnp.dot(x_ref[...], w1_ref[...], preferred_element_type=jnp.float32)
    y = z + b1_ref[...]
    y = y * jax.nn.sigmoid(y)                # SiLU
    out = jnp.dot(y.astype(jnp.bfloat16), w2_ref[...],
                  preferred_element_type=jnp.float32) + b2_ref[...]
    o_ref[...] = out.astype(o_ref.dtype)


def _choose_tm(m):
    # Largest tile that divides M exactly (no padded-rows copy of the im2col
    # tensor) while giving >= 2 grid steps so both v7x TensorCores get work.
    for tm in (1024, 512, 256, 128, 64, 32, 16, 8):
        if m % tm == 0 and m // tm >= 2:
            return tm
    return m


def matmul_bias_act(x, w, bias, *, apply_silu, out_dtype=jnp.float32):
    """out = act(x @ w + bias) in one fused Pallas TPU kernel.

    K and N must be multiples of 128 (callers zero-pad); BN scale is already
    folded into `w`.
    """
    m, k = x.shape
    kw, n = w.shape
    assert kw == k and k % 128 == 0 and n % 128 == 0, (k, n)
    tm = _choose_tm(m)

    return pl.pallas_call(
        functools.partial(_mm_bias_act_kernel, apply_silu=apply_silu),
        out_shape=jax.ShapeDtypeStruct((m, n), out_dtype),
        grid_spec=pltpu.PrefetchScalarGridSpec(
            num_scalar_prefetch=0,
            grid=(m // tm,),
            in_specs=[
                pl.BlockSpec((tm, k), lambda i: (i, 0)),   # activation tile
                pl.BlockSpec((k, n), lambda i: (0, 0)),    # full (scaled) weight
                pl.BlockSpec((1, n), lambda i: (0, 0)),    # folded BN bias
            ],
            out_specs=pl.BlockSpec((tm, n), lambda i: (i, 0)),
        ),
        compiler_params=pltpu.CompilerParams(dimension_semantics=("parallel",)),
    )(x.astype(jnp.bfloat16), w.astype(jnp.bfloat16),
      bias.reshape(1, n).astype(jnp.float32))


def matmul_silu_matmul(x, w1, b1, w2, b2, *, out_dtype=jnp.float32):
    """out = silu(x @ w1 + b1) @ w2 + b2, fused (intermediate stays in VMEM)."""
    m, k = x.shape
    k1, n1 = w1.shape
    n1b, n2 = w2.shape
    assert k1 == k and n1b == n1, (k, k1, n1, n1b)
    assert k % 128 == 0 and n1 % 128 == 0 and n2 % 128 == 0, (k, n1, n2)
    tm = _choose_tm(m)

    return pl.pallas_call(
        _mm_silu_mm_kernel,
        out_shape=jax.ShapeDtypeStruct((m, n2), out_dtype),
        grid_spec=pltpu.PrefetchScalarGridSpec(
            num_scalar_prefetch=0,
            grid=(m // tm,),
            in_specs=[
                pl.BlockSpec((tm, k), lambda i: (i, 0)),   # im2col patches tile
                pl.BlockSpec((k, n1), lambda i: (0, 0)),   # dilated-conv weight
                pl.BlockSpec((1, n1), lambda i: (0, 0)),   # folded BN bias
                pl.BlockSpec((n1, n2), lambda i: (0, 0)),  # 1x1 projection weight
                pl.BlockSpec((1, n2), lambda i: (0, 0)),   # 1x1 bias
            ],
            out_specs=pl.BlockSpec((tm, n2), lambda i: (i, 0)),
        ),
        compiler_params=pltpu.CompilerParams(dimension_semantics=("parallel",)),
    )(x.astype(jnp.bfloat16), w1.astype(jnp.bfloat16),
      b1.reshape(1, n1).astype(jnp.float32),
      w2.astype(jnp.bfloat16), b2.reshape(1, n2).astype(jnp.float32))


# ----------------------------------------------------------------------------
# Helpers (im2col / BN folding / padding are plain-JAX glue)
# ----------------------------------------------------------------------------
def _pad_axis(x, mult, axis):
    pad = (-x.shape[axis]) % mult
    if pad == 0:
        return x
    widths = [(0, 0)] * x.ndim
    widths[axis] = (0, pad)
    return jnp.pad(x, widths)


def _fold_bn(p, eps=1e-5):
    # Eval-mode BatchNorm folded to per-channel scale/bias; the scale is folded
    # straight into the conv weight so the kernel epilogue is just `+ bias`.
    scale = p["gamma"] / jnp.sqrt(p["var"] + eps)
    bias = (p["b"] - p["mean"]) * scale + p["beta"]
    w = p["w"].reshape(-1, p["w"].shape[-1]) * scale[None, :]   # (9*cin, cout)
    return w, bias


def _im2col_3x3(x_nhwc, dilation=1):
    n, h, w, c = x_nhwc.shape
    p = dilation  # "same" padding for 3x3 with the given dilation
    xp = jnp.pad(x_nhwc, ((0, 0), (p, p), (p, p), (0, 0)))
    cols = []
    for dy in range(3):
        for dx in range(3):
            cols.append(xp[:, dy * dilation:dy * dilation + h,
                              dx * dilation:dx * dilation + w, :])
    patches = jnp.concatenate(cols, axis=-1)          # (N, H, W, 9*C)
    return patches.reshape(n * h * w, 9 * c)


# ----------------------------------------------------------------------------
# Fused stem: the four parallel Conv3x3+BN+SiLU branches as ONE matmul (N=256)
# ----------------------------------------------------------------------------
def fused_stem(x_nhwc, stem_params):
    n, h, w, _ = x_nhwc.shape
    patches = _pad_axis(_im2col_3x3(x_nhwc.astype(jnp.bfloat16), 1), 128, 1)
    ws, bs = zip(*(_fold_bn(p) for p in stem_params))
    cout = ws[0].shape[1]                                       # 64 per branch
    w_all = _pad_axis(_pad_axis(jnp.concatenate(ws, axis=1), 128, 0), 128, 1)
    b_all = _pad_axis(jnp.concatenate(bs, axis=0), 128, 0)
    y = matmul_bias_act(patches, w_all, b_all, apply_silu=True)  # (M, 256)
    y = y.reshape(n, h, w, -1)
    return [y[..., i * cout:(i + 1) * cout] for i in range(len(stem_params))]


# ----------------------------------------------------------------------------
# DecoderMultiClassDilation (reconstructed)
# ----------------------------------------------------------------------------
def decoder_multiclass_dilation(x_nhwc, dp, output_size=(256, 256)):
    # TODO(synk): DecoderMultiClassDilation's definition is not given in the
    # source file; reconstructed as conv3x3(dil=1)+BN+SiLU -> conv3x3(dil=3)+
    # BN+SiLU -> 1x1 conv to n_cls -> bilinear upsample to output_size.
    n, h, w, _ = x_nhwc.shape
    inter = dp["c1"]["w"].shape[-1]                 # 32
    n_cls = dp["w_out"].shape[-1]

    # --- conv1: 3x3 dilation 1, BN, SiLU -------------------------------------
    # Output is lane-padded to 128 for unmasked stores and stored in bf16
    # (its only consumer is the bf16 im2col of conv2).
    w1, b1 = _fold_bn(dp["c1"])                     # (9*cin, inter)
    w1 = _pad_axis(_pad_axis(w1, 128, 0), 128, 1)
    b1 = _pad_axis(b1, 128, 0)
    p1 = _pad_axis(_im2col_3x3(x_nhwc.astype(jnp.bfloat16), 1), 128, 1)
    y1 = matmul_bias_act(p1, w1, b1, apply_silu=True, out_dtype=jnp.bfloat16)
    y1 = y1[:, :inter].reshape(n, h, w, inter)      # keep only the 32 valid ch

    # --- conv2 (3x3 dilation 3 + BN + SiLU) fused with the final 1x1 conv ----
    # K = 9*32 -> 384 (instead of 9*128 = 1152) and the 32-ch intermediate
    # never leaves VMEM.
    w2, b2 = _fold_bn(dp["c2"])                     # (9*inter, inter)
    w2 = _pad_axis(_pad_axis(w2, 128, 0), 128, 1)   # (384, 128)
    b2 = _pad_axis(b2, 128, 0)
    w3 = jnp.zeros((128, 128), jnp.float32).at[:inter, :n_cls].set(dp["w_out"])
    b3 = jnp.zeros((128,), jnp.float32).at[:n_cls].set(dp["b_out"])
    p2 = _pad_axis(_im2col_3x3(y1, 3), 128, 1)      # (M, 384) bf16
    logits = matmul_silu_matmul(p2, w2, b2, w3, b3)  # (M, 128) f32
    logits = logits[:, :n_cls].reshape(n, h, w, n_cls)

    # The 1x1 conv was commuted ahead of the upsample (exact: both are linear
    # and bilinear weights sum to 1), so the resize moves n_cls channels.
    # Bilinear upsample stays in XLA (no Pallas resize kernel here).
    return jax.image.resize(
        logits, (n, output_size[0], output_size[1], n_cls), method="bilinear")


# ----------------------------------------------------------------------------
# TransformerNoEncoder forward
# ----------------------------------------------------------------------------
def transformer_no_encoder_forward(x_nchw, params, patch_size=16):
    H, W = 512, 512  # hard-coded in the PyTorch forward
    x = jnp.transpose(x_nchw, (0, 2, 3, 1))  # NCHW -> NHWC

    x_1_2, x_1_4, x_1_8, x_1_16 = fused_stem(
        x, [params["t_1_2"], params["t_1_4"], params["t_1_8"], params["t_1_16"]])

    side = {}
    if patch_size == 16:
        n = x.shape[0]
        # Mirrors the self.x_1_* attribute assignments (side effects only, not
        # part of the returned masks).  Kept in NHWC.
        side["x_1_2"] = jax.image.resize(x_1_2, (n, H // 2, W // 2, 64), "bilinear")
        side["x_1_4"] = jax.image.resize(x_1_4, (n, H // 4, W // 4, 64), "bilinear")
        side["x_1_8"] = jax.image.resize(x_1_8, (n, H // 8, W // 8, 64), "bilinear")
        side["x_1_16"] = x_1_16

    masks = decoder_multiclass_dilation(x_1_16, params["decoder"])
    masks = jnp.transpose(masks, (0, 3, 1, 2))  # back to NCHW
    return masks, side


# ----------------------------------------------------------------------------
# Deterministic parameter initialization (synthetic, no checkpoint)
# ----------------------------------------------------------------------------
def _init_conv_bn(key, cin, cout):
    k = jax.random.split(key, 6)
    return dict(
        w=0.1 * jax.random.normal(k[0], (3, 3, cin, cout), jnp.float32),
        b=0.1 * jax.random.normal(k[1], (cout,), jnp.float32),
        gamma=1.0 + 0.1 * jax.random.normal(k[2], (cout,), jnp.float32),
        beta=0.1 * jax.random.normal(k[3], (cout,), jnp.float32),
        mean=0.1 * jax.random.normal(k[4], (cout,), jnp.float32),
        var=1.0 + 0.1 * jnp.abs(jax.random.normal(k[5], (cout,), jnp.float32)),
    )


def init_params(key, in_channels, n_cls, inter_chans=32):
    keys = jax.random.split(key, 8)
    # TODO(synk): the original module constructs the decoder with
    # in_chans=num_outputs_trans=32 while feeding it the 64-channel x_1_16;
    # we use the actual 64 input channels so the forward is runnable.
    dec_in = 64
    decoder = dict(
        c1=_init_conv_bn(keys[4], dec_in, inter_chans),
        c2=_init_conv_bn(keys[5], inter_chans, inter_chans),
        w_out=0.1 * jax.random.normal(keys[6], (inter_chans, n_cls), jnp.float32),
        b_out=0.1 * jax.random.normal(keys[7], (n_cls,), jnp.float32),
    )
    return dict(
        t_1_2=_init_conv_bn(keys[0], in_channels, 64),
        t_1_4=_init_conv_bn(keys[1], in_channels, 64),
        t_1_8=_init_conv_bn(keys[2], in_channels, 64),
        t_1_16=_init_conv_bn(keys[3], in_channels, 64),
        decoder=decoder,
    )


# ----------------------------------------------------------------------------
if __name__ == "__main__":
    key = jax.random.PRNGKey(0)
    k_x, k_p = jax.random.split(key)

    batch, in_channels, spatial, n_cls = 2, 4, 16, 3
    x = jax.random.normal(k_x, (batch, in_channels, spatial, spatial), jnp.float32)
    params = init_params(k_p, in_channels, n_cls)

    fwd = jax.jit(functools.partial(transformer_no_encoder_forward, patch_size=16))
    masks, side = fwd(x, params)
    jax.block_until_ready(masks)
    jax.block_until_ready(side)

    assert masks.shape == (batch, n_cls, 256, 256), masks.shape
    assert masks.dtype == jnp.float32
    print("KERNEL_OK")
</pallas_src>

<mosaic_0001>
module attributes {stable_mosaic.version = 11 : i64} {
  func.func private @main(%arg0: i32) attributes {dimension_semantics = [#tpu.dimension_semantics<core_parallel>], iteration_bounds = array<i64: 2>, tpu.core_type = #tpu.core_type<sc_scalar_subcore>, window_params = []} {
    return
  }
}

module attributes {stable_mosaic.version = 11 : i64} {
  func.func private @main(%arg0: i32) attributes {dimension_semantics = [#tpu.dimension_semantics<core_parallel>], iteration_bounds = array<i64: 2>, tpu.core_type = #tpu.core_type<sc_scalar_subcore>, window_params = []} {
    return
  }
}

module attributes {stable_mosaic.version = 11 : i64} {
  func.func @_mm_bias_act_kernel(%arg0: i32, %arg1: memref<256x128xbf16, #tpu.memory_space<vmem>>, %arg2: memref<128x256xbf16, #tpu.memory_space<vmem>>, %arg3: memref<1x256xf32, #tpu.memory_space<vmem>>, %arg4: memref<256x256xf32, #tpu.memory_space<vmem>>) attributes {dimension_semantics = [#tpu.dimension_semantics<parallel>], iteration_bounds = array<i64: 2>, scalar_prefetch = 0 : i64, scratch_operands = 0 : i64, tpu.core_type = #tpu.core_type<tc>, window_params = [{transform_indices = @transform_0, window_bounds = array<i64: 256, 128>}, {pipeline_mode = #tpu.pipeline_mode<synchronous>, transform_indices = @transform_1, window_bounds = array<i64: 128, 256>}, {pipeline_mode = #tpu.pipeline_mode<synchronous>, transform_indices = @transform_2, window_bounds = array<i64: 1, 256>}, {transform_indices = @transform_3, window_bounds = array<i64: 256, 256>}]} {
    %c0 = arith.constant 0 : index
    %c0_0 = arith.constant 0 : index
    %0 = vector.load %arg1[%c0, %c0_0] : memref<256x128xbf16, #tpu.memory_space<vmem>>, vector<256x128xbf16>
    %c0_1 = arith.constant 0 : index
    %c0_2 = arith.constant 0 : index
    %1 = vector.load %arg2[%c0_1, %c0_2] : memref<128x256xbf16, #tpu.memory_space<vmem>>, vector<128x256xbf16>
    %cst = arith.constant dense<0.000000e+00> : vector<256x256xf32>
    %2 = tpu.matmul %0, %1, %cst {dimension_numbers = #tpu.dot_dimension_numbers<[1], [0], [0], [1], [0, 0, 1, 1], [], []>} : vector<256x128xbf16>, vector<128x256xbf16>, vector<256x256xf32> -> vector<256x256xf32>
    %c0_3 = arith.constant 0 : index
    %c0_4 = arith.constant 0 : index
    %3 = vector.load %arg3[%c0_3, %c0_4] : memref<1x256xf32, #tpu.memory_space<vmem>>, vector<1x256xf32>
    %4 = vector.broadcast %3 : vector<1x256xf32> to vector<256x256xf32>
    %5 = arith.addf %2, %4 : vector<256x256xf32>
    %6 = arith.negf %5 : vector<256x256xf32>
    %7 = math.exp %6 : vector<256x256xf32>
    %cst_5 = arith.constant 1.000000e+00 : f32
    %8 = vector.broadcast %cst_5 : f32 to vector<256x256xf32>
    %9 = arith.addf %8, %7 : vector<256x256xf32>
    %10 = arith.divf %8, %9 : vector<256x256xf32>
    %11 = arith.mulf %5, %10 : vector<256x256xf32>
    %c0_6 = arith.constant 0 : index
    %c0_7 = arith.constant 0 : index
    %12 = vector.load %arg4[%c0_6, %c0_7] : memref<256x256xf32, #tpu.memory_space<vmem>>, vector<256x256xf32>
    tpu.vector_store %arg4[%c0_6, %c0_7], %11 {strides = array<i32>} : memref<256x256xf32, #tpu.memory_space<vmem>>, vector<256x256xf32>,
    return
  }
  func.func @transform_0(%arg0: i32) -> (i32, i32) {
    %c0_i32 = arith.constant 0 : i32
    %c0_i32_0 = arith.constant 0 : i32
    return %arg0, %c0_i32 : i32, i32
  }
  func.func @transform_1(%arg0: i32) -> (i32, i32) {
    %c0_i32 = arith.constant 0 : i32
    %c0_i32_0 = arith.constant 0 : i32
    %c0_i32_1 = arith.constant 0 : i32
    return %c0_i32, %c0_i32_0 : i32, i32
  }
  func.func @transform_2(%arg0: i32) -> (i32, i32) {
    %c0_i32 = arith.constant 0 : i32
    %c0_i32_0 = arith.constant 0 : i32
    %c0_i32_1 = arith.constant 0 : i32
    return %c0_i32, %c0_i32_0 : i32, i32
  }
  func.func @transform_3(%arg0: i32) -> (i32, i32) {
    %c0_i32 = arith.constant 0 : i32
    %c0_i32_0 = arith.constant 0 : i32
    return %arg0, %c0_i32 : i32, i32
  }
}

module attributes {stable_mosaic.version = 11 : i64} {
  func.func @_mm_bias_act_kernel(%arg0: i32, %arg1: memref<256x640xbf16, #tpu.memory_space<vmem>>, %arg2: memref<640x128xbf16, #tpu.memory_space<vmem>>, %arg3: memref<1x128xf32, #tpu.memory_space<vmem>>, %arg4: memref<256x128xbf16, #tpu.memory_space<vmem>>) attributes {dimension_semantics = [#tpu.dimension_semantics<parallel>], iteration_bounds = array<i64: 2>, scalar_prefetch = 0 : i64, scratch_operands = 0 : i64, tpu.core_type = #tpu.core_type<tc>, window_params = [{transform_indices = @transform_0, window_bounds = array<i64: 256, 640>}, {pipeline_mode = #tpu.pipeline_mode<synchronous>, transform_indices = @transform_1, window_bounds = array<i64: 640, 128>}, {pipeline_mode = #tpu.pipeline_mode<synchronous>, transform_indices = @transform_2, window_bounds = array<i64: 1, 128>}, {transform_indices = @transform_3, window_bounds = array<i64: 256, 128>}]} {
    %c0 = arith.constant 0 : index
    %c0_0 = arith.constant 0 : index
    %0 = vector.load %arg1[%c0, %c0_0] : memref<256x640xbf16, #tpu.memory_space<vmem>>, vector<256x640xbf16>
    %c0_1 = arith.constant 0 : index
    %c0_2 = arith.constant 0 : index
    %1 = vector.load %arg2[%c0_1, %c0_2] : memref<640x128xbf16, #tpu.memory_space<vmem>>, vector<640x128xbf16>
    %cst = arith.constant dense<0.000000e+00> : vector<256x128xf32>
    %2 = tpu.matmul %0, %1, %cst {dimension_numbers = #tpu.dot_dimension_numbers<[1], [0], [0], [1], [0, 0, 1, 1], [], []>} : vector<256x640xbf16>, vector<640x128xbf16>, vector<256x128xf32> -> vector<256x128xf32>
    %c0_3 = arith.constant 0 : index
    %c0_4 = arith.constant 0 : index
    %3 = vector.load %arg3[%c0_3, %c0_4] : memref<1x128xf32, #tpu.memory_space<vmem>>, vector<1x128xf32>
    %4 = vector.broadcast %3 : vector<1x128xf32> to vector<256x128xf32>
    %5 = arith.addf %2, %4 : vector<256x128xf32>
    %6 = arith.negf %5 : vector<256x128xf32>
    %7 = math.exp %6 : vector<256x128xf32>
    %cst_5 = arith.constant 1.000000e+00 : f32
    %8 = vector.broadcast %cst_5 : f32 to vector<256x128xf32>
    %9 = arith.addf %8, %7 : vector<256x128xf32>
    %10 = arith.divf %8, %9 : vector<256x128xf32>
    %11 = arith.mulf %5, %10 : vector<256x128xf32>
    %12 = arith.truncf %11 : vector<256x128xf32> to vector<256x128xbf16>
    %c0_6 = arith.constant 0 : index
    %c0_7 = arith.constant 0 : index
    %13 = vector.load %arg4[%c0_6, %c0_7] : memref<256x128xbf16, #tpu.memory_space<vmem>>, vector<256x128xbf16>
    tpu.vector_store %arg4[%c0_6, %c0_7], %12 {strides = array<i32>} : memref<256x128xbf16, #tpu.memory_space<vmem>>, vector<256x128xbf16>,
    return
  }
  func.func @transform_0(%arg0: i32) -> (i32, i32) {
    %c0_i32 = arith.constant 0 : i32
    %c0_i32_0 = arith.constant 0 : i32
    return %arg0, %c0_i32 : i32, i32
  }
  func.func @transform_1(%arg0: i32) -> (i32, i32) {
    %c0_i32 = arith.constant 0 : i32
    %c0_i32_0 = arith.constant 0 : i32
    %c0_i32_1 = arith.constant 0 : i32
    return %c0_i32, %c0_i32_0 : i32, i32
  }
  func.func @transform_2(%arg0: i32) -> (i32, i32) {
    %c0_i32 = arith.constant 0 : i32
    %c0_i32_0 = arith.constant 0 : i32
    %c0_i32_1 = arith.constant 0 : i32
    return %c0_i32, %c0_i32_0 : i32, i32
  }
  func.func @transform_3(%arg0: i32) -> (i32, i32) {
    %c0_i32 = arith.constant 0 : i32
    %c0_i32_0 = arith.constant 0 : i32
    return %arg0, %c0_i32 : i32, i32
  }
}

module attributes {stable_mosaic.version = 11 : i64} {
  func.func @_mm_silu_mm_kernel(%arg0: i32, %arg1: memref<256x384xbf16, #tpu.memory_space<vmem>>, %arg2: memref<384x128xbf16, #tpu.memory_space<vmem>>, %arg3: memref<1x128xf32, #tpu.memory_space<vmem>>, %arg4: memref<128x128xbf16, #tpu.memory_space<vmem>>, %arg5: memref<1x128xf32, #tpu.memory_space<vmem>>, %arg6: memref<256x128xf32, #tpu.memory_space<vmem>>) attributes {dimension_semantics = [#tpu.dimension_semantics<parallel>], iteration_bounds = array<i64: 2>, scalar_prefetch = 0 : i64, scratch_operands = 0 : i64, tpu.core_type = #tpu.core_type<tc>, window_params = [{transform_indices = @transform_0, window_bounds = array<i64: 256, 384>}, {pipeline_mode = #tpu.pipeline_mode<synchronous>, transform_indices = @transform_1, window_bounds = array<i64: 384, 128>}, {pipeline_mode = #tpu.pipeline_mode<synchronous>, transform_indices = @transform_2, window_bounds = array<i64: 1, 128>}, {pipeline_mode = #tpu.pipeline_mode<synchronous>, transform_indices = @transform_3, window_bounds = array<i64: 128, 128>}, {pipeline_mode = #tpu.pipeline_mode<synchronous>, transform_indices = @transform_4, window_bounds = array<i64: 1, 128>}, {transform_indices = @transform_5, window_bounds = array<i64: 256, 128>}]} {
    %c0 = arith.constant 0 : index
    %c0_0 = arith.constant 0 : index
    %0 = vector.load %arg1[%c0, %c0_0] : memref<256x384xbf16, #tpu.memory_space<vmem>>, vector<256x384xbf16>
    %c0_1 = arith.constant 0 : index
    %c0_2 = arith.constant 0 : index
    %1 = vector.load %arg2[%c0_1, %c0_2] : memref<384x128xbf16, #tpu.memory_space<vmem>>, vector<384x128xbf16>
    %cst = arith.constant dense<0.000000e+00> : vector<256x128xf32>
    %2 = tpu.matmul %0, %1, %cst {dimension_numbers = #tpu.dot_dimension_numbers<[1], [0], [0], [1], [0, 0, 1, 1], [], []>} : vector<256x384xbf16>, vector<384x128xbf16>, vector<256x128xf32> -> vector<256x128xf32>
    %c0_3 = arith.constant 0 : index
    %c0_4 = arith.constant 0 : index
    %3 = vector.load %arg3[%c0_3, %c0_4] : memref<1x128xf32, #tpu.memory_space<vmem>>, vector<1x128xf32>
    %4 = vector.broadcast %3 : vector<1x128xf32> to vector<256x128xf32>
    %5 = arith.addf %2, %4 : vector<256x128xf32>
    %6 = arith.negf %5 : vector<256x128xf32>
    %7 = math.exp %6 : vector<256x128xf32>
    %cst_5 = arith.constant 1.000000e+00 : f32
    %8 = vector.broadcast %cst_5 : f32 to vector<256x128xf32>
    %9 = arith.addf %8, %7 : vector<256x128xf32>
    %10 = arith.divf %8, %9 : vector<256x128xf32>
    %11 = arith.mulf %5, %10 : vector<256x128xf32>
    %12 = arith.truncf %11 : vector<256x128xf32> to vector<256x128xbf16>
    %c0_6 = arith.constant 0 : index
    %c0_7 = arith.constant 0 : index
    %13 = vector.load %arg4[%c0_6, %c0_7] : memref<128x128xbf16, #tpu.memory_space<vmem>>, vector<128x128xbf16>
    %cst_8 = arith.constant dense<0.000000e+00> : vector<256x128xf32>
    %14 = tpu.matmul %12, %13, %cst_8 {dimension_numbers = #tpu.dot_dimension_numbers<[1], [0], [0], [1], [0, 0, 1, 1], [], []>} : vector<256x128xbf16>, vector<128x128xbf16>, vector<256x128xf32> -> vector<256x128xf32>
    %c0_9 = arith.constant 0 : index
    %c0_10 = arith.constant 0 : index
    %15 = vector.load %arg5[%c0_9, %c0_10] : memref<1x128xf32, #tpu.memory_space<vmem>>, vector<1x128xf32>
    %16 = vector.broadcast %15 : vector<1x128xf32> to vector<256x128xf32>
    %17 = arith.addf %14, %16 : vector<256x128xf32>
    %c0_11 = arith.constant 0 : index
    %c0_12 = arith.constant 0 : index
    %18 = vector.load %arg6[%c0_11, %c0_12] : memref<256x128xf32, #tpu.memory_space<vmem>>, vector<256x128xf32>
    tpu.vector_store %arg6[%c0_11, %c0_12], %17 {strides = array<i32>} : memref<256x128xf32, #tpu.memory_space<vmem>>, vector<256x128xf32>,
    return
  }
  func.func @transform_0(%arg0: i32) -> (i32, i32) {
    %c0_i32 = arith.constant 0 : i32
    %c0_i32_0 = arith.constant 0 : i32
    return %arg0, %c0_i32 : i32, i32
  }
  func.func @transform_1(%arg0: i32) -> (i32, i32) {
    %c0_i32 = arith.constant 0 : i32
    %c0_i32_0 = arith.constant 0 : i32
    %c0_i32_1 = arith.constant 0 : i32
    return %c0_i32, %c0_i32_0 : i32, i32
  }
  func.func @transform_2(%arg0: i32) -> (i32, i32) {
    %c0_i32 = arith.constant 0 : i32
    %c0_i32_0 = arith.constant 0 : i32
    %c0_i32_1 = arith.constant 0 : i32
    return %c0_i32, %c0_i32_0 : i32, i32
  }
  func.func @transform_3(%arg0: i32) -> (i32, i32) {
    %c0_i32 = arith.constant 0 : i32
    %c0_i32_0 = arith.constant 0 : i32
    %c0_i32_1 = arith.constant 0 : i32
    return %c0_i32, %c0_i32_0 : i32, i32
  }
  func.func @transform_4(%arg0: i32) -> (i32, i32) {
    %c0_i32 = arith.constant 0 : i32
    %c0_i32_0 = arith.constant 0 : i32
    %c0_i32_1 = arith.constant 0 : i32
    return %c0_i32, %c0_i32_0 : i32, i32
  }
  func.func @transform_5(%arg0: i32) -> (i32, i32) {
    %c0_i32 = arith.constant 0 : i32
    %c0_i32_0 = arith.constant 0 : i32
    return %arg0, %c0_i32 : i32, i32
  }
}

</mosaic_0001>

<bundles_post_ra>
// kernel: transformer_no_encoder_forward.3
= control target key start
LH: loop header
LB: loop body
LE: loop exit
PB: predicated region body
PF: predicated region fallthrough
CT: control target
= control target key end

     0   :  { %s1635_s12 = smov 0   ;;  %s2200_s0 = inlined_call_operand.vmem [shape: bf16[512,128], index: 0, kind: input, shape index: {}]   ;;  %s2201_s1 = inlined_call_operand.vmem [shape: bf16[128,256], index: 1, kind: input, shape index: {}]   ;;  %s2202_s2 = inlined_call_operand.vmem [shape: f32[1,256], index: 2, kind: input, shape index: {}]   ;;  %s2203_s3 = inlined_call_operand.vmem [shape: f32[512,256], index: 3, kind: output, shape index: {}]  }
   0x1 LB: > { %s1176_s13 = sadd.s32 4294967295, %s1612_s12   ;;  %p1180_p0 = scmp.ge.s32.totalorder %s1612_s12, 1  ;;  %s1612_s12 = sphi %s1635_s12, %s13_s12  }
   0x2   : > { %p138_p1 = scmp.lt.s32.totalorder %s1612_s12, 3 }
   0x4   : > { %p139_p2 = pnand %p1180_p0, %p138_p1 }
   0x5   : > { %v1310_v0 = vld [vmem:[%s2201_s1 + $0x4] ss:$8 sps:$4 sm:$0xff] (!%p139_p2)   ;;  %s1181_s16 = sshll.u32 (!%p139_p2), %s1176_s13, 5  ;;  %v1312_v1 = vld [vmem:[%s2201_s1] ss:$8 sps:$4 sm:$0xff] (!%p139_p2)   ;;  %v1614_v2 = vmov (!%p139_p2), 0   ;;  %v227_v33 = vlaneseq (!%p139_p2) }
   0x6   : > { %142 = sbr.rel (%p139_p2) target bundleno = 401 (0x191), region = 32  ;;  %445 = vmatprep.mubr.bf16.mxu0 (!%p139_p2), %v1614_v2  ;;  %525 = vmatprep.mubr.bf16.mxu1 (!%p139_p2), %v1614_v2  ;;  %p164_p3 = scmp.lt.s32.totalorder (!%p139_p2), %s1181_s16, 63  ;;  %v1313_v3 = vld [vmem:[%s2201_s1 + $0x14] ss:$8 sps:$4 sm:$0xff] (!%p139_p2)   ;;  %v1315_v4 = vld [vmem:[%s2201_s1 + $0x10] ss:$8 sps:$4 sm:$0xff] (!%p139_p2)  }
   0x7   : > { %413 = vmatprep.subr.bf16.mxu0 (!%p139_p2), %v1310_v0  ;;  %1285 = vmatprep.subr.bf16.mxu1 (!%p139_p2), %v1310_v0  ;;  %v1316_v5 = vld [vmem:[%s2201_s1 + $0x24] ss:$8 sps:$4 sm:$0xff] (!%p139_p2)   ;;  %v1318_v6 = vld [vmem:[%s2201_s1 + $0x20] ss:$8 sps:$4 sm:$0xff] (!%p139_p2)   ;;  %v1319_v7 = vld [vmem:[%s2201_s1 + $0x34] ss:$8 sps:$4 sm:$0xff] (!%p139_p2)  }
   0x8   : > { %414 = vmatpush1.bf16.msra.mxu0 (!%p139_p2), %v1312_v1  ;;  %1293 = vmatpush1.bf16.msra.mxu1 (!%p139_p2), %v1312_v1  ;;  %v1321_v8 = vld [vmem:[%s2201_s1 + $0x30] ss:$8 sps:$4 sm:$0xff] (!%p139_p2)   ;;  %v1322_v9 = vld [vmem:[%s2201_s1 + $0x44] ss:$8 sps:$4 sm:$0xff] (!%p139_p2)   ;;  %v1324_v10 = vld [vmem:[%s2201_s1 + $0x40] ss:$8 sps:$4 sm:$0xff] (!%p139_p2)  }
   0x9   : > { %415 = vmatprep.subr.bf16.mxu0 (!%p139_p2), %v1313_v3  ;;  %1286 = vmatprep.subr.bf16.mxu1 (!%p139_p2), %v1313_v3  ;;  %v1325_v11 = vld [vmem:[%s2201_s1 + $0x54] ss:$8 sps:$4 sm:$0xff] (!%p139_p2)   ;;  %v1327_v12 = vld [vmem:[%s2201_s1 + $0x50] ss:$8 sps:$4 sm:$0xff] (!%p139_p2)   ;;  %v1328_v13 = vld [vmem:[%s2201_s1 + $0x64] ss:$8 sps:$4 sm:$0xff] (!%p139_p2)  }
   0xa   : > { %v1330_v14 = vld [vmem:[%s2201_s1 + $0x60] ss:$8 sps:$4 sm:$0xff] (!%p139_p2)   ;;  %v1331_v15 = vld [vmem:[%s2201_s1 + $0x74] ss:$8 sps:$4 sm:$0xff] (!%p139_p2)   ;;  %v1333_v16 = vld [vmem:[%s2201_s1 + $0x70] ss:$8 sps:$4 sm:$0xff] (!%p139_p2)  }
   0xb   : > { %v228_v34 = vshrl.u32 (!%p139_p2), %v227_v33, 7  ;;  %v225_v36 = vld [vmem:[%s2202_s2] sm:$0x3] (!%p139_p2) }
   0xc   : > { %416 = vmatpush1.bf16.msra.mxu0 (!%p139_p2), %v1315_v4  ;;  %1294 = vmatpush1.bf16.msra.mxu1 (!%p139_p2), %v1315_v4 }
   0xd   : > { %s2205_s16 = smov (!%p164_p3, %s1181_s16), 63  ;;  %417 = vmatprep.subr.bf16.mxu0 %v1316_v5  ;;  %1287 = vmatprep.subr.bf16.mxu1 %v1316_v5  ;;  %v229_v35 = vsub.s32 0, %v228_v34  ;;  %v233_v37 = vsub.s32 1, %v228_v34 }
   0xe   : > { %s1182_s25 = sshll.u32 %s2205_s16, 2  ;;  %s1284_s28 = sshll.u32 %s2205_s16, 4 }
   0xf   : > { %s1672_s5 = scalar_lea.vmem %s2200_s0, %s1182_s25  ;;  %v1734_v38 = vrot.slane %v225_v36, %v229_v35  ;;  %v1736_v39 = vrot.slane %v225_v36, %v233_v37  ;;  %s1830_s30 = scalar_lea.vmem %s2203_s3, %s1284_s28 }
  0x10   : > { %418 = vmatpush1.bf16.msra.mxu0 %v1318_v6  ;;  %1295 = vmatpush1.bf16.msra.mxu1 %v1318_v6  ;;  %v1334_v17 = vld [vmem:[%s1672_s5] sm:$0xff]   ;;  %v1336_v19 = vld [vmem:[%s1672_s5 + $0x8] sm:$0xff]   ;;  %v1338_v21 = vld [vmem:[%s1672_s5 + $0x10] sm:$0xff]  }
  0x11   : > { %419 = vmatprep.subr.bf16.mxu0 %v1319_v7  ;;  %1288 = vmatprep.subr.bf16.mxu1 %v1319_v7  ;;  %v1335_v18 = vld [vmem:[%s1672_s5 + $0x40] sm:$0xff]   ;;  %v1337_v20 = vld [vmem:[%s1672_s5 + $0x48] sm:$0xff]   ;;  %v1339_v22 = vld [vmem:[%s1672_s5 + $0x50] sm:$0xff]  }
  0x12   : > { %v1340_v23 = vld [vmem:[%s1672_s5 + $0x18] sm:$0xff]   ;;  %v1342_v25 = vld [vmem:[%s1672_s5 + $0x20] sm:$0xff]   ;;  %v1344_v27 = vld [vmem:[%s1672_s5 + $0x28] sm:$0xff]  }
  0x13   : > { %v1341_v24 = vld [vmem:[%s1672_s5 + $0x58] sm:$0xff]   ;;  %v1343_v26 = vld [vmem:[%s1672_s5 + $0x60] sm:$0xff]   ;;  %v1345_v28 = vld [vmem:[%s1672_s5 + $0x68] sm:$0xff]  }
  0x14   : > { %420 = vmatpush1.bf16.msra.mxu0 %v1321_v8  ;;  %1296 = vmatpush1.bf16.msra.mxu1 %v1321_v8  ;;  %v1346_v29 = vld [vmem:[%s1672_s5 + $0x30] sm:$0xff]   ;;  %v1348_v31 = vld [vmem:[%s1672_s5 + $0x38] sm:$0xff]  }
  0x15   : > { %421 = vmatprep.subr.bf16.mxu0 %v1322_v9  ;;  %1289 = vmatprep.subr.bf16.mxu1 %v1322_v9  ;;  %v1347_v30 = vld [vmem:[%s1672_s5 + $0x70] sm:$0xff]   ;;  %v1349_v32 = vld [vmem:[%s1672_s5 + $0x78] sm:$0xff]  }
  0x18   : > { %422 = vmatpush1.bf16.msra.mxu0 %v1324_v10  ;;  %1297 = vmatpush1.bf16.msra.mxu1 %v1324_v10 }
  0x19   : > { %423 = vmatprep.subr.bf16.mxu0 %v1325_v11  ;;  %1290 = vmatprep.subr.bf16.mxu1 %v1325_v11 }
  0x1c   : > { %424 = vmatpush1.bf16.msra.mxu0 %v1327_v12  ;;  %1298 = vmatpush1.bf16.msra.mxu1 %v1327_v12 }
  0x1d   : > { %425 = vmatprep.subr.bf16.mxu0 %v1328_v13  ;;  %1291 = vmatprep.subr.bf16.mxu1 %v1328_v13 }
  0x20   : > { %426 = vmatpush1.bf16.msra.mxu0 %v1330_v14  ;;  %1299 = vmatpush1.bf16.msra.mxu1 %v1330_v14 }
  0x21   : > { %427 = vmatprep.subr.bf16.mxu0 %v1331_v15  ;;  %1292 = vmatprep.subr.bf16.mxu1 %v1331_v15 }
  0x24   : > { %428 = vmatpush1.bf16.msra.mxu0 %v1333_v16  ;;  %1300 = vmatpush1.bf16.msra.mxu1 %v1333_v16 }
  0x27   : > { %446 = vmatmul.mubr.bf16.vlgmr.msra.gmra.mrb[0].mxu0 %v1334_v17  ;;  %526 = vmatmul.mubr.bf16.vlgmr.msra.gmra.mrb[0].mxu1 %v1335_v18 }
  0x28   : > { %455 = vmatprep.mubr.bf16.mxu0 %v1614_v2  ;;  %535 = vmatprep.mubr.bf16.mxu1 %v1614_v2 }
  0x2f   : > { %456 = vmatmul.mubr.bf16.gmra.mrb[4].mxu0 %v1336_v19  ;;  %536 = vmatmul.mubr.bf16.gmra.mrb[4].mxu1 %v1337_v20 }
  0x30   : > { %465 = vmatprep.mubr.bf16.mxu0 %v1614_v2  ;;  %545 = vmatprep.mubr.bf16.mxu1 %v1614_v2 }
  0x37   : > { %466 = vmatmul.mubr.bf16.gmra.mrb[8].mxu0 %v1338_v21  ;;  %546 = vmatmul.mubr.bf16.gmra.mrb[8].mxu1 %v1339_v22 }
  0x38   : > { %475 = vmatprep.mubr.bf16.mxu0 %v1614_v2  ;;  %555 = vmatprep.mubr.bf16.mxu1 %v1614_v2 }
  0x3f   : > { %476 = vmatmul.mubr.bf16.gmra.mrb[12].mxu0 %v1340_v23  ;;  %556 = vmatmul.mubr.bf16.gmra.mrb[12].mxu1 %v1341_v24 }
  0x40   : > { %485 = vmatprep.mubr.bf16.mxu0 %v1614_v2  ;;  %565 = vmatprep.mubr.bf16.mxu1 %v1614_v2 }
  0x47   : > { %486 = vmatmul.mubr.bf16.gmra.mrb[16].mxu0 %v1342_v25  ;;  %566 = vmatmul.mubr.bf16.gmra.mrb[16].mxu1 %v1343_v26 }
  0x48   : > { %495 = vmatprep.mubr.bf16.mxu0 %v1614_v2  ;;  %575 = vmatprep.mubr.bf16.mxu1 %v1614_v2 }
  0x4f   : > { %496 = vmatmul.mubr.bf16.gmra.mrb[20].mxu0 %v1344_v27  ;;  %576 = vmatmul.mubr.bf16.gmra.mrb[20].mxu1 %v1345_v28 }
  0x50   : > { %505 = vmatprep.mubr.bf16.mxu0 %v1614_v2  ;;  %585 = vmatprep.mubr.bf16.mxu1 %v1614_v2 }
  0x57   : > { %506 = vmatmul.mubr.bf16.gmra.mrb[24].mxu0 %v1346_v29  ;;  %586 = vmatmul.mubr.bf16.gmra.mrb[24].mxu1 %v1347_v30 }
  0x58   : > { %515 = vmatprep.mubr.bf16.mxu0 %v1614_v2  ;;  %595 = vmatprep.mubr.bf16.mxu1 %v1614_v2 }
  0x5f   : > { %516 = vmatmul.mubr.bf16.gmra.mrb[28].mxu0 %v1348_v31  ;;  %596 = vmatmul.mubr.bf16.gmra.mrb[28].mxu1 %v1349_v32 }
  0xfa   : > { %v447_v40 = vpop.f32.mrb[0].mxu0  ;;  %v527_v41 = vpop.f32.mrb[0].mxu1 }
  0xfb   : > { %v1739_v42 = vadd.f32 %v447_v40, %v1734_v38  ;;  %v1742_v43 = vadd.f32 %v527_v41, %v1734_v38  ;;  %v449_v44 = vpop.f32.mrb[1].mxu0  ;;  %v529_v45 = vpop.f32.mrb[1].mxu1 }
  0xfc   : > { %v1745_v46 = vadd.f32 %v449_v44, %v1736_v39  ;;  %v1748_v47 = vadd.f32 %v529_v45, %v1736_v39  ;;  %v451_v48 = vpop.f32.mrb[2].mxu0  ;;  %v531_v49 = vpop.f32.mrb[2].mxu1 }
  0xfd   : > { %v1218_v50 = vmul.f32 -1.442695, %v1739_v42  ;;  %v1250_v51 = vmul.f32 -1.442695, %v1742_v43  ;;  %v1753_v52 = vadd.f32 %v451_v48, %v1734_v38  ;;  %v1756_v53 = vadd.f32 %v531_v49, %v1734_v38  ;;  %v453_v54 = vpop.f32.mrb[3].mxu0  ;;  %v533_v55 = vpop.f32.mrb[3].mxu1 }
  0xfe   : > { %v1219_v56 = vmul.f32 -1.442695, %v1745_v46  ;;  %v1251_v57 = vmul.f32 -1.442695, %v1748_v47  ;;  %v1761_v58 = vadd.f32 %v453_v54, %v1736_v39  ;;  %v1764_v59 = vadd.f32 %v533_v55, %v1736_v39 }
  0xff   : > { %1350 = vpow2.f32 %v1218_v50  ;;  %v1220_v60 = vmul.f32 -1.442695, %v1753_v52  ;;  %v1252_v61 = vmul.f32 -1.442695, %v1756_v53 }
 0x100   : > { %1352 = vpow2.f32 %v1250_v51  ;;  %v1221_v62 = vmul.f32 -1.442695, %v1761_v58  ;;  %v1253_v63 = vmul.f32 -1.442695, %v1764_v59 }
 0x101   : > { %1354 = vpow2.f32 %v1219_v56 }
 0x102   : > { %1356 = vpow2.f32 %v1251_v57  ;;  %v457_v0 = vpop.f32.mrb[4].mxu0  ;;  %v537_v1 = vpop.f32.mrb[4].mxu1 }
 0x103   : > { %1358 = vpow2.f32 %v1220_v60  ;;  %v1771_v2 = vadd.f32 %v457_v0, %v1734_v38  ;;  %v1774_v3 = vadd.f32 %v537_v1, %v1734_v38  ;;  %v459_v4 = vpop.f32.mrb[5].mxu0  ;;  %v539_v5 = vpop.f32.mrb[5].mxu1 }
 0x104   : > { %1360 = vpow2.f32 %v1252_v61  ;;  %v1777_v6 = vadd.f32 %v459_v4, %v1736_v39  ;;  %v1780_v7 = vadd.f32 %v539_v5, %v1736_v39  ;;  %v461_v8 = vpop.f32.mrb[6].mxu0  ;;  %v541_v9 = vpop.f32.mrb[6].mxu1 }
 0x105   : > { %1362 = vpow2.f32 %v1221_v62  ;;  %v1222_v10 = vmul.f32 -1.442695, %v1771_v2  ;;  %v1254_v11 = vmul.f32 -1.442695, %v1774_v3  ;;  %v1785_v12 = vadd.f32 %v461_v8, %v1734_v38  ;;  %v463_v13 = vpop.f32.mrb[7].mxu0  ;;  %v543_v14 = vpop.f32.mrb[7].mxu1 }
 0x106   : > { %1364 = vpow2.f32 %v1253_v63  ;;  %v1223_v15 = vmul.f32 -1.442695, %v1777_v6  ;;  %v1255_v16 = vmul.f32 -1.442695, %v1780_v7  ;;  %v1797_v49 = vadd.f32 %v541_v9, %v1734_v38 }
 0x107   : > { %1366 = vpow2.f32 %v1222_v10  ;;  %v1224_v17 = vmul.f32 -1.442695, %v1785_v12  ;;  %v1800_v54 = vadd.f32 %v463_v13, %v1736_v39  ;;  %v1806_v60 = vadd.f32 %v543_v14, %v1736_v39 }
 0x108   : > { %1368 = vpow2.f32 %v1254_v11  ;;  %v1256_v10 = vmul.f32 -1.442695, %v1797_v49 }
 0x109   : > { %v1351_v18 = vpop.eup %1350  ;;  %1370 = vpow2.f32 %v1223_v15 }
 0x10a   : > { %v1353_v19 = vpop.eup %1352  ;;  %v798_v20 = vadd.f32 1.0, %v1351_v18  ;;  %1372 = vpow2.f32 %v1255_v16  ;;  %v467_v21 = vpop.f32.mrb[8].mxu0 }
 0x10b   : > { %v547_v22 = vpop.f32.mrb[8].mxu1  ;;  %v1355_v23 = vpop.eup %1354  ;;  %v830_v24 = vadd.f32 1.0, %v1353_v19  ;;  %1374 = vpow2.f32 %v1224_v17  ;;  %v1813_v1 = vadd.f32 %v467_v21, %v1734_v38  ;;  %v1225_v17 = vmul.f32 -1.442695, %v1800_v54 }
 0x10c   : > { %v469_v25 = vpop.f32.mrb[9].mxu0  ;;  %v549_v26 = vpop.f32.mrb[9].mxu1  ;;  %1376 = vrcp.f32 %v798_v20  ;;  %v799_v28 = vadd.f32 1.0, %v1355_v23  ;;  %v1821_v11 = vadd.f32 %v547_v22, %v1734_v38  ;;  %v1257_v22 = vmul.f32 -1.442695, %v1806_v60 }
 0x10d   : > { %v1357_v27 = vpop.eup %1356  ;;  %v471_v29 = vpop.f32.mrb[10].mxu0  ;;  %1378 = vrcp.f32 %v830_v24  ;;  %v1834_v18 = vadd.f32 %v469_v25, %v1736_v39  ;;  %v1841_v23 = vadd.f32 %v549_v26, %v1736_v39 }
 0x10e   : > { %v1790_v30 = vpop.f32.mrb[10].mxu1  ;;  %v1359_v31 = vpop.eup %1358  ;;  %v831_v32 = vadd.f32 1.0, %v1357_v27  ;;  %1380 = vrcp.f32 %v799_v28  ;;  %v1226_v28 = vmul.f32 -1.442695, %v1813_v1  ;;  %v1846_v25 = vadd.f32 %v471_v29, %v1734_v38 }
 0x10f   : > { %v1792_v33 = vpop.f32.mrb[11].mxu0  ;;  %v1361_v34 = vpop.eup %1360  ;;  %v800_v35 = vadd.f32 1.0, %v1359_v31  ;;  %v1853_v26 = vadd.f32 %v1790_v30, %v1734_v38  ;;  %v1227_v29 = vmul.f32 -1.442695, %v1834_v18 }
 0x110   : > { %v1794_v36 = vpop.f32.mrb[11].mxu1  ;;  %v1363_v37 = vpop.eup %1362  ;;  %1382 = vrcp.f32 %v831_v32  ;;  %v832_v40 = vadd.f32 1.0, %v1361_v34  ;;  %v1258_v32 = vmul.f32 -1.442695, %v1821_v11 }
 0x111   : > { %v1365_v41 = vpop.eup %1364  ;;  %1384 = vrcp.f32 %v800_v35  ;;  %v801_v44 = vadd.f32 1.0, %v1363_v37  ;;  %v1860_v35 = vadd.f32 %v1792_v33, %v1736_v39 }
 0x112   : > { %v1367_v45 = vpop.eup %1366  ;;  %1386 = vrcp.f32 %v832_v40  ;;  %v833_v48 = vadd.f32 1.0, %v1365_v41  ;;  %v1802_v55 = vpop.f32.mrb[12].mxu0  ;;  %v1259_v41 = vmul.f32 -1.442695, %v1841_v23 }
 0x113   : > { %v1369_v50 = vpop.eup %1368  ;;  %1388 = vrcp.f32 %v801_v44  ;;  %v802_v51 = vadd.f32 1.0, %v1367_v45  ;;  %v1808_v61 = vpop.f32.mrb[12].mxu1 }
 0x114   : > { %v1371_v56 = vpop.eup %1370  ;;  %1390 = vrcp.f32 %v833_v48  ;;  %v834_v57 = vadd.f32 1.0, %v1369_v50  ;;  %v1810_v62 = vpop.f32.mrb[13].mxu0  ;;  %v1228_v50 = vmul.f32 -1.442695, %v1846_v25 }
 0x115   : > { %v1373_v63 = vpop.eup %1372  ;;  %1392 = vrcp.f32 %v802_v51  ;;  %v803_v0 = vadd.f32 1.0, %v1371_v56  ;;  %v1815_v4 = vpop.f32.mrb[13].mxu1 }
 0x116   : > { %v1817_v5 = vpop.f32.mrb[14].mxu0  ;;  %v1375_v8 = vpop.eup %1374  ;;  %1394 = vrcp.f32 %v834_v57  ;;  %v835_v9 = vadd.f32 1.0, %v1373_v63  ;;  %v1260_v63 = vmul.f32 -1.442695, %v1853_v26 }
 0x117   : > { %v1823_v13 = vpop.f32.mrb[14].mxu1  ;;  %v1825_v14 = vpop.f32.mrb[15].mxu0  ;;  %1396 = vrcp.f32 %v803_v0  ;;  %v804_v16 = vadd.f32 1.0, %v1375_v8 }
 0x118   : > { %v1377_v15 = vpop.eup %1376  ;;  %v1836_v19 = vpop.f32.mrb[15].mxu1  ;;  %1398 = vrcp.f32 %v835_v9 }
 0x119   : > { %v1379_v20 = vpop.eup %1378  ;;  %v990_v21 = vmul.f32 %v1377_v15, %v1739_v42  ;;  %1400 = vrcp.f32 %v804_v16  ;;  %v1903_v16 = vadd.f32 %v1810_v62, %v1736_v39 }
 0x11a   : > { %v1381_v24 = vpop.eup %1380  ;;  %v1022_v27 = vmul.f32 %v1379_v20, %v1742_v43  ;;  %1402 = vpow2.f32 %v1256_v10  ;;  %v1864_v37 = vpop.f32.mrb[16].mxu1  ;;  %v1229_v10 = vmul.f32 -1.442695, %v1860_v35 }
 0x11b   : > { %v1383_v31 = vpop.eup %1382  ;;  %1054 = vst [vmem:[%s1830_s30] sm:$0xff] %v990_v21  ;;  %v991_v42 = vmul.f32 %v1381_v24, %v1745_v46  ;;  %1404 = vpow2.f32 %v1225_v17  ;;  %v1862_v46 = vpop.f32.mrb[16].mxu0 }
 0x11c   : > { %v1385_v34 = vpop.eup %1384  ;;  %1086 = vst [vmem:[%s1830_s30 + $0x100] sm:$0xff] %v1022_v27  ;;  %v1023_v43 = vmul.f32 %v1383_v31, %v1748_v47  ;;  %1406 = vpow2.f32 %v1257_v22  ;;  %v1871_v47 = vadd.f32 %v1794_v36, %v1736_v39  ;;  %v1873_v44 = vpop.f32.mrb[17].mxu0 }
 0x11d   : > { %v1387_v40 = vpop.eup %1386  ;;  %1055 = vst [vmem:[%s1830_s30 + $0x8] sm:$0xff] %v991_v42  ;;  %v992_v30 = vmul.f32 %v1385_v34, %v1753_v52  ;;  %v1875_v33 = vpop.f32.mrb[17].mxu1  ;;  %1408 = vpow2.f32 %v1226_v28  ;;  %v1882_v52 = vadd.f32 %v1802_v55, %v1734_v38  ;;  %v1921_v28 = vadd.f32 %v1815_v4, %v1736_v39 }
 0x11e   : > { %v1389_v45 = vpop.eup %1388  ;;  %1087 = vst [vmem:[%s1830_s30 + $0x108] sm:$0xff] %v1023_v43  ;;  %v1024_v48 = vmul.f32 %v1387_v40, %v1756_v53  ;;  %v1884_v51 = vpop.f32.mrb[18].mxu0  ;;  %1410 = vpow2.f32 %v1258_v32  ;;  %v1891_v53 = vadd.f32 %v1808_v61, %v1734_v38  ;;  %v1261_v61 = vmul.f32 -1.442695, %v1871_v47 }
 0x11f   : > { %v571_v36 = vpop.f32.mrb[18].mxu1  ;;  %v1391_v56 = vpop.eup %1390  ;;  %1056 = vst [vmem:[%s1830_s30 + $0x10] sm:$0xff] %v992_v30  ;;  %v993_v57 = vmul.f32 %v1389_v45, %v1761_v58  ;;  %1412 = vpow2.f32 %v1227_v29  ;;  %v1230_v20 = vmul.f32 -1.442695, %v1882_v52 }
 0x120   : > { %v1893_v0 = vpop.f32.mrb[19].mxu0  ;;  %v573_v55 = vpop.f32.mrb[19].mxu1  ;;  %1088 = vst [vmem:[%s1830_s30 + $0x110] sm:$0xff] %v1024_v48  ;;  %v1025_v9 = vmul.f32 %v1391_v56, %v1764_v59  ;;  %1414 = vpow2.f32 %v1259_v41  ;;  %v1909_v21 = vadd.f32 %v571_v36, %v1734_v38  ;;  %v1262_v24 = vmul.f32 -1.442695, %v1891_v53 }
 0x121   : > { %v1393_v8 = vpop.eup %1392  ;;  %1057 = vst [vmem:[%s1830_s30 + $0x18] sm:$0xff] %v993_v57  ;;  %1416 = vpow2.f32 %v1228_v50  ;;  %v1915_v62 = vadd.f32 %v573_v55, %v1736_v39  ;;  %v1937_v50 = vmul.f32 -1.442695, %v1903_v16 }
 0x122   : > { %v1395_v58 = vpop.eup %1394  ;;  %v994_v15 = vmul.f32 %v1393_v8, %v1771_v2  ;;  %1089 = vst [vmem:[%s1830_s30 + $0x118] sm:$0xff] %v1025_v9  ;;  %1418 = vpow2.f32 %v1260_v63  ;;  %v497_v31 = vpop.f32.mrb[20].mxu0  ;;  %v1943_v8 = vmul.f32 -1.442695, %v1921_v28  ;;  %v1947_v9 = vadd.f32 %v1817_v5, %v1734_v38 }
 0x123   : > { %v1397_v17 = vpop.eup %1396  ;;  %v1026_v59 = vmul.f32 %v1395_v58, %v1774_v3  ;;  %1420 = vpow2.f32 %v1229_v10  ;;  %v577_v42 = vpop.f32.mrb[20].mxu1  ;;  %v1926_v34 = vadd.f32 %v497_v31, %v1734_v38 }
 0x124   : > { %v1399_v2 = vpop.eup %1398  ;;  %1058 = vst [vmem:[%s1830_s30 + $0x20] sm:$0xff] %v994_v15  ;;  %v995_v22 = vmul.f32 %v1397_v17, %v1777_v6  ;;  %1422 = vpow2.f32 %v1261_v61  ;;  %v499_v43 = vpop.f32.mrb[21].mxu0  ;;  %v1930_v4 = vadd.f32 %v577_v42, %v1734_v38  ;;  %v1951_v15 = vadd.f32 %v1823_v13, %v1734_v38 }
 0x125   : > { %v1401_v27 = vpop.eup %1400  ;;  %1090 = vst [vmem:[%s1830_s30 + $0x120] sm:$0xff] %v1026_v59  ;;  %v1027_v3 = vmul.f32 %v1399_v2, %v1780_v7  ;;  %v579_v29 = vpop.f32.mrb[21].mxu1  ;;  %1424 = vpow2.f32 %v1230_v20  ;;  %v1933_v30 = vadd.f32 %v499_v43, %v1736_v39  ;;  %v1970_v31 = vmul.f32 -1.442695, %v1947_v9 }
 0x126   : > { %v1403_v32 = vpop.eup %1402  ;;  %1059 = vst [vmem:[%s1830_s30 + $0x28] sm:$0xff] %v995_v22  ;;  %v996_v6 = vmul.f32 %v1401_v27, %v1785_v12  ;;  %v501_v41 = vpop.f32.mrb[22].mxu0  ;;  %1426 = vpow2.f32 %v1262_v24  ;;  %v1940_v36 = vadd.f32 %v579_v29, %v1736_v39  ;;  %v1964_v24 = vadd.f32 %v1825_v14, %v1736_v39 }
 0x127   : > { %v1405_v40 = vpop.eup %1404  ;;  %1091 = vst [vmem:[%s1830_s30 + $0x128] sm:$0xff] %v1027_v3  ;;  %v836_v7 = vadd.f32 1.0, %v1403_v32  ;;  %v581_v45 = vpop.f32.mrb[22].mxu1  ;;  %v1954_v61 = vadd.f32 %v501_v41, %v1734_v38  ;;  %v1974_v42 = vadd.f32 %v1836_v19, %v1736_v39  ;;  %v1977_v14 = vmul.f32 -1.442695, %v1951_v15 }
 0x128   : > { %v1407_v48 = vpop.eup %1406  ;;  %1060 = vst [vmem:[%s1830_s30 + $0x30] sm:$0xff] %v996_v6  ;;  %v805_v12 = vadd.f32 1.0, %v1405_v40  ;;  %v503_v56 = vpop.f32.mrb[23].mxu0  ;;  %v1957_v20 = vadd.f32 %v581_v45, %v1734_v38 }
 0x129   : > { %v583_v57 = vpop.f32.mrb[23].mxu1  ;;  %v1409_v63 = vpop.eup %1408  ;;  %1428 = vrcp.f32 %v836_v7  ;;  %v837_v55 = vadd.f32 1.0, %v1407_v48  ;;  %v1960_v2 = vadd.f32 %v503_v56, %v1736_v39 }
 0x12a   : > { %v1411_v10 = vpop.eup %1410  ;;  %1430 = vrcp.f32 %v805_v12  ;;  %v806_v58 = vadd.f32 1.0, %v1409_v63  ;;  %v1967_v13 = vadd.f32 %v583_v57, %v1736_v39  ;;  %v507_v32 = vpop.f32.mrb[24].mxu0 }
 0x12b   : > { %v1413_v17 = vpop.eup %1412  ;;  %1432 = vrcp.f32 %v837_v55  ;;  %v838_v59 = vadd.f32 1.0, %v1411_v10  ;;  %v1980_v29 = vadd.f32 %v507_v32, %v1734_v38  ;;  %v587_v40 = vpop.f32.mrb[24].mxu1  ;;  %v1989_v55 = vmul.f32 -1.442695, %v1964_v24 }
 0x12c   : > { %v1415_v5 = vpop.eup %1414  ;;  %1434 = vrcp.f32 %v806_v58  ;;  %v807_v22 = vadd.f32 1.0, %v1413_v17  ;;  %v509_v7 = vpop.f32.mrb[25].mxu0  ;;  %v1983_v48 = vadd.f32 %v587_v40, %v1734_v38 }
 0x12d   : > { %v1417_v27 = vpop.eup %1416  ;;  %1436 = vrcp.f32 %v838_v59  ;;  %v839_v3 = vadd.f32 1.0, %v1415_v5  ;;  %v1986_v19 = vadd.f32 %v509_v7, %v1736_v39  ;;  %v589_v12 = vpop.f32.mrb[25].mxu1 }
 0x12e   : > { %v1419_v6 = vpop.eup %1418  ;;  %1438 = vrcp.f32 %v807_v22  ;;  %v808_v43 = vadd.f32 1.0, %v1417_v27  ;;  %v511_v56 = vpop.f32.mrb[26].mxu0  ;;  %v1992_v10 = vadd.f32 %v589_v12, %v1736_v39  ;;  %v1995_v22 = vmul.f32 -1.442695, %v1974_v42 }
 0x12f   : > { %v1421_v41 = vpop.eup %1420  ;;  %1440 = vrcp.f32 %v839_v3  ;;  %v840_v45 = vadd.f32 1.0, %v1419_v6  ;;  %v591_v58 = vpop.f32.mrb[26].mxu1  ;;  %v1999_v27 = vadd.f32 %v1862_v46, %v1734_v38  ;;  %v2006_v40 = vadd.f32 %v511_v56, %v1734_v38 }
 0x130   : > { %v1423_v57 = vpop.eup %1422  ;;  %1442 = vrcp.f32 %v808_v43  ;;  %v809_v63 = vadd.f32 1.0, %v1421_v41  ;;  %v513_v17 = vpop.f32.mrb[27].mxu0  ;;  %v2003_v43 = vadd.f32 %v1864_v37, %v1734_v38  ;;  %v2017_v37 = vadd.f32 %v1873_v44, %v1736_v39 }
 0x131   : > { %v1425_v59 = vpop.eup %1424  ;;  %1444 = vrcp.f32 %v840_v45  ;;  %v841_v5 = vadd.f32 1.0, %v1423_v57  ;;  %v593_v3 = vpop.f32.mrb[27].mxu1  ;;  %v2009_v45 = vadd.f32 %v591_v58, %v1734_v38  ;;  %v2012_v46 = vadd.f32 %v513_v17, %v1736_v39 }
 0x132   : > { %v1427_v32 = vpop.eup %1426  ;;  %1446 = vrcp.f32 %v809_v63  ;;  %v810_v6 = vadd.f32 1.0, %v1425_v59  ;;  %v2020_v56 = vadd.f32 %v593_v3, %v1736_v39  ;;  %v1234_v58 = vmul.f32 -1.442695, %v1999_v27 }
 0x133   : > { %v1429_v7 = vpop.eup %1428  ;;  %1448 = vrcp.f32 %v841_v5  ;;  %v842_v41 = vadd.f32 1.0, %v1427_v32  ;;  %v2026_v17 = vadd.f32 %v1875_v33, %v1736_v39  ;;  %v597_v5 = vpop.f32.mrb[28].mxu1  ;;  %v1266_v3 = vmul.f32 -1.442695, %v2003_v43 }
 0x134   : > { %v1431_v12 = vpop.eup %1430  ;;  %v1028_v57 = vmul.f32 %v1429_v7, %v1797_v49  ;;  %1450 = vrcp.f32 %v810_v6  ;;  %v517_v49 = vpop.f32.mrb[28].mxu0 }
 0x135   : > { %v1433_v63 = vpop.eup %1432  ;;  %v997_v59 = vmul.f32 %v1431_v12, %v1800_v54  ;;  %1452 = vrcp.f32 %v842_v41  ;;  %v2033_v54 = vadd.f32 %v517_v49, %v1734_v38  ;;  %v519_v6 = vpop.f32.mrb[29].mxu0  ;;  %v2039_v12 = vadd.f32 %v597_v5, %v1734_v38 }
 0x136   : > { %v1435_v32 = vpop.eup %1434  ;;  %1092 = vst [vmem:[%s1830_s30 + $0x130] sm:$0xff] %v1028_v57  ;;  %v1029_v44 = vmul.f32 %v1433_v63, %v1806_v60  ;;  %1454 = vpow2.f32 %v1937_v50  ;;  %v599_v7 = vpop.f32.mrb[29].mxu1  ;;  %v2042_v60 = vadd.f32 %v519_v6, %v1736_v39 }
 0x137   : > { %v1437_v41 = vpop.eup %1436  ;;  %1061 = vst [vmem:[%s1830_s30 + $0x38] sm:$0xff] %v997_v59  ;;  %v998_v33 = vmul.f32 %v1435_v32, %v1813_v1  ;;  %1456 = vpow2.f32 %v1943_v8  ;;  %v521_v50 = vpop.f32.mrb[30].mxu0  ;;  %v2049_v1 = vadd.f32 %v1884_v51, %v1734_v38  ;;  %v2052_v8 = vadd.f32 %v599_v7, %v1736_v39 }
 0x138   : > { %v601_v57 = vpop.f32.mrb[30].mxu1  ;;  %v1439_v63 = vpop.eup %1438  ;;  %1093 = vst [vmem:[%s1830_s30 + $0x138] sm:$0xff] %v1029_v44  ;;  %v1030_v49 = vmul.f32 %v1437_v41, %v1821_v11  ;;  %1458 = vpow2.f32 %v1970_v31  ;;  %v1235_v11 = vmul.f32 -1.442695, %v2017_v37  ;;  %v1267_v31 = vmul.f32 -1.442695, %v2026_v17 }
 0x139   : > { %v523_v59 = vpop.f32.mrb[31].mxu0  ;;  %v603_v5 = vpop.f32.mrb[31].mxu1  ;;  %1062 = vst [vmem:[%s1830_s30 + $0x40] sm:$0xff] %v998_v33  ;;  %v999_v6 = vmul.f32 %v1439_v63, %v1834_v18  ;;  %1460 = vpow2.f32 %v1977_v14  ;;  %v2064_v7 = vadd.f32 %v1893_v0, %v1736_v39  ;;  %v2067_v18 = vadd.f32 %v521_v50, %v1734_v38 }
 0x13a   : > { %v1441_v32 = vpop.eup %1440  ;;  %1094 = vst [vmem:[%s1830_s30 + $0x140] sm:$0xff] %v1030_v49  ;;  %1462 = vpow2.f32 %v1989_v55  ;;  %v2073_v33 = vadd.f32 %v601_v57, %v1734_v38  ;;  %v1236_v50 = vmul.f32 -1.442695, %v2049_v1  ;;  %v2082_v63 = vadd.f32 %v603_v5, %v1736_v39 }
 0x13b   : > { %v1443_v44 = vpop.eup %1442  ;;  %v1031_v51 = vmul.f32 %v1441_v32, %v1841_v23  ;;  %1063 = vst [vmem:[%s1830_s30 + $0x48] sm:$0xff] %v999_v6  ;;  %1464 = vpow2.f32 %v1995_v22  ;;  %v2076_v23 = vadd.f32 %v523_v59, %v1736_v39  ;;  %v1268_v22 = vmul.f32 -1.442695, %v1909_v21 }
 0x13c   : > { %v1445_v14 = vpop.eup %1444  ;;  %v1000_v41 = vmul.f32 %v1443_v44, %v1846_v25  ;;  %1466 = vpow2.f32 %v1234_v58 }
 0x13d   : > { %v1447_v55 = vpop.eup %1446  ;;  %1095 = vst [vmem:[%s1830_s30 + $0x148] sm:$0xff] %v1031_v51  ;;  %v1032_v0 = vmul.f32 %v1445_v14, %v1853_v26  ;;  %1468 = vpow2.f32 %v1266_v3  ;;  %v1237_v26 = vmul.f32 -1.442695, %v2064_v7 }
 0x13e   : > { %v1449_v25 = vpop.eup %1448  ;;  %1064 = vst [vmem:[%s1830_s30 + $0x50] sm:$0xff] %v1000_v41  ;;  %v1001_v38 = vmul.f32 %v1447_v55, %v1860_v35  ;;  %1470 = vpow2.f32 %v1235_v11 }
 0x13f   : > { %v1451_v57 = vpop.eup %1450  ;;  %1096 = vst [vmem:[%s1830_s30 + $0x150] sm:$0xff] %v1032_v0  ;;  %v1033_v49 = vmul.f32 %v1449_v25, %v1871_v47  ;;  %1472 = vpow2.f32 %v1267_v31 }
 0x140   : > { %v1453_v58 = vpop.eup %1452  ;;  %1065 = vst [vmem:[%s1830_s30 + $0x58] sm:$0xff] %v1001_v38  ;;  %v1002_v39 = vmul.f32 %v1451_v57, %v1882_v52  ;;  %1474 = vpow2.f32 %v1236_v50 }
 0x141   : > { %v1455_v59 = vpop.eup %1454  ;;  %1097 = vst [vmem:[%s1830_s30 + $0x158] sm:$0xff] %v1033_v49  ;;  %v1034_v35 = vmul.f32 %v1453_v58, %v1891_v53  ;;  %1476 = vpow2.f32 %v1268_v22 }
 0x142   : > { %v1457_v3 = vpop.eup %1456  ;;  %1066 = vst [vmem:[%s1830_s30 + $0x60] sm:$0xff] %v1002_v39  ;;  %v811_v5 = vadd.f32 1.0, %v1455_v59  ;;  %1478 = vpow2.f32 %v1237_v26  ;;  %v1269_v59 = vmul.f32 -1.442695, %v1915_v62 }
 0x143   : > { %v1459_v32 = vpop.eup %1458  ;;  %1098 = vst [vmem:[%s1830_s30 + $0x160] sm:$0xff] %v1034_v35  ;;  %v843_v47 = vadd.f32 1.0, %v1457_v3 }
 0x144   : > { %v1461_v6 = vpop.eup %1460  ;;  %1480 = vrcp.f32 %v811_v5  ;;  %v812_v11 = vadd.f32 1.0, %v1459_v32  ;;  %v1238_v5 = vmul.f32 -1.442695, %v1926_v34 }
 0x145   : > { %v1463_v44 = vpop.eup %1462  ;;  %1482 = vrcp.f32 %v843_v47  ;;  %v844_v52 = vadd.f32 1.0, %v1461_v6  ;;  %v1270_v6 = vmul.f32 -1.442695, %v1930_v4 }
 0x146   : > { %v1465_v31 = vpop.eup %1464  ;;  %1484 = vrcp.f32 %v812_v11  ;;  %v813_v51 = vadd.f32 1.0, %v1463_v44 }
 0x147   : > { %v1467_v14 = vpop.eup %1466  ;;  %1486 = vrcp.f32 %v844_v52  ;;  %v845_v53 = vadd.f32 1.0, %v1465_v31  ;;  %v1239_v52 = vmul.f32 -1.442695, %v1933_v30 }
 0x148   : > { %v1469_v41 = vpop.eup %1468  ;;  %1488 = vrcp.f32 %v813_v51  ;;  %v814_v55 = vadd.f32 1.0, %v1467_v14  ;;  %v1271_v14 = vmul.f32 -1.442695, %v1940_v36 }
 0x149   : > { %v1471_v0 = vpop.eup %1470  ;;  %1490 = vrcp.f32 %v845_v53  ;;  %v846_v50 = vadd.f32 1.0, %v1469_v41  ;;  %v1240_v41 = vmul.f32 -1.442695, %v1954_v61 }
 0x14a   : > { %v1473_v25 = vpop.eup %1472  ;;  %1492 = vrcp.f32 %v814_v55  ;;  %v815_v38 = vadd.f32 1.0, %v1471_v0  ;;  %v1272_v0 = vmul.f32 -1.442695, %v1957_v20 }
 0x14b   : > { %v1475_v22 = vpop.eup %1474  ;;  %1494 = vrcp.f32 %v846_v50  ;;  %v847_v57 = vadd.f32 1.0, %v1473_v25  ;;  %v1241_v25 = vmul.f32 -1.442695, %v1960_v2 }
 0x14c   : > { %v1477_v49 = vpop.eup %1476  ;;  %1496 = vrcp.f32 %v815_v38  ;;  %v816_v26 = vadd.f32 1.0, %v1475_v22  ;;  %v1273_v22 = vmul.f32 -1.442695, %v1967_v13 }
 0x14d   : > { %v1479_v58 = vpop.eup %1478  ;;  %1498 = vrcp.f32 %v847_v57  ;;  %v848_v39 = vadd.f32 1.0, %v1477_v49  ;;  %v1242_v49 = vmul.f32 -1.442695, %v1980_v29 }
 0x14e   : > { %v1481_v35 = vpop.eup %1480  ;;  %1500 = vrcp.f32 %v816_v26  ;;  %v817_v3 = vadd.f32 1.0, %v1479_v58  ;;  %v1274_v58 = vmul.f32 -1.442695, %v1983_v48 }
 0x14f   : > { %v1483_v32 = vpop.eup %1482  ;;  %v1003_v47 = vmul.f32 %v1481_v35, %v1903_v16  ;;  %1502 = vrcp.f32 %v848_v39 }
 0x150   : > { %v1485_v11 = vpop.eup %1484  ;;  %v1035_v44 = vmul.f32 %v1483_v32, %v1921_v28  ;;  %1504 = vrcp.f32 %v817_v3 }
 0x151   : > { %v1487_v31 = vpop.eup %1486  ;;  %1067 = vst [vmem:[%s1830_s30 + $0x68] sm:$0xff] %v1003_v47  ;;  %v1004_v51 = vmul.f32 %v1485_v11, %v1947_v9  ;;  %1506 = vpow2.f32 %v1269_v59 }
 0x152   : > { %v1489_v53 = vpop.eup %1488  ;;  %1099 = vst [vmem:[%s1830_s30 + $0x168] sm:$0xff] %v1035_v44  ;;  %v1036_v16 = vmul.f32 %v1487_v31, %v1951_v15  ;;  %1508 = vpow2.f32 %v1238_v5 }
 0x153   : > { %v1491_v28 = vpop.eup %1490  ;;  %1068 = vst [vmem:[%s1830_s30 + $0x70] sm:$0xff] %v1004_v51  ;;  %v1005_v55 = vmul.f32 %v1489_v53, %v1964_v24  ;;  %1510 = vpow2.f32 %v1270_v6 }
 0x154   : > { %v1493_v9 = vpop.eup %1492  ;;  %1100 = vst [vmem:[%s1830_s30 + $0x170] sm:$0xff] %v1036_v16  ;;  %v1037_v50 = vmul.f32 %v1491_v28, %v1974_v42  ;;  %1512 = vpow2.f32 %v1239_v52 }
 0x155   : > { %v1495_v15 = vpop.eup %1494  ;;  %1069 = vst [vmem:[%s1830_s30 + $0x78] sm:$0xff] %v1005_v55  ;;  %v1006_v38 = vmul.f32 %v1493_v9, %v1999_v27  ;;  %1514 = vpow2.f32 %v1271_v14 }
 0x156   : > { %v1497_v24 = vpop.eup %1496  ;;  %1101 = vst [vmem:[%s1830_s30 + $0x178] sm:$0xff] %v1037_v50  ;;  %v1038_v57 = vmul.f32 %v1495_v15, %v2003_v43  ;;  %1516 = vpow2.f32 %v1240_v41  ;;  %v1243_v43 = vmul.f32 -1.442695, %v1986_v19 }
 0x157   : > { %v1499_v42 = vpop.eup %1498  ;;  %1070 = vst [vmem:[%s1830_s30 + $0x80] sm:$0xff] %v1006_v38  ;;  %v1007_v26 = vmul.f32 %v1497_v24, %v2017_v37  ;;  %1518 = vpow2.f32 %v1272_v0  ;;  %v1275_v37 = vmul.f32 -1.442695, %v1992_v10 }
 0x158   : > { %v1501_v27 = vpop.eup %1500  ;;  %1102 = vst [vmem:[%s1830_s30 + $0x180] sm:$0xff] %v1038_v57  ;;  %v1039_v39 = vmul.f32 %v1499_v42, %v2026_v17  ;;  %1520 = vpow2.f32 %v1241_v25  ;;  %v1244_v57 = vmul.f32 -1.442695, %v2006_v40 }
 0x159   : > { %v1503_v59 = vpop.eup %1502  ;;  %1071 = vst [vmem:[%s1830_s30 + $0x88] sm:$0xff] %v1007_v26  ;;  %v1008_v35 = vmul.f32 %v1501_v27, %v2049_v1  ;;  %1522 = vpow2.f32 %v1273_v22  ;;  %v1276_v26 = vmul.f32 -1.442695, %v2009_v45 }
 0x15a   : > { %v1505_v3 = vpop.eup %1504  ;;  %1103 = vst [vmem:[%s1830_s30 + $0x188] sm:$0xff] %v1039_v39  ;;  %v1040_v5 = vmul.f32 %v1503_v59, %v1909_v21  ;;  %1524 = vpow2.f32 %v1242_v49  ;;  %v1245_v39 = vmul.f32 -1.442695, %v2012_v46 }
 0x15b   : > { %v1507_v32 = vpop.eup %1506  ;;  %1072 = vst [vmem:[%s1830_s30 + $0x90] sm:$0xff] %v1008_v35  ;;  %v1009_v17 = vmul.f32 %v1505_v3, %v2064_v7  ;;  %1526 = vpow2.f32 %v1274_v58  ;;  %v1277_v35 = vmul.f32 -1.442695, %v2020_v56 }
 0x15c   : > { %v1509_v47 = vpop.eup %1508  ;;  %1104 = vst [vmem:[%s1830_s30 + $0x190] sm:$0xff] %v1040_v5  ;;  %v849_v6 = vadd.f32 1.0, %v1507_v32  ;;  %1528 = vpow2.f32 %v1243_v43  ;;  %v1246_v5 = vmul.f32 -1.442695, %v2033_v54 }
 0x15d   : > { %v1511_v11 = vpop.eup %1510  ;;  %1073 = vst [vmem:[%s1830_s30 + $0x98] sm:$0xff] %v1009_v17  ;;  %v818_v1 = vadd.f32 1.0, %v1509_v47  ;;  %1530 = vpow2.f32 %v1275_v37  ;;  %v1278_v17 = vmul.f32 -1.442695, %v2039_v12 }
 0x15e   : > { %v1513_v44 = vpop.eup %1512  ;;  %1532 = vrcp.f32 %v849_v6  ;;  %v850_v52 = vadd.f32 1.0, %v1511_v11  ;;  %v1247_v6 = vmul.f32 -1.442695, %v2042_v60 }
 0x15f   : > { %v1515_v31 = vpop.eup %1514  ;;  %1534 = vrcp.f32 %v818_v1  ;;  %v819_v21 = vadd.f32 1.0, %v1513_v44  ;;  %v1279_v1 = vmul.f32 -1.442695, %v2052_v8 }
 0x160   : > { %v1517_v51 = vpop.eup %1516  ;;  %1536 = vrcp.f32 %v850_v52  ;;  %v851_v14 = vadd.f32 1.0, %v1515_v31  ;;  %v1248_v52 = vmul.f32 -1.442695, %v2067_v18 }
 0x161   : > { %v1519_v53 = vpop.eup %1518  ;;  %1538 = vrcp.f32 %v819_v21  ;;  %v820_v7 = vadd.f32 1.0, %v1517_v51  ;;  %v1280_v21 = vmul.f32 -1.442695, %v2073_v33 }
 0x162   : > { %v1521_v16 = vpop.eup %1520  ;;  %1540 = vrcp.f32 %v851_v14  ;;  %v852_v41 = vadd.f32 1.0, %v1519_v53 }
 0x163   : > { %v1523_v28 = vpop.eup %1522  ;;  %1542 = vrcp.f32 %v820_v7  ;;  %v821_v55 = vadd.f32 1.0, %v1521_v16 }
 0x164   : > { %v1525_v0 = vpop.eup %1524  ;;  %1544 = vrcp.f32 %v852_v41  ;;  %v853_v9 = vadd.f32 1.0, %v1523_v28 }
 0x165   : > { %v1527_v50 = vpop.eup %1526  ;;  %1546 = vrcp.f32 %v821_v55  ;;  %v822_v25 = vadd.f32 1.0, %v1525_v0 }
 0x166   : > { %v1529_v15 = vpop.eup %1528  ;;  %1548 = vrcp.f32 %v853_v9  ;;  %v854_v38 = vadd.f32 1.0, %v1527_v50 }
 0x167   : > { %v1531_v22 = vpop.eup %1530  ;;  %1550 = vrcp.f32 %v822_v25  ;;  %v823_v24 = vadd.f32 1.0, %v1529_v15 }
 0x168   : > { %v1533_v49 = vpop.eup %1532  ;;  %1552 = vrcp.f32 %v854_v38  ;;  %v855_v42 = vadd.f32 1.0, %v1531_v22 }
 0x169   : > { %v1535_v58 = vpop.eup %1534  ;;  %v1041_v27 = vmul.f32 %v1533_v49, %v1915_v62  ;;  %1554 = vrcp.f32 %v823_v24 }
 0x16a   : > { %v1537_v43 = vpop.eup %1536  ;;  %v1010_v59 = vmul.f32 %v1535_v58, %v1926_v34  ;;  %1556 = vrcp.f32 %v855_v42 }
 0x16b   : > { %v1539_v37 = vpop.eup %1538  ;;  %1105 = vst [vmem:[%s1830_s30 + $0x198] sm:$0xff] %v1041_v27  ;;  %v1042_v3 = vmul.f32 %v1537_v43, %v1930_v4  ;;  %1558 = vpow2.f32 %v1244_v57 }
 0x16c   : > { %v1541_v32 = vpop.eup %1540  ;;  %1074 = vst [vmem:[%s1830_s30 + $0xa0] sm:$0xff] %v1010_v59  ;;  %v1011_v62 = vmul.f32 %v1539_v37, %v1933_v30  ;;  %1560 = vpow2.f32 %v1276_v26 }
 0x16d   : > { %v1543_v34 = vpop.eup %1542  ;;  %1106 = vst [vmem:[%s1830_s30 + $0x1a0] sm:$0xff] %v1042_v3  ;;  %v1043_v47 = vmul.f32 %v1541_v32, %v1940_v36  ;;  %1562 = vpow2.f32 %v1245_v39 }
 0x16e   : > { %v1545_v4 = vpop.eup %1544  ;;  %1075 = vst [vmem:[%s1830_s30 + $0xa8] sm:$0xff] %v1011_v62  ;;  %v1012_v11 = vmul.f32 %v1543_v34, %v1954_v61  ;;  %1564 = vpow2.f32 %v1277_v35 }
 0x16f   : > { %v1547_v30 = vpop.eup %1546  ;;  %1107 = vst [vmem:[%s1830_s30 + $0x1a8] sm:$0xff] %v1043_v47  ;;  %v1044_v44 = vmul.f32 %v1545_v4, %v1957_v20  ;;  %1566 = vpow2.f32 %v1246_v5  ;;  %v1249_v20 = vmul.f32 -1.442695, %v2076_v23 }
 0x170   : > { %v1549_v36 = vpop.eup %1548  ;;  %1076 = vst [vmem:[%s1830_s30 + $0xb0] sm:$0xff] %v1012_v11  ;;  %v1013_v31 = vmul.f32 %v1547_v30, %v1960_v2  ;;  %1568 = vpow2.f32 %v1278_v17  ;;  %v1281_v2 = vmul.f32 -1.442695, %v2082_v63 }
 0x171   : > { %v1551_v61 = vpop.eup %1550  ;;  %1108 = vst [vmem:[%s1830_s30 + $0x1b0] sm:$0xff] %v1044_v44  ;;  %v1045_v51 = vmul.f32 %v1549_v36, %v1967_v13  ;;  %1570 = vpow2.f32 %v1247_v6 }
 0x172   : > { %v1553_v14 = vpop.eup %1552  ;;  %1077 = vst [vmem:[%s1830_s30 + $0xb8] sm:$0xff] %v1013_v31  ;;  %v1014_v53 = vmul.f32 %v1551_v61, %v1980_v29  ;;  %1572 = vpow2.f32 %v1279_v1 }
 0x173   : > { %v1555_v7 = vpop.eup %1554  ;;  %1109 = vst [vmem:[%s1830_s30 + $0x1b8] sm:$0xff] %v1045_v51  ;;  %v1046_v16 = vmul.f32 %v1553_v14, %v1983_v48  ;;  %1574 = vpow2.f32 %v1248_v52 }
 0x174   : > { %v1557_v41 = vpop.eup %1556  ;;  %1078 = vst [vmem:[%s1830_s30 + $0xc0] sm:$0xff] %v1014_v53  ;;  %v1015_v13 = vmul.f32 %v1555_v7, %v1986_v19  ;;  %1576 = vpow2.f32 %v1280_v21 }
 0x175   : > { %v1559_v28 = vpop.eup %1558  ;;  %1110 = vst [vmem:[%s1830_s30 + $0x1c0] sm:$0xff] %v1046_v16  ;;  %v1047_v55 = vmul.f32 %v1557_v41, %v1992_v10  ;;  %1578 = vpow2.f32 %v1249_v20 }
 0x176   : > { %v1561_v29 = vpop.eup %1560  ;;  %1079 = vst [vmem:[%s1830_s30 + $0xc8] sm:$0xff] %v1015_v13  ;;  %v824_v0 = vadd.f32 1.0, %v1559_v28  ;;  %1580 = vpow2.f32 %v1281_v2 }
 0x177   : > { %v1563_v9 = vpop.eup %1562  ;;  %1111 = vst [vmem:[%s1830_s30 + $0x1c8] sm:$0xff] %v1047_v55  ;;  %v856_v50 = vadd.f32 1.0, %v1561_v29 }
 0x178   : > { %v1565_v25 = vpop.eup %1564  ;;  %1582 = vrcp.f32 %v824_v0  ;;  %v825_v48 = vadd.f32 1.0, %v1563_v9 }
 0x179   : > { %v1567_v15 = vpop.eup %1566  ;;  %1584 = vrcp.f32 %v856_v50  ;;  %v857_v38 = vadd.f32 1.0, %v1565_v25 }
 0x17a   : > { %v1569_v19 = vpop.eup %1568  ;;  %1586 = vrcp.f32 %v825_v48  ;;  %v826_v22 = vadd.f32 1.0, %v1567_v15 }
 0x17b   : > { %v1571_v24 = vpop.eup %1570  ;;  %1588 = vrcp.f32 %v857_v38  ;;  %v858_v10 = vadd.f32 1.0, %v1569_v19 }
 0x17c   : > { %v1573_v57 = vpop.eup %1572  ;;  %1590 = vrcp.f32 %v826_v22  ;;  %v827_v49 = vadd.f32 1.0, %v1571_v24 }
 0x17d   : > { %v1575_v42 = vpop.eup %1574  ;;  %1592 = vrcp.f32 %v858_v10  ;;  %v859_v26 = vadd.f32 1.0, %v1573_v57 }
 0x17e   : > { %v1577_v58 = vpop.eup %1576  ;;  %1594 = vrcp.f32 %v827_v49  ;;  %v828_v27 = vadd.f32 1.0, %v1575_v42 }
 0x17f   : > { %v1579_v39 = vpop.eup %1578  ;;  %1596 = vrcp.f32 %v859_v26  ;;  %v860_v43 = vadd.f32 1.0, %v1577_v58 }
 0x180   : > { %v1581_v59 = vpop.eup %1580  ;;  %1598 = vrcp.f32 %v828_v27  ;;  %v829_v35 = vadd.f32 1.0, %v1579_v39 }
 0x181   : > { %1600 = vrcp.f32 %v860_v43  ;;  %v861_v37 = vadd.f32 1.0, %v1581_v59 }
 0x182   : > { %v1583_v3 = vpop.eup %1582  ;;  %1602 = vrcp.f32 %v829_v35 }
 0x183   : > { %v1585_v5 = vpop.eup %1584  ;;  %v1016_v32 = vmul.f32 %v1583_v3, %v2006_v40  ;;  %1604 = vrcp.f32 %v861_v37 }
 0x184   : > { %v1587_v62 = vpop.eup %1586  ;;  %v1048_v17 = vmul.f32 %v1585_v5, %v2009_v45 }
 0x185   : > { %v1589_v34 = vpop.eup %1588  ;;  %1080 = vst [vmem:[%s1830_s30 + $0xd0] sm:$0xff] %v1016_v32  ;;  %v1017_v47 = vmul.f32 %v1587_v62, %v2012_v46 }
 0x186   : > { %v1591_v6 = vpop.eup %1590  ;;  %1112 = vst [vmem:[%s1830_s30 + $0x1d0] sm:$0xff] %v1048_v17  ;;  %v1049_v4 = vmul.f32 %v1589_v34, %v2020_v56 }
 0x187   : > { %v1593_v11 = vpop.eup %1592  ;;  %1081 = vst [vmem:[%s1830_s30 + $0xd8] sm:$0xff] %v1017_v47  ;;  %v1018_v40 = vmul.f32 %v1591_v6, %v2033_v54 }
 0x188   : > { %v1595_v1 = vpop.eup %1594  ;;  %1113 = vst [vmem:[%s1830_s30 + $0x1d8] sm:$0xff] %v1049_v4  ;;  %v1050_v45 = vmul.f32 %v1593_v11, %v2039_v12 }
 0x189   : > { %v1597_v30 = vpop.eup %1596  ;;  %1082 = vst [vmem:[%s1830_s30 + $0xe0] sm:$0xff] %v1018_v40  ;;  %v1019_v46 = vmul.f32 %v1595_v1, %v2042_v60 }
 0x18a   : > { %v1599_v44 = vpop.eup %1598  ;;  %1114 = vst [vmem:[%s1830_s30 + $0x1e0] sm:$0xff] %v1050_v45  ;;  %v1051_v56 = vmul.f32 %v1597_v30, %v2052_v8 }
 0x18b   : > { %v1601_v52 = vpop.eup %1600  ;;  %1083 = vst [vmem:[%s1830_s30 + $0xe8] sm:$0xff] %v1019_v46  ;;  %v1020_v54 = vmul.f32 %v1599_v44, %v2067_v18 }
 0x18c   : > { %v1603_v36 = vpop.eup %1602  ;;  %1115 = vst [vmem:[%s1830_s30 + $0x1e8] sm:$0xff] %v1051_v56  ;;  %v1052_v31 = vmul.f32 %v1601_v52, %v2073_v33 }
 0x18d   : > { %v1605_v12 = vpop.eup %1604  ;;  %1084 = vst [vmem:[%s1830_s30 + $0xf0] sm:$0xff] %v1020_v54  ;;  %v1021_v21 = vmul.f32 %v1603_v36, %v2076_v23 }
 0x18e   : > { %1116 = vst [vmem:[%s1830_s30 + $0x1f0] sm:$0xff] %v1052_v31  ;;  %v1053_v60 = vmul.f32 %v1605_v12, %v2082_v63 }
 0x18f   : > { %1085 = vst [vmem:[%s1830_s30 + $0xf8] sm:$0xff] %v1021_v21 }
 0x190   : > { %1117 = vst [vmem:[%s1830_s30 + $0x1f8] sm:$0xff] %v1053_v60 }
 0x191 PF: > { %s13_s12 = sadd.s32 1, %s1612_s12  }
 0x192   : > { %p10_p4 = scmp.ge.s32.totalorder %s13_s12, 4  }
 0x194   :  { %12 = sbr.rel (!%p10_p4) target bundleno = 1 (0x1), region = 62 }

// kernel: transformer_no_encoder_forward.4
= control target key start
LH: loop header
LB: loop body
LE: loop exit
PB: predicated region body
PF: predicated region fallthrough
CT: control target
= control target key end

     0   :  { %s2892_s12 = smov 0   ;;  %s3418_s0 = inlined_call_operand.vmem [shape: bf16[512,640], index: 0, kind: input, shape index: {}]   ;;  %s3419_s1 = inlined_call_operand.vmem [shape: bf16[640,128], index: 1, kind: input, shape index: {}]   ;;  %s3420_s2 = inlined_call_operand.vmem [shape: f32[1,128], index: 2, kind: input, shape index: {}]   ;;  %s3421_s3 = inlined_call_operand.vmem [shape: bf16[512,128], index: 3, kind: output, shape index: {}]  }
   0x1 LB: > { %s1940_s13 = sadd.s32 4294967295, %s2870_s12   ;;  %p1944_p0 = scmp.ge.s32.totalorder %s2870_s12, 1  ;;  %s2870_s12 = sphi %s2892_s12, %s13_s12  }
   0x2   : > { %p139_p1 = scmp.lt.s32.totalorder %s2870_s12, 3 }
   0x4   : > { %p140_p2 = pnand %p1944_p0, %p139_p1 }
   0x5   : > { %v2584_v0 = vld [vmem:[%s3419_s1 + $0x40] sm:$0xff] (!%p140_p2)   ;;  %s1945_s16 = sshll.u32 (!%p140_p2), %s1940_s13, 5  ;;  %v2586_v2 = vld [vmem:[%s3419_s1 + $0x48] sm:$0xff] (!%p140_p2)   ;;  %v2588_v4 = vld [vmem:[%s3419_s1 + $0x50] sm:$0xff] (!%p140_p2)  }
   0x6   : > { %143 = sbr.rel (%p140_p2) target bundleno = 445 (0x1bd), region = 32  ;;  %v2585_v1 = vld [vmem:[%s3419_s1] sm:$0xff] (!%p140_p2)   ;;  %2263 = vmatprep.subr.bf16.mxu0 (!%p140_p2), %v2584_v0  ;;  %2559 = vmatprep.subr.bf16.mxu1 (!%p140_p2), %v2584_v0  ;;  %p165_p3 = scmp.lt.s32.totalorder (!%p140_p2), %s1945_s16, 63  ;;  %v2587_v3 = vld [vmem:[%s3419_s1 + $0x8] sm:$0xff] (!%p140_p2)   ;;  %v2589_v5 = vld [vmem:[%s3419_s1 + $0x10] sm:$0xff] (!%p140_p2)  }
   0x7   : > { %2264 = vmatpush3.bf16.msra.mxu0 (!%p140_p2), %v2585_v1  ;;  %2567 = vmatpush3.bf16.msra.mxu1 (!%p140_p2), %v2585_v1  ;;  %v2590_v6 = vld [vmem:[%s3419_s1 + $0x58] sm:$0xff] (!%p140_p2)   ;;  %v2592_v8 = vld [vmem:[%s3419_s1 + $0x60] sm:$0xff] (!%p140_p2)   ;;  %v2594_v10 = vld [vmem:[%s3419_s1 + $0x68] sm:$0xff] (!%p140_p2)  }
   0x8   : > { %2265 = vmatprep.subr.bf16.mxu0 (!%p140_p2), %v2586_v2  ;;  %2560 = vmatprep.subr.bf16.mxu1 (!%p140_p2), %v2586_v2  ;;  %v2591_v7 = vld [vmem:[%s3419_s1 + $0x18] sm:$0xff] (!%p140_p2)   ;;  %v2593_v9 = vld [vmem:[%s3419_s1 + $0x20] sm:$0xff] (!%p140_p2)   ;;  %v2595_v13 = vld [vmem:[%s3419_s1 + $0x28] sm:$0xff] (!%p140_p2)  }
   0x9   : > { %v2596_v14 = vld [vmem:[%s3419_s1 + $0x70] sm:$0xff] (!%p140_p2)   ;;  %v2598_v16 = vld [vmem:[%s3419_s1 + $0x78] sm:$0xff] (!%p140_p2)   ;;  %v2606_v18 = vld [vmem:[%s3419_s1 + $0xc0] sm:$0xff] (!%p140_p2)  }
   0xa   : > { %v2597_v15 = vld [vmem:[%s3419_s1 + $0x30] sm:$0xff] (!%p140_p2)   ;;  %v2599_v17 = vld [vmem:[%s3419_s1 + $0x38] sm:$0xff] (!%p140_p2)   ;;  %v2609_v19 = vld [vmem:[%s3419_s1 + $0x100] sm:$0xff] (!%p140_p2)  }
   0xb   : > { %2266 = vmatpush3.bf16.msra.mxu0 (!%p140_p2), %v2587_v3  ;;  %2568 = vmatpush3.bf16.msra.mxu1 (!%p140_p2), %v2587_v3  ;;  %v2607_v22 = vld [vmem:[%s3419_s1 + $0x80] sm:$0xff] (!%p140_p2)   ;;  %v2608_v23 = vld [vmem:[%s3419_s1 + $0xc8] sm:$0xff] (!%p140_p2)   ;;  %v2617_v29 = vld [vmem:[%s3419_s1 + $0xd0] sm:$0xff] (!%p140_p2)  }
   0xc   : > { %2267 = vmatprep.subr.bf16.mxu0 (!%p140_p2), %v2588_v4  ;;  %2561 = vmatprep.subr.bf16.mxu1 (!%p140_p2), %v2588_v4  ;;  %v2628_v26 = vld [vmem:[%s3419_s1 + $0x108] sm:$0xff] (!%p140_p2)   ;;  %v2618_v31 = vld [vmem:[%s3419_s1 + $0x90] sm:$0xff] (!%p140_p2)   ;;  %v2619_v33 = vld [vmem:[%s3419_s1 + $0xd8] sm:$0xff] (!%p140_p2)  }
   0xd   : > { %s3423_s16 = smov (!%p165_p3, %s1945_s16), 63  ;;  %v2610_v27 = vld [vmem:[%s3419_s1 + $0x88] sm:$0xff]   ;;  %v2620_v35 = vld [vmem:[%s3419_s1 + $0x98] sm:$0xff]   ;;  %v2627_v36 = vld [vmem:[%s3419_s1 + $0xe0] sm:$0xff]  }
   0xe   : > { %s2575_s29 = smul.u32 20, %s3423_s16  ;;  %v2641_v38 = vld [vmem:[%s3419_s1 + $0x110] sm:$0xff]   ;;  %v2629_v40 = vld [vmem:[%s3419_s1 + $0xa0] sm:$0xff]   ;;  %v2630_v41 = vld [vmem:[%s3419_s1 + $0xe8] sm:$0xff]   ;;  %s1948_s27 = sshll.u32 %s3423_s16, 2 }
   0xf   : > { %2268 = vmatpush3.bf16.msra.mxu0 %v2589_v5  ;;  %2569 = vmatpush3.bf16.msra.mxu1 %v2589_v5  ;;  %v2631_v44 = vld [vmem:[%s3419_s1 + $0xa8] sm:$0xff]   ;;  %v2655_v45 = vld [vmem:[%s3419_s1 + $0x118] sm:$0xff]   ;;  %v2638_v48 = vld [vmem:[%s3419_s1 + $0xf0] sm:$0xff]  }
  0x10   : > { %2269 = vmatprep.subr.bf16.mxu0 %v2590_v6  ;;  %2562 = vmatprep.subr.bf16.mxu1 %v2590_v6  ;;  %s2933_s9 = scalar_lea.vmem %s3418_s0, %s2575_s29  ;;  %v2639_v49 = vld [vmem:[%s3419_s1 + $0xb0] sm:$0xff]   ;;  %v2640_v50 = vld [vmem:[%s3419_s1 + $0xf8] sm:$0xff]   ;;  %v2662_v52 = vld [vmem:[%s3419_s1 + $0x120] sm:$0xff]   ;;  %s3294_s29 = scalar_lea.vmem %s3421_s3, %s1948_s27 }
  0x11   : > { %v2602_v11 = vld [vmem:[%s2933_s9 + $0x4] ss:$20 sps:$4 sm:$0xff]   ;;  %v2600_v20 = vld [vmem:[%s2933_s9] ss:$20 sps:$4 sm:$0xff]   ;;  %v2615_v28 = vld [vmem:[%s2933_s9 + $0x28] ss:$20 sps:$4 sm:$0xff]  }
  0x12   : > { %v2605_v12 = vld [vmem:[%s2933_s9 + $0x1e4] ss:$20 sps:$4 sm:$0xff]   ;;  %1049 = vmatprep.mubr.bf16.mxu0 %v2602_v11  ;;  %v2603_v21 = vld [vmem:[%s2933_s9 + $0x1e0] ss:$20 sps:$4 sm:$0xff]   ;;  %v2616_v30 = vld [vmem:[%s2933_s9 + $0x208] ss:$20 sps:$4 sm:$0xff]  }
  0x13   : > { %2270 = vmatpush3.bf16.msra.mxu0 %v2591_v7  ;;  %2570 = vmatpush3.bf16.msra.mxu1 %v2591_v7  ;;  %v2611_v24 = vld [vmem:[%s2933_s9 + $0x2c] ss:$20 sps:$4 sm:$0xff]   ;;  %v2621_v32 = vld [vmem:[%s2933_s9 + $0x54] ss:$20 sps:$4 sm:$0xff]   ;;  %v2625_v37 = vld [vmem:[%s2933_s9 + $0x50] ss:$20 sps:$4 sm:$0xff]  }
  0x14   : > { %2271 = vmatprep.subr.bf16.mxu0 %v2592_v8  ;;  %2563 = vmatprep.subr.bf16.mxu1 %v2592_v8  ;;  %v2613_v25 = vld [vmem:[%s2933_s9 + $0x20c] ss:$20 sps:$4 sm:$0xff]   ;;  %v2623_v34 = vld [vmem:[%s2933_s9 + $0x234] ss:$20 sps:$4 sm:$0xff]   ;;  %v2626_v39 = vld [vmem:[%s2933_s9 + $0x230] ss:$20 sps:$4 sm:$0xff]  }
  0x15   : > { %1145 = vmatprep.mubr.bf16.mxu1 %v2605_v12  ;;  %v2632_v42 = vld [vmem:[%s2933_s9 + $0x7c] ss:$20 sps:$4 sm:$0xff]   ;;  %v2636_v46 = vld [vmem:[%s2933_s9 + $0x78] ss:$20 sps:$4 sm:$0xff]   ;;  %v2648_v56 = vld [vmem:[%s2933_s9 + $0xa0] ss:$20 sps:$4 sm:$0xff]  }
  0x16   : > { %v2634_v43 = vld [vmem:[%s2933_s9 + $0x25c] ss:$20 sps:$4 sm:$0xff]   ;;  %v2637_v47 = vld [vmem:[%s2933_s9 + $0x258] ss:$20 sps:$4 sm:$0xff]   ;;  %v2651_v59 = vld [vmem:[%s2933_s9 + $0x34] ss:$20 sps:$4 sm:$0xff]  }
  0x17   : > { %2272 = vmatpush3.bf16.msra.mxu0 %v2593_v9  ;;  %2571 = vmatpush3.bf16.msra.mxu1 %v2593_v9  ;;  %v2643_v51 = vld [vmem:[%s2933_s9 + $0xa4] ss:$20 sps:$4 sm:$0xff]   ;;  %v2647_v53 = vld [vmem:[%s2933_s9 + $0xc] ss:$20 sps:$4 sm:$0xff]   ;;  %v2645_v55 = vld [vmem:[%s2933_s9 + $0x8] ss:$20 sps:$4 sm:$0xff]  }
  0x18   : > { %2273 = vmatprep.subr.bf16.mxu0 %v2594_v10  ;;  %2564 = vmatprep.subr.bf16.mxu1 %v2594_v10  ;;  %v2642_v54 = vld [vmem:[%s3419_s1 + $0xb8] sm:$0xff]   ;;  %v2675_v57 = vld [vmem:[%s3419_s1 + $0x128] sm:$0xff]   ;;  %v2682_v60 = vld [vmem:[%s3419_s1 + $0x130] sm:$0xff]  }
  0x19   : > { %v2649_v58 = vld [vmem:[%s2933_s9 + $0xcc] ss:$20 sps:$4 sm:$0xff]   ;;  %v2653_v61 = vld [vmem:[%s2933_s9 + $0xc8] ss:$20 sps:$4 sm:$0xff]   ;;  %v2654_v62 = vld [vmem:[%s2933_s9 + $0x30] ss:$20 sps:$4 sm:$0xff]  }
  0x1a   : > { %v2656_v63 = vld [vmem:[%s2933_s9 + $0xf4] ss:$20 sps:$4 sm:$0xff]   ;;  %v2658_v0 = vld [vmem:[%s2933_s9 + $0x5c] ss:$20 sps:$4 sm:$0xff]   ;;  %v2661_v3 = vld [vmem:[%s2933_s9 + $0x58] ss:$20 sps:$4 sm:$0xff]  }
  0x1b   : > { %2274 = vmatpush3.bf16.msra.mxu0 %v2595_v13  ;;  %2572 = vmatpush3.bf16.msra.mxu1 %v2595_v13  ;;  %v2695_v1 = vld [vmem:[%s3419_s1 + $0x138] sm:$0xff]   ;;  %v2660_v2 = vld [vmem:[%s2933_s9 + $0xf0] ss:$20 sps:$4 sm:$0xff]   ;;  %v2668_v7 = vld [vmem:[%s2933_s9 + $0x80] ss:$20 sps:$4 sm:$0xff]  }
  0x1c   : > { %2275 = vmatprep.subr.bf16.mxu0 %v2596_v14  ;;  %2565 = vmatprep.subr.bf16.mxu1 %v2596_v14  ;;  %v2663_v4 = vld [vmem:[%s2933_s9 + $0x11c] ss:$20 sps:$4 sm:$0xff]   ;;  %v2665_v5 = vld [vmem:[%s2933_s9 + $0x84] ss:$20 sps:$4 sm:$0xff]   ;;  %v2671_v9 = vld [vmem:[%s2933_s9 + $0xac] ss:$20 sps:$4 sm:$0xff]  }
  0x1d   : > { %v2667_v6 = vld [vmem:[%s2933_s9 + $0x118] ss:$20 sps:$4 sm:$0xff]   ;;  %v2673_v10 = vld [vmem:[%s2933_s9 + $0x140] ss:$20 sps:$4 sm:$0xff]   ;;  %v2674_v11 = vld [vmem:[%s2933_s9 + $0xa8] ss:$20 sps:$4 sm:$0xff]  }
  0x1e   : > { %v2669_v8 = vld [vmem:[%s2933_s9 + $0x144] ss:$20 sps:$4 sm:$0xff]   ;;  %v2676_v12 = vld [vmem:[%s2933_s9 + $0x16c] ss:$20 sps:$4 sm:$0xff]   ;;  %v2678_v13 = vld [vmem:[%s2933_s9 + $0xd4] ss:$20 sps:$4 sm:$0xff]  }
  0x1f   : > { %2276 = vmatpush3.bf16.msra.mxu0 %v2597_v15  ;;  %2573 = vmatpush3.bf16.msra.mxu1 %v2597_v15  ;;  %v2680_v14 = vld [vmem:[%s2933_s9 + $0x168] ss:$20 sps:$4 sm:$0xff]   ;;  %v2681_v15 = vld [vmem:[%s2933_s9 + $0xd0] ss:$20 sps:$4 sm:$0xff]  }
  0x20   : > { %2277 = vmatprep.subr.bf16.mxu0 %v2598_v16  ;;  %2566 = vmatprep.subr.bf16.mxu1 %v2598_v16  ;;  %v2683_v16 = vld [vmem:[%s2933_s9 + $0x194] ss:$20 sps:$4 sm:$0xff]  }
  0x23   : > { %2278 = vmatpush3.bf16.msra.mxu0 %v2599_v17  ;;  %2574 = vmatpush3.bf16.msra.mxu1 %v2599_v17  ;;  %v2685_v17 = vld [vmem:[%s2933_s9 + $0xfc] ss:$20 sps:$4 sm:$0xff]  }
  0x24   : > { %2375 = vmatprep.subr.bf16.mxu1 %v2606_v18  ;;  %2511 = vmatprep.subr.bf16.mxu0 %v2609_v19  ;;  %v2687_v18 = vld [vmem:[%s2933_s9 + $0x190] ss:$20 sps:$4 sm:$0xff]  }
  0x26   : > { %1050 = vmatmul.mubr.bf16.vlgmr.msra.gmra.mrb[0].mxu0 %v2600_v20  ;;  %1146 = vmatmul.mubr.bf16.vlgmr.msra.gmra.mrb[0].mxu1 %v2603_v21  ;;  %v2689_v20 = vld [vmem:[%s2933_s9 + $0x1bc] ss:$20 sps:$4 sm:$0xff]   ;;  %v2691_v21 = vld [vmem:[%s2933_s9 + $0x124] ss:$20 sps:$4 sm:$0xff]  }
  0x27   : > { %2376 = vmatpush3.bf16.msra.mxu1 %v2607_v22  ;;  %2512 = vmatpush3.bf16.msra.mxu0 %v2609_v19  ;;  %v2688_v19 = vld [vmem:[%s2933_s9 + $0xf8] ss:$20 sps:$4 sm:$0xff]  }
  0x28   : > { %2377 = vmatprep.subr.bf16.mxu1 %v2608_v23  ;;  %1057 = vmatprep.mubr.bf16.mxu0 %v2611_v24  ;;  %v2693_v22 = vld [vmem:[%s2933_s9 + $0x1b8] ss:$20 sps:$4 sm:$0xff]   ;;  %v2694_v23 = vld [vmem:[%s2933_s9 + $0x120] ss:$20 sps:$4 sm:$0xff]  }
  0x29   : > { %1153 = vmatprep.mubr.bf16.mxu1 %v2613_v25  ;;  %2513 = vmatprep.subr.bf16.mxu0 %v2628_v26  ;;  %v2696_v24 = vld [vmem:[%s2933_s9 + $0x14c] ss:$20 sps:$4 sm:$0xff]   ;;  %v2698_v25 = vld [vmem:[%s2933_s9 + $0x10] ss:$20 sps:$4 sm:$0xff]  }
  0x2b   : > { %2378 = vmatpush3.bf16.msra.mxu1 %v2610_v27  ;;  %2514 = vmatpush3.bf16.msra.mxu0 %v2628_v26  ;;  %v2699_v26 = vld [vmem:[%s2933_s9 + $0x148] ss:$20 sps:$4 sm:$0xff]   ;;  %v2700_v27 = vld [vmem:[%s2933_s9 + $0x38] ss:$20 sps:$4 sm:$0xff]  }
  0x2c   : > { %2379 = vmatprep.subr.bf16.mxu1 %v2617_v29  ;;  %2515 = vmatprep.subr.bf16.mxu0 %v2641_v38  ;;  %v2703_v29 = vld [vmem:[%s2933_s9 + $0x60] ss:$20 sps:$4 sm:$0xff]  }
  0x2e   : > { %1058 = vmatmul.mubr.bf16.gmra.mrb[4].mxu0 %v2615_v28  ;;  %1154 = vmatmul.mubr.bf16.gmra.mrb[4].mxu1 %v2616_v30  ;;  %v2701_v28 = vld [vmem:[%s2933_s9 + $0x174] ss:$20 sps:$4 sm:$0xff]   ;;  %v2704_v30 = vld [vmem:[%s2933_s9 + $0x170] ss:$20 sps:$4 sm:$0xff]  }
  0x2f   : > { %2380 = vmatpush3.bf16.msra.mxu1 %v2618_v31  ;;  %1065 = vmatprep.mubr.bf16.mxu0 %v2621_v32  ;;  %v2705_v31 = vld [vmem:[%s2933_s9 + $0x88] ss:$20 sps:$4 sm:$0xff]  }
  0x30   : > { %2381 = vmatprep.subr.bf16.mxu1 %v2619_v33  ;;  %1161 = vmatprep.mubr.bf16.mxu1 %v2623_v34  ;;  %v2706_v32 = vld [vmem:[%s2933_s9 + $0x19c] ss:$20 sps:$4 sm:$0xff]   ;;  %v2709_v34 = vld [vmem:[%s2933_s9 + $0x198] ss:$20 sps:$4 sm:$0xff]  }
  0x31   : > { %2516 = vmatpush3.bf16.msra.mxu0 %v2641_v38  ;;  %v2708_v33 = vld [vmem:[%s2933_s9 + $0xb0] ss:$20 sps:$4 sm:$0xff]   ;;  %v2714_v38 = vld [vmem:[%s2933_s9 + $0x1c0] ss:$20 sps:$4 sm:$0xff]  }
  0x32   : > { %2517 = vmatprep.subr.bf16.mxu0 %v2655_v45 }
  0x33   : > { %2382 = vmatpush3.bf16.msra.mxu1 %v2620_v35  ;;  %v2710_v35 = vld [vmem:[%s2933_s9 + $0xd8] ss:$20 sps:$4 sm:$0xff]  }
  0x34   : > { %2383 = vmatprep.subr.bf16.mxu1 %v2627_v36  ;;  %v2711_v36 = vld [vmem:[%s2933_s9 + $0x1c4] ss:$20 sps:$4 sm:$0xff]  }
  0x35   : > { %2518 = vmatpush3.bf16.msra.mxu0 %v2655_v45  ;;  %v2723_v45 = vld [vmem:[%s2933_s9 + $0x1a0] ss:$20 sps:$4 sm:$0xff]  }
  0x36   : > { %1066 = vmatmul.mubr.bf16.gmra.mrb[8].mxu0 %v2625_v37  ;;  %1162 = vmatmul.mubr.bf16.gmra.mrb[8].mxu1 %v2626_v39  ;;  %v2713_v37 = vld [vmem:[%s2933_s9 + $0x100] ss:$20 sps:$4 sm:$0xff]   ;;  %v2715_v39 = vld [vmem:[%s2933_s9 + $0x128] ss:$20 sps:$4 sm:$0xff]  }
  0x37   : > { %2384 = vmatpush3.bf16.msra.mxu1 %v2629_v40  ;;  %1073 = vmatprep.mubr.bf16.mxu0 %v2632_v42  ;;  %v2716_v40 = vld [vmem:[%s2933_s9 + $0x1ec] ss:$20 sps:$4 sm:$0xff]   ;;  %v2719_v42 = vld [vmem:[%s2933_s9 + $0x1e8] ss:$20 sps:$4 sm:$0xff]  }
  0x38   : > { %2385 = vmatprep.subr.bf16.mxu1 %v2630_v41  ;;  %1169 = vmatprep.mubr.bf16.mxu1 %v2634_v43  ;;  %v2718_v41 = vld [vmem:[%s2933_s9 + $0x150] ss:$20 sps:$4 sm:$0xff]   ;;  %v2720_v43 = vld [vmem:[%s2933_s9 + $0x178] ss:$20 sps:$4 sm:$0xff]  }
  0x39   : > { %2519 = vmatprep.subr.bf16.mxu0 %v2662_v52 }
  0x3a   : > { %2520 = vmatpush3.bf16.msra.mxu0 %v2662_v52  ;;  %v2731_v52 = vld [vmem:[%s2933_s9 + $0x264] ss:$20 sps:$4 sm:$0xff]  }
  0x3b   : > { %2386 = vmatpush3.bf16.msra.mxu1 %v2631_v44  ;;  %2521 = vmatprep.subr.bf16.mxu0 %v2675_v57  ;;  %v2721_v44 = vld [vmem:[%s2933_s9 + $0x214] ss:$20 sps:$4 sm:$0xff]  }
  0x3c   : > { %2387 = vmatprep.subr.bf16.mxu1 %v2638_v48  ;;  %v2726_v48 = vld [vmem:[%s2933_s9 + $0x23c] ss:$20 sps:$4 sm:$0xff]  }
  0x3e   : > { %1074 = vmatmul.mubr.bf16.gmra.mrb[12].mxu0 %v2636_v46  ;;  %1170 = vmatmul.mubr.bf16.gmra.mrb[12].mxu1 %v2637_v47  ;;  %v2724_v46 = vld [vmem:[%s2933_s9 + $0x210] ss:$20 sps:$4 sm:$0xff]   ;;  %v2725_v47 = vld [vmem:[%s2933_s9 + $0x1c8] ss:$20 sps:$4 sm:$0xff]  }
  0x3f   : > { %2388 = vmatpush3.bf16.msra.mxu1 %v2639_v49  ;;  %1081 = vmatprep.mubr.bf16.mxu0 %v2643_v51  ;;  %v2728_v49 = vld [vmem:[%s2933_s9 + $0x1f0] ss:$20 sps:$4 sm:$0xff]   ;;  %v2730_v51 = vld [vmem:[%s2933_s9 + $0x218] ss:$20 sps:$4 sm:$0xff]  }
  0x40   : > { %2389 = vmatprep.subr.bf16.mxu1 %v2640_v50  ;;  %1210 = vmatprep.mubr.bf16.mxu1 %v2647_v53  ;;  %v2729_v50 = vld [vmem:[%s2933_s9 + $0x238] ss:$20 sps:$4 sm:$0xff]   ;;  %v2733_v53 = vld [vmem:[%s2933_s9 + $0x240] ss:$20 sps:$4 sm:$0xff]  }
  0x41   : > { %2522 = vmatpush3.bf16.msra.mxu0 %v2675_v57 }
  0x42   : > { %2523 = vmatprep.subr.bf16.mxu0 %v2682_v60 }
  0x43   : > { %2390 = vmatpush3.bf16.msra.mxu1 %v2642_v54  ;;  %v2734_v54 = vld [vmem:[%s2933_s9 + $0x260] ss:$20 sps:$4 sm:$0xff]  }
  0x45   : > { %2524 = vmatpush3.bf16.msra.mxu0 %v2682_v60 }
  0x46   : > { %1082 = vmatmul.mubr.bf16.gmra.mrb[16].mxu0 %v2648_v56  ;;  %1211 = vmatmul.mubr.bf16.vlgmr.msra.gmra.mrb[16].mxu1 %v2645_v55  ;;  %v2735_v55 = vld [vmem:[%s2933_s9 + $0x268] ss:$20 sps:$4 sm:$0xff]  }
  0x47   : > { %1089 = vmatprep.mubr.bf16.mxu0 %v2649_v58  ;;  %1218 = vmatprep.mubr.bf16.mxu1 %v2651_v59 }
  0x48   : > { %2525 = vmatprep.subr.bf16.mxu0 %v2695_v1 }
  0x49   : > { %2526 = vmatpush3.bf16.msra.mxu0 %v2695_v1 }
  0x4e   : > { %1090 = vmatmul.mubr.bf16.gmra.mrb[20].mxu0 %v2653_v61  ;;  %1219 = vmatmul.mubr.bf16.gmra.mrb[20].mxu1 %v2654_v62 }
  0x4f   : > { %1097 = vmatprep.mubr.bf16.mxu0 %v2656_v63  ;;  %1226 = vmatprep.mubr.bf16.mxu1 %v2658_v0 }
  0x56   : > { %1098 = vmatmul.mubr.bf16.gmra.mrb[24].mxu0 %v2660_v2  ;;  %1227 = vmatmul.mubr.bf16.gmra.mrb[24].mxu1 %v2661_v3 }
  0x57   : > { %1105 = vmatprep.mubr.bf16.mxu0 %v2663_v4  ;;  %1234 = vmatprep.mubr.bf16.mxu1 %v2665_v5 }
  0x5e   : > { %1106 = vmatmul.mubr.bf16.gmra.mrb[28].mxu0 %v2667_v6  ;;  %1235 = vmatmul.mubr.bf16.gmra.mrb[28].mxu1 %v2668_v7 }
  0x5f   : > { %1113 = vmatprep.mubr.bf16.mxu0 %v2669_v8  ;;  %1242 = vmatprep.mubr.bf16.mxu1 %v2671_v9 }
  0x66   : > { %1114 = vmatmul.mubr.bf16.gmra.mrb[32].mxu0 %v2673_v10  ;;  %1243 = vmatmul.mubr.bf16.gmra.mrb[32].mxu1 %v2674_v11 }
  0x67   : > { %1121 = vmatprep.mubr.bf16.mxu0 %v2676_v12  ;;  %1250 = vmatprep.mubr.bf16.mxu1 %v2678_v13 }
  0x6e   : > { %1122 = vmatmul.mubr.bf16.gmra.mrb[36].mxu0 %v2680_v14  ;;  %1251 = vmatmul.mubr.bf16.gmra.mrb[36].mxu1 %v2681_v15 }
  0x6f   : > { %1129 = vmatprep.mubr.bf16.mxu0 %v2683_v16  ;;  %1258 = vmatprep.mubr.bf16.mxu1 %v2685_v17 }
  0x76   : > { %1130 = vmatmul.mubr.bf16.gmra.mrb[40].mxu0 %v2687_v18  ;;  %1259 = vmatmul.mubr.bf16.gmra.mrb[40].mxu1 %v2688_v19 }
  0x77   : > { %1137 = vmatprep.mubr.bf16.mxu0 %v2689_v20  ;;  %1266 = vmatprep.mubr.bf16.mxu1 %v2691_v21 }
  0x7e   : > { %1138 = vmatmul.mubr.bf16.gmra.mrb[44].mxu0 %v2693_v22  ;;  %1267 = vmatmul.mubr.bf16.gmra.mrb[44].mxu1 %v2694_v23 }
  0x7f   : > { %1274 = vmatprep.mubr.bf16.mxu1 %v2696_v24  ;;  %2527 = vmatprep.mubr.bf16.mxu0 %v2698_v25 }
  0x86   : > { %1275 = vmatmul.mubr.bf16.gmra.mrb[48].mxu1 %v2699_v26  ;;  %2528 = vmatmul.mubr.bf16.vlgmr.msra.gmra.mrb[48].mxu0 %v2700_v27 }
  0x87   : > { %1282 = vmatprep.mubr.bf16.mxu1 %v2701_v28  ;;  %2531 = vmatprep.mubr.bf16.mxu0 %v2703_v29 }
  0x8e   : > { %1283 = vmatmul.mubr.bf16.gmra.mrb[52].mxu1 %v2704_v30  ;;  %2532 = vmatmul.mubr.bf16.gmra.mrb[52].mxu0 %v2705_v31 }
  0x8f   : > { %1290 = vmatprep.mubr.bf16.mxu1 %v2706_v32  ;;  %2535 = vmatprep.mubr.bf16.mxu0 %v2708_v33 }
  0x96   : > { %1291 = vmatmul.mubr.bf16.gmra.mrb[56].mxu1 %v2709_v34  ;;  %2536 = vmatmul.mubr.bf16.gmra.mrb[56].mxu0 %v2710_v35 }
  0x97   : > { %1298 = vmatprep.mubr.bf16.mxu1 %v2711_v36  ;;  %2539 = vmatprep.mubr.bf16.mxu0 %v2713_v37 }
  0x9e   : > { %1299 = vmatmul.mubr.bf16.gmra.mrb[60].mxu1 %v2714_v38  ;;  %2540 = vmatmul.mubr.bf16.gmra.mrb[60].mxu0 %v2715_v39 }
  0x9f   : > { %1306 = vmatprep.mubr.bf16.mxu1 %v2716_v40  ;;  %2543 = vmatprep.mubr.bf16.mxu0 %v2718_v41 }
  0xa6   : > { %1307 = vmatmul.mubr.bf16.gmra.mrb[64].mxu1 %v2719_v42  ;;  %2544 = vmatmul.mubr.bf16.gmra.mrb[64].mxu0 %v2720_v43  ;;  %v3127_v42 = vld [vmem:[%s3420_s2] ss:$0 sm:$0xff] }
  0xa7   : > { %1314 = vmatprep.mubr.bf16.mxu1 %v2721_v44  ;;  %2547 = vmatprep.mubr.bf16.mxu0 %v2723_v45 }
  0xae   : > { %1315 = vmatmul.mubr.bf16.gmra.mrb[68].mxu1 %v2724_v46  ;;  %2548 = vmatmul.mubr.bf16.gmra.mrb[68].mxu0 %v2725_v47 }
  0xaf   : > { %1322 = vmatprep.mubr.bf16.mxu1 %v2726_v48  ;;  %2551 = vmatprep.mubr.bf16.mxu0 %v2728_v49 }
  0xb6   : > { %1323 = vmatmul.mubr.bf16.gmra.mrb[72].mxu1 %v2729_v50  ;;  %2552 = vmatmul.mubr.bf16.gmra.mrb[72].mxu0 %v2730_v51 }
  0xb7   : > { %1330 = vmatprep.mubr.bf16.mxu1 %v2731_v52  ;;  %2555 = vmatprep.mubr.bf16.mxu0 %v2733_v53 }
  0xbe   : > { %1331 = vmatmul.mubr.bf16.gmra.mrb[76].mxu1 %v2734_v54  ;;  %2556 = vmatmul.mubr.bf16.gmra.mrb[76].mxu0 %v2735_v55 }
  0xf9   : > { %v2351_v56 = vpop.f32.mrb[0].mxu1  ;;  %v2279_v57 = vpop.f32.mrb[0].mxu0 }
  0xfa   : > { %v2352_v58 = vpop.f32.mrb[1].mxu1  ;;  %v2280_v59 = vpop.f32.mrb[1].mxu0 }
  0xfb   : > { %v3108_v60 = vadd.f32 %v2352_v58, %v2351_v56  ;;  %v2354_v61 = vpop.f32.mrb[2].mxu1  ;;  %v2281_v62 = vadd.f32 %v2280_v59, %v2279_v57  ;;  %v2282_v63 = vpop.f32.mrb[2].mxu0 }
  0xfc   : > { %v2355_v0 = vpop.f32.mrb[3].mxu1  ;;  %v2283_v1 = vpop.f32.mrb[3].mxu0 }
  0xfd   : > { %v3110_v2 = vadd.f32 %v2355_v0, %v2354_v61  ;;  %v2284_v3 = vadd.f32 %v2283_v1, %v2282_v63  ;;  %v1052_v45 = vadd.f32 %v2281_v62, %v3127_v42 }
  0xff   : > { %v1055_v52 = vadd.f32 %v2284_v3, %v3127_v42 }
 0x101   : > { %v2357_v4 = vpop.f32.mrb[4].mxu1  ;;  %v2285_v5 = vpop.f32.mrb[4].mxu0 }
 0x102   : > { %v2358_v6 = vpop.f32.mrb[5].mxu1  ;;  %v2286_v7 = vpop.f32.mrb[5].mxu0 }
 0x103   : > { %v3112_v8 = vadd.f32 %v2358_v6, %v2357_v4  ;;  %v2360_v9 = vpop.f32.mrb[6].mxu1  ;;  %v2287_v10 = vadd.f32 %v2286_v7, %v2285_v5  ;;  %v2288_v11 = vpop.f32.mrb[6].mxu0 }
 0x104   : > { %v2361_v12 = vpop.f32.mrb[7].mxu1  ;;  %v2289_v13 = vpop.f32.mrb[7].mxu0 }
 0x105   : > { %v3114_v14 = vadd.f32 %v2361_v12, %v2360_v9  ;;  %v2290_v15 = vadd.f32 %v2289_v13, %v2288_v11  ;;  %v1060_v62 = vadd.f32 %v2287_v10, %v3127_v42 }
 0x107   : > { %v1063_v3 = vadd.f32 %v2290_v15, %v3127_v42 }
 0x109   : > { %v2363_v16 = vpop.f32.mrb[8].mxu1  ;;  %v2291_v17 = vpop.f32.mrb[8].mxu0 }
 0x10a   : > { %v2364_v18 = vpop.f32.mrb[9].mxu1  ;;  %v2292_v19 = vpop.f32.mrb[9].mxu0 }
 0x10b   : > { %v3116_v20 = vadd.f32 %v2364_v18, %v2363_v16  ;;  %v2366_v21 = vpop.f32.mrb[10].mxu1  ;;  %v2293_v22 = vadd.f32 %v2292_v19, %v2291_v17  ;;  %v2294_v23 = vpop.f32.mrb[10].mxu0 }
 0x10c   : > { %v2367_v24 = vpop.f32.mrb[11].mxu1  ;;  %v2295_v25 = vpop.f32.mrb[11].mxu0 }
 0x10d   : > { %v3118_v26 = vadd.f32 %v2367_v24, %v2366_v21  ;;  %v2296_v27 = vadd.f32 %v2295_v25, %v2294_v23  ;;  %v1068_v10 = vadd.f32 %v2293_v22, %v3127_v42 }
 0x10f   : > { %v1071_v15 = vadd.f32 %v2296_v27, %v3127_v42 }
 0x111   : > { %v2369_v28 = vpop.f32.mrb[12].mxu1  ;;  %v2297_v29 = vpop.f32.mrb[12].mxu0 }
 0x112   : > { %v2370_v30 = vpop.f32.mrb[13].mxu1  ;;  %v2298_v31 = vpop.f32.mrb[13].mxu0 }
 0x113   : > { %v3120_v32 = vadd.f32 %v2370_v30, %v2369_v28  ;;  %v2372_v33 = vpop.f32.mrb[14].mxu1  ;;  %v2299_v34 = vadd.f32 %v2298_v31, %v2297_v29  ;;  %v2300_v35 = vpop.f32.mrb[14].mxu0 }
 0x114   : > { %v2373_v36 = vpop.f32.mrb[15].mxu1  ;;  %v2301_v37 = vpop.f32.mrb[15].mxu0 }
 0x115   : > { %v3122_v38 = vadd.f32 %v2373_v36, %v2372_v33  ;;  %v2302_v39 = vadd.f32 %v2301_v37, %v2300_v35  ;;  %v1076_v22 = vadd.f32 %v2299_v34, %v3127_v42 }
 0x117   : > { %v1079_v27 = vadd.f32 %v2302_v39, %v3127_v42 }
 0x119   : > { %v2391_v40 = vpop.f32.mrb[16].mxu1  ;;  %v2303_v41 = vpop.f32.mrb[16].mxu0 }
 0x11a   : > { %v2392_v43 = vpop.f32.mrb[17].mxu1  ;;  %v2304_v44 = vpop.f32.mrb[17].mxu0 }
 0x11b   : > { %v2393_v46 = vadd.f32 %v2392_v43, %v2391_v40  ;;  %v2394_v47 = vpop.f32.mrb[18].mxu1  ;;  %v2305_v48 = vadd.f32 %v2304_v44, %v2303_v41  ;;  %v2306_v49 = vpop.f32.mrb[18].mxu0 }
 0x11c   : > { %v2395_v50 = vpop.f32.mrb[19].mxu1  ;;  %v2307_v51 = vpop.f32.mrb[19].mxu0 }
 0x11d   : > { %v2396_v53 = vadd.f32 %v2395_v50, %v2394_v47  ;;  %v2308_v54 = vadd.f32 %v2307_v51, %v2306_v49  ;;  %v3131_v55 = vadd.f32 %v2393_v46, %v1052_v45  ;;  %v1084_v34 = vadd.f32 %v2305_v48, %v3127_v42 }
 0x11f   : > { %v3133_v56 = vadd.f32 %v2396_v53, %v1055_v52  ;;  %v1087_v39 = vadd.f32 %v2308_v54, %v3127_v42 }
 0x121   : > { %v2397_v57 = vpop.f32.mrb[20].mxu1  ;;  %v2309_v58 = vpop.f32.mrb[20].mxu0 }
 0x122   : > { %v2398_v59 = vpop.f32.mrb[21].mxu1  ;;  %v2310_v61 = vpop.f32.mrb[21].mxu0 }
 0x123   : > { %v2399_v63 = vadd.f32 %v2398_v59, %v2397_v57  ;;  %v2400_v0 = vpop.f32.mrb[22].mxu1  ;;  %v2311_v1 = vadd.f32 %v2310_v61, %v2309_v58  ;;  %v2312_v4 = vpop.f32.mrb[22].mxu0 }
 0x124   : > { %v2401_v5 = vpop.f32.mrb[23].mxu1  ;;  %v2313_v6 = vpop.f32.mrb[23].mxu0 }
 0x125   : > { %v2402_v7 = vadd.f32 %v2401_v5, %v2400_v0  ;;  %v2314_v9 = vadd.f32 %v2313_v6, %v2312_v4  ;;  %v3137_v11 = vadd.f32 %v2399_v63, %v1060_v62  ;;  %v1092_v48 = vadd.f32 %v2311_v1, %v3127_v42 }
 0x127   : > { %v3139_v12 = vadd.f32 %v2402_v7, %v1063_v3  ;;  %v1095_v54 = vadd.f32 %v2314_v9, %v3127_v42 }
 0x129   : > { %v2403_v13 = vpop.f32.mrb[24].mxu1  ;;  %v2315_v16 = vpop.f32.mrb[24].mxu0 }
 0x12a   : > { %v2404_v17 = vpop.f32.mrb[25].mxu1  ;;  %v2316_v18 = vpop.f32.mrb[25].mxu0 }
 0x12b   : > { %v2405_v19 = vadd.f32 %v2404_v17, %v2403_v13  ;;  %v2406_v21 = vpop.f32.mrb[26].mxu1  ;;  %v2317_v23 = vadd.f32 %v2316_v18, %v2315_v16  ;;  %v2318_v24 = vpop.f32.mrb[26].mxu0 }
 0x12c   : > { %v2407_v25 = vpop.f32.mrb[27].mxu1  ;;  %v2319_v28 = vpop.f32.mrb[27].mxu0 }
 0x12d   : > { %v2408_v29 = vadd.f32 %v2407_v25, %v2406_v21  ;;  %v2320_v30 = vadd.f32 %v2319_v28, %v2318_v24  ;;  %v3143_v31 = vadd.f32 %v2405_v19, %v1068_v10 }
 0x12f   : > { %v3145_v33 = vadd.f32 %v2408_v29, %v1071_v15 }
 0x131   : > { %v2409_v35 = vpop.f32.mrb[28].mxu1  ;;  %v2321_v36 = vpop.f32.mrb[28].mxu0 }
 0x132   : > { %v2410_v37 = vpop.f32.mrb[29].mxu1  ;;  %v2322_v40 = vpop.f32.mrb[29].mxu0 }
 0x133   : > { %v2411_v41 = vadd.f32 %v2410_v37, %v2409_v35  ;;  %v2412_v43 = vpop.f32.mrb[30].mxu1  ;;  %v2323_v44 = vadd.f32 %v2322_v40, %v2321_v36  ;;  %v2324_v45 = vpop.f32.mrb[30].mxu0 }
 0x134   : > { %v2413_v46 = vpop.f32.mrb[31].mxu1  ;;  %v2325_v47 = vpop.f32.mrb[31].mxu0 }
 0x135   : > { %v2414_v49 = vadd.f32 %v2413_v46, %v2412_v43  ;;  %v2326_v50 = vadd.f32 %v2325_v47, %v2324_v45  ;;  %v3149_v51 = vadd.f32 %v2411_v41, %v1076_v22  ;;  %v1100_v43 = vadd.f32 %v2317_v23, %v3127_v42 }
 0x137   : > { %v3151_v52 = vadd.f32 %v2414_v49, %v1079_v27 }
 0x139   : > { %v2415_v53 = vpop.f32.mrb[32].mxu1  ;;  %v2327_v57 = vpop.f32.mrb[32].mxu0 }
 0x13a   : > { %v2416_v58 = vpop.f32.mrb[33].mxu1  ;;  %v2328_v59 = vpop.f32.mrb[33].mxu0 }
 0x13b   : > { %v2417_v61 = vadd.f32 %v2416_v58, %v2415_v53  ;;  %v2418_v62 = vpop.f32.mrb[34].mxu1  ;;  %v2329_v63 = vadd.f32 %v2328_v59, %v2327_v57  ;;  %v2330_v0 = vpop.f32.mrb[34].mxu0  ;;  %v1103_v53 = vadd.f32 %v2320_v30, %v3127_v42 }
 0x13c   : > { %v2419_v4 = vpop.f32.mrb[35].mxu1  ;;  %v2331_v5 = vpop.f32.mrb[35].mxu0 }
 0x13d   : > { %v2420_v6 = vadd.f32 %v2419_v4, %v2418_v62  ;;  %v2332_v3 = vadd.f32 %v2331_v5, %v2330_v0  ;;  %v3155_v7 = vadd.f32 %v2417_v61, %v1084_v34  ;;  %v1108_v4 = vadd.f32 %v2323_v44, %v3127_v42 }
 0x13f   : > { %v3157_v13 = vadd.f32 %v2420_v6, %v1087_v39 }
 0x141   : > { %v2421_v16 = vpop.f32.mrb[36].mxu1  ;;  %v2333_v17 = vpop.f32.mrb[36].mxu0 }
 0x142   : > { %v2422_v18 = vpop.f32.mrb[37].mxu1  ;;  %v2334_v10 = vpop.f32.mrb[37].mxu0 }
 0x143   : > { %v2423_v19 = vadd.f32 %v2422_v18, %v2421_v16  ;;  %v2424_v21 = vpop.f32.mrb[38].mxu1  ;;  %v3160_v24 = vadd.f32 %v2334_v10, %v2333_v17  ;;  %v2336_v25 = vpop.f32.mrb[38].mxu0  ;;  %v1111_v18 = vadd.f32 %v2326_v50, %v3127_v42 }
 0x144   : > { %v2425_v28 = vpop.f32.mrb[39].mxu1  ;;  %v2337_v15 = vpop.f32.mrb[39].mxu0 }
 0x145   : > { %v2426_v29 = vadd.f32 %v2425_v28, %v2424_v21  ;;  %v3163_v35 = vadd.f32 %v2337_v15, %v2336_v25  ;;  %v3165_v36 = vadd.f32 %v2423_v19, %v1092_v48 }
 0x147   : > { %v3167_v37 = vadd.f32 %v2426_v29, %v1095_v54  ;;  %v1116_v29 = vadd.f32 %v2329_v63, %v3127_v42 }
 0x149   : > { %v2427_v40 = vpop.f32.mrb[40].mxu1  ;;  %v2339_v22 = vpop.f32.mrb[40].mxu0 }
 0x14a   : > { %v2428_v41 = vpop.f32.mrb[41].mxu1  ;;  %v2340_v1 = vpop.f32.mrb[41].mxu0 }
 0x14b   : > { %v2429_v45 = vadd.f32 %v2428_v41, %v2427_v40  ;;  %v2430_v46 = vpop.f32.mrb[42].mxu1  ;;  %v3170_v47 = vadd.f32 %v2340_v1, %v2339_v22  ;;  %v2342_v27 = vpop.f32.mrb[42].mxu0  ;;  %v1119_v1 = vadd.f32 %v2332_v3, %v3127_v42 }
 0x14c   : > { %v2431_v49 = vpop.f32.mrb[43].mxu1  ;;  %v2343_v9 = vpop.f32.mrb[43].mxu0 }
 0x14d   : > { %v2432_v57 = vadd.f32 %v2431_v49, %v2430_v46  ;;  %v3173_v58 = vadd.f32 %v2343_v9, %v2342_v27  ;;  %v3175_v59 = vadd.f32 %v2429_v45, %v1100_v43 }
 0x14f   : > { %v3177_v34 = vadd.f32 %v2432_v57, %v1103_v53 }
 0x151   : > { %v2433_v61 = vpop.f32.mrb[44].mxu1  ;;  %v2345_v62 = vpop.f32.mrb[44].mxu0 }
 0x152   : > { %v2434_v0 = vpop.f32.mrb[45].mxu1  ;;  %v2346_v23 = vpop.f32.mrb[45].mxu0 }
 0x153   : > { %v2435_v5 = vadd.f32 %v2434_v0, %v2433_v61  ;;  %v2436_v39 = vpop.f32.mrb[46].mxu1  ;;  %v3180_v6 = vadd.f32 %v2346_v23, %v2345_v62  ;;  %v2348_v16 = vpop.f32.mrb[46].mxu0  ;;  %v1124_v0 = vadd.f32 %v3160_v24, %v3127_v42 }
 0x154   : > { %v2437_v17 = vpop.f32.mrb[47].mxu1  ;;  %v2349_v30 = vpop.f32.mrb[47].mxu0 }
 0x155   : > { %v2438_v10 = vadd.f32 %v2437_v17, %v2436_v39  ;;  %v3183_v48 = vadd.f32 %v2349_v30, %v2348_v16  ;;  %v3185_v19 = vadd.f32 %v2435_v5, %v1108_v4  ;;  %v1127_v16 = vadd.f32 %v3163_v35, %v3127_v42 }
 0x157   : > { %v3187_v21 = vadd.f32 %v2438_v10, %v1111_v18 }
 0x159   : > { %v2439_v25 = vpop.f32.mrb[48].mxu1  ;;  %v2529_v28 = vpop.f32.mrb[48].mxu0 }
 0x15a   : > { %v3190_v44 = vadd.f32 %v2529_v28, %v3137_v11  ;;  %v2440_v15 = vpop.f32.mrb[49].mxu1  ;;  %v1373_v54 = vpop.f32.mrb[49].mxu0 }
 0x15b   : > { %v2441_v40 = vadd.f32 %v2440_v15, %v2439_v25  ;;  %v3194_v22 = vadd.f32 %v1373_v54, %v3131_v55  ;;  %v2442_v50 = vpop.f32.mrb[50].mxu1  ;;  %v2530_v41 = vpop.f32.mrb[50].mxu0 }
 0x15c   : > { %v2072_v43 = vmul.f32 -1.442695, %v3190_v44  ;;  %v3199_v45 = vadd.f32 %v2530_v41, %v3139_v12  ;;  %v2443_v46 = vpop.f32.mrb[51].mxu1  ;;  %v1376_v11 = vpop.f32.mrb[51].mxu0 }
 0x15d   : > { %v2070_v27 = vmul.f32 -1.442695, %v3194_v22  ;;  %v2444_v49 = vadd.f32 %v2443_v46, %v2442_v50  ;;  %v3203_v63 = vadd.f32 %v1376_v11, %v3133_v56  ;;  %v3205_v9 = vadd.f32 %v2441_v40, %v1116_v29 }
 0x15e   : > { %2736 = vpow2.f32 %v2072_v43  ;;  %v2073_v55 = vmul.f32 -1.442695, %v3199_v45 }
 0x15f   : > { %2738 = vpow2.f32 %v2070_v27  ;;  %v2071_v3 = vmul.f32 -1.442695, %v3203_v63  ;;  %v3209_v53 = vadd.f32 %v2444_v49, %v1119_v1  ;;  %v1135_v1 = vadd.f32 %v3173_v58, %v3127_v42 }
 0x160   : > { %2740 = vpow2.f32 %v2073_v55 }
 0x161   : > { %2742 = vpow2.f32 %v2071_v3  ;;  %v2445_v12 = vpop.f32.mrb[52].mxu1  ;;  %v2533_v57 = vpop.f32.mrb[52].mxu0 }
 0x162   : > { %v3212_v61 = vadd.f32 %v2533_v57, %v3149_v51  ;;  %v2446_v62 = vpop.f32.mrb[53].mxu1  ;;  %v1389_v56 = vpop.f32.mrb[53].mxu0 }
 0x163   : > { %v2447_v23 = vadd.f32 %v2446_v62, %v2445_v12  ;;  %v3217_v4 = vadd.f32 %v1389_v56, %v3143_v31  ;;  %v2448_v5 = vpop.f32.mrb[54].mxu1  ;;  %v2534_v39 = vpop.f32.mrb[54].mxu0 }
 0x164   : > { %v2076_v17 = vmul.f32 -1.442695, %v3212_v61  ;;  %v3223_v30 = vadd.f32 %v2534_v39, %v3151_v52  ;;  %v2449_v51 = vpop.f32.mrb[55].mxu1  ;;  %v1392_v18 = vpop.f32.mrb[55].mxu0 }
 0x165   : > { %v2074_v10 = vmul.f32 -1.442695, %v3217_v4  ;;  %v2450_v25 = vadd.f32 %v2449_v51, %v2448_v5  ;;  %v3227_v24 = vadd.f32 %v1392_v18, %v3145_v33  ;;  %v3229_v31 = vadd.f32 %v2447_v23, %v1124_v0 }
 0x166   : > { %2744 = vpow2.f32 %v2076_v17  ;;  %v2077_v28 = vmul.f32 -1.442695, %v3223_v30  ;;  %v1132_v33 = vadd.f32 %v3170_v47, %v3127_v42 }
 0x167   : > { %2746 = vpow2.f32 %v2074_v10  ;;  %v2075_v35 = vmul.f32 -1.442695, %v3227_v24  ;;  %v3233_v15 = vadd.f32 %v2450_v25, %v1127_v16  ;;  %v1140_v10 = vadd.f32 %v3180_v6, %v3127_v42 }
 0x168   : > { %v2737_v52 = vpop.eup %2736  ;;  %2748 = vpow2.f32 %v2077_v28 }
 0x169   : > { %v2739_v54 = vpop.eup %2738  ;;  %v1598_v29 = vadd.f32 1.0, %v2737_v52  ;;  %2750 = vpow2.f32 %v2075_v35  ;;  %v2451_v40 = vpop.f32.mrb[56].mxu1  ;;  %v1143_v52 = vadd.f32 %v3183_v48, %v3127_v42 }
 0x16a   : > { %v2537_v50 = vpop.f32.mrb[56].mxu0  ;;  %v2741_v41 = vpop.eup %2740  ;;  %v1596_v43 = vadd.f32 1.0, %v2739_v54 }
 0x16b   : > { %v3240_v46 = vadd.f32 %v2537_v50, %v3165_v36  ;;  %v2452_v11 = vpop.f32.mrb[57].mxu1  ;;  %v1405_v27 = vpop.f32.mrb[57].mxu0  ;;  %2752 = vrcp.f32 %v1598_v29  ;;  %v1599_v55 = vadd.f32 1.0, %v2741_v41 }
 0x16c   : > { %v2743_v49 = vpop.eup %2742  ;;  %v2453_v3 = vadd.f32 %v2452_v11, %v2451_v40  ;;  %v3243_v12 = vadd.f32 %v1405_v27, %v3155_v7  ;;  %v2454_v57 = vpop.f32.mrb[58].mxu1  ;;  %2754 = vrcp.f32 %v1596_v43 }
 0x16d   : > { %v2538_v62 = vpop.f32.mrb[58].mxu0  ;;  %v1597_v47 = vadd.f32 1.0, %v2743_v49  ;;  %v2080_v56 = vmul.f32 -1.442695, %v3240_v46  ;;  %v2455_v36 = vpop.f32.mrb[59].mxu1  ;;  %2756 = vrcp.f32 %v1599_v55 }
 0x16e   : > { %v3247_v58 = vadd.f32 %v2538_v62, %v3167_v37  ;;  %v1408_v0 = vpop.f32.mrb[59].mxu0  ;;  %v2078_v23 = vmul.f32 -1.442695, %v3243_v12  ;;  %v2456_v5 = vadd.f32 %v2455_v36, %v2454_v57  ;;  %v3254_v16 = vadd.f32 %v2453_v3, %v1132_v33 }
 0x16f   : > { %v3251_v39 = vadd.f32 %v1408_v0, %v3157_v13  ;;  %2758 = vrcp.f32 %v1597_v47 }
 0x170   : > { %v2081_v7 = vmul.f32 -1.442695, %v3247_v58  ;;  %2760 = vpow2.f32 %v2080_v56  ;;  %v3257_v51 = vadd.f32 %v2456_v5, %v1135_v1  ;;  %v2745_v37 = vpop.eup %2744 }
 0x171   : > { %v2079_v17 = vmul.f32 -1.442695, %v3251_v39  ;;  %2762 = vpow2.f32 %v2078_v23  ;;  %v2747_v18 = vpop.eup %2746  ;;  %v1602_v25 = vadd.f32 1.0, %v2745_v37  ;;  %v2457_v13 = vpop.f32.mrb[60].mxu1 }
 0x172   : > { %2764 = vpow2.f32 %v2081_v7  ;;  %v2541_v28 = vpop.f32.mrb[60].mxu0  ;;  %v2749_v35 = vpop.eup %2748  ;;  %v1600_v54 = vadd.f32 1.0, %v2747_v18  ;;  %v1148_v7 = vadd.f32 %v3108_v60, %v3127_v42  ;;  %v1151_v18 = vadd.f32 %v3110_v2, %v3127_v42 }
 0x173   : > { %2766 = vpow2.f32 %v2079_v17  ;;  %v3264_v29 = vadd.f32 %v2541_v28, %v3185_v19  ;;  %v2458_v40 = vpop.f32.mrb[61].mxu1  ;;  %v1421_v50 = vpop.f32.mrb[61].mxu0  ;;  %v1603_v33 = vadd.f32 1.0, %v2749_v35 }
 0x174   : > { %v2751_v41 = vpop.eup %2750  ;;  %2768 = vrcp.f32 %v1602_v25  ;;  %v2459_v1 = vadd.f32 %v2458_v40, %v2457_v13  ;;  %v3267_v6 = vadd.f32 %v1421_v50, %v3175_v59  ;;  %v2460_v43 = vpop.f32.mrb[62].mxu1 }
 0x175   : > { %v2542_v11 = vpop.f32.mrb[62].mxu0  ;;  %2770 = vrcp.f32 %v1600_v54  ;;  %v1601_v27 = vadd.f32 1.0, %v2751_v41  ;;  %v2084_v48 = vmul.f32 -1.442695, %v3264_v29  ;;  %v2461_v19 = vpop.f32.mrb[63].mxu1 }
 0x176   : > { %v3271_v49 = vadd.f32 %v2542_v11, %v3187_v21  ;;  %v1424_v55 = vpop.f32.mrb[63].mxu0  ;;  %v2753_v3 = vpop.eup %2752  ;;  %2772 = vrcp.f32 %v1603_v33  ;;  %v2082_v57 = vmul.f32 -1.442695, %v3267_v6  ;;  %v2462_v62 = vadd.f32 %v2461_v19, %v2460_v43 }
 0x177   : > { %v3275_v47 = vadd.f32 %v1424_v55, %v3177_v34  ;;  %v2755_v59 = vpop.eup %2754  ;;  %2774 = vrcp.f32 %v1601_v27  ;;  %v3279_v36 = vadd.f32 %v2459_v1, %v1140_v10  ;;  %v1694_v34 = vmul.f32 %v2753_v3, %v3190_v44 }
 0x178   : > { %v2085_v56 = vmul.f32 -1.442695, %v3271_v49  ;;  %v2757_v0 = vpop.eup %2756  ;;  %2776 = vpow2.f32 %v2084_v48  ;;  %v3282_v23 = vadd.f32 %v2462_v62, %v1143_v52  ;;  %v1692_v10 = vmul.f32 %v2755_v59, %v3194_v22 }
 0x179   : > { %v2083_v21 = vmul.f32 -1.442695, %v3275_v47  ;;  %v2759_v5 = vpop.eup %2758  ;;  %v1695_v17 = vmul.f32 %v2757_v0, %v3199_v45  ;;  %2778 = vpow2.f32 %v2082_v57  ;;  %v2463_v60 = vpop.f32.mrb[64].mxu1 }
 0x17a   : > { %v2761_v37 = vpop.eup %2760  ;;  %v1693_v25 = vmul.f32 %v2759_v5, %v3203_v63  ;;  %2780 = vpow2.f32 %v2085_v56  ;;  %v2545_v13 = vpop.f32.mrb[64].mxu0 }
 0x17b   : > { %v2763_v44 = vpop.eup %2762  ;;  %v2176_v45 = vpack.c.bf16 %v1695_v17, %v1694_v34  ;;  %v1606_v28 = vadd.f32 1.0, %v2761_v37  ;;  %2782 = vpow2.f32 %v2083_v21  ;;  %v3298_v35 = vadd.f32 %v2545_v13, %v3229_v31  ;;  %v2464_v2 = vpop.f32.mrb[65].mxu1 }
 0x17c   : > { %v1437_v22 = vpop.f32.mrb[65].mxu0  ;;  %v2765_v52 = vpop.eup %2764  ;;  %v2171_v54 = vpack.c.bf16 %v1693_v25, %v1692_v10  ;;  %v1604_v40 = vadd.f32 1.0, %v2763_v44  ;;  %v2465_v50 = vadd.f32 %v2464_v2, %v2463_v60 }
 0x17d   : > { %v3301_v63 = vadd.f32 %v1437_v22, %v3205_v9  ;;  %v2466_v41 = vpop.f32.mrb[66].mxu1  ;;  %v2546_v33 = vpop.f32.mrb[66].mxu0  ;;  %2248 = vst [vmem:[%s3294_s29 + $0x8] sm:$0xff] %v2176_v45   ;;  %2784 = vrcp.f32 %v1606_v28  ;;  %v1607_v43 = vadd.f32 1.0, %v2765_v52  ;;  %v2088_v11 = vmul.f32 -1.442695, %v3298_v35 }
 0x17e   : > { %v2767_v1 = vpop.eup %2766  ;;  %v3306_v31 = vadd.f32 %v2546_v33, %v3233_v15  ;;  %v2467_v27 = vpop.f32.mrb[67].mxu1  ;;  %2172 = vst [vmem:[%s3294_s29] sm:$0xff] %v2171_v54   ;;  %2786 = vrcp.f32 %v1604_v40  ;;  %v1156_v15 = vadd.f32 %v3112_v8, %v3127_v42  ;;  %v3316_v0 = vadd.f32 %v2465_v50, %v1148_v7 }
 0x17f   : > { %v1440_v48 = vpop.f32.mrb[67].mxu0  ;;  %v2769_v19 = vpop.eup %2768  ;;  %v1605_v55 = vadd.f32 1.0, %v2767_v1  ;;  %v2086_v9 = vmul.f32 -1.442695, %v3301_v63  ;;  %v2468_v3 = vadd.f32 %v2467_v27, %v2466_v41  ;;  %2788 = vrcp.f32 %v1607_v43 }
 0x180   : > { %v2771_v57 = vpop.eup %2770  ;;  %v2089_v62 = vmul.f32 -1.442695, %v3306_v31  ;;  %v3312_v59 = vadd.f32 %v1440_v48, %v3209_v53  ;;  %v1698_v34 = vmul.f32 %v2769_v19, %v3212_v61  ;;  %v1159_v53 = vadd.f32 %v3114_v14, %v3127_v42 }
 0x181   : > { %v2773_v56 = vpop.eup %2772  ;;  %2790 = vrcp.f32 %v1605_v55  ;;  %v3318_v21 = vadd.f32 %v2468_v3, %v1151_v18  ;;  %v1696_v25 = vmul.f32 %v2771_v57, %v3217_v4  ;;  %v2469_v7 = vpop.f32.mrb[68].mxu1  ;;  %v1164_v57 = vadd.f32 %v3116_v20, %v3127_v42 }
 0x182   : > { %v2775_v5 = vpop.eup %2774  ;;  %v1699_v17 = vmul.f32 %v2773_v56, %v3223_v30  ;;  %2792 = vpow2.f32 %v2088_v11  ;;  %v2087_v37 = vmul.f32 -1.442695, %v3312_v59  ;;  %v2549_v18 = vpop.f32.mrb[68].mxu0  ;;  %v1167_v56 = vadd.f32 %v3118_v26, %v3127_v42 }
 0x183   : > { %v2777_v10 = vpop.eup %2776  ;;  %v1697_v8 = vmul.f32 %v2775_v5, %v3227_v24  ;;  %2794 = vpow2.f32 %v2086_v9  ;;  %v3328_v30 = vadd.f32 %v2549_v18, %v3279_v36  ;;  %v2470_v44 = vpop.f32.mrb[69].mxu1 }
 0x184   : > { %v2779_v60 = vpop.eup %2778  ;;  %v2186_v13 = vpack.c.bf16 %v1699_v17, %v1698_v34  ;;  %v1610_v61 = vadd.f32 1.0, %v2777_v10  ;;  %2796 = vpow2.f32 %v2089_v62  ;;  %v1453_v45 = vpop.f32.mrb[69].mxu0  ;;  %v2471_v4 = vadd.f32 %v2470_v44, %v2469_v7 }
 0x185   : > { %v2781_v28 = vpop.eup %2780  ;;  %v2181_v14 = vpack.c.bf16 %v1697_v8, %v1696_v25  ;;  %v1608_v2 = vadd.f32 1.0, %v2779_v60  ;;  %2798 = vpow2.f32 %v2087_v37  ;;  %v2472_v24 = vpop.f32.mrb[70].mxu1  ;;  %v2092_v40 = vmul.f32 -1.442695, %v3328_v30 }
 0x186   : > { %v2550_v22 = vpop.f32.mrb[70].mxu0  ;;  %v2783_v52 = vpop.eup %2782  ;;  %2250 = vst [vmem:[%s3294_s29 + $0x18] sm:$0xff] %v2186_v13   ;;  %2800 = vrcp.f32 %v1610_v61  ;;  %v1611_v54 = vadd.f32 1.0, %v2781_v28  ;;  %v3333_v50 = vadd.f32 %v1453_v45, %v3254_v16  ;;  %v1317_v19 = vadd.f32 %v2471_v4, %v1156_v15 }
 0x187   : > { %v2473_v36 = vpop.f32.mrb[71].mxu1  ;;  %v1456_v41 = vpop.f32.mrb[71].mxu0  ;;  %2249 = vst [vmem:[%s3294_s29 + $0x10] sm:$0xff] %v2181_v14   ;;  %2802 = vrcp.f32 %v1608_v2  ;;  %v1609_v33 = vadd.f32 1.0, %v2783_v52  ;;  %v3337_v1 = vadd.f32 %v2550_v22, %v3282_v23 }
 0x188   : > { %v2474_v43 = vadd.f32 %v2473_v36, %v2472_v24  ;;  %v2785_v11 = vpop.eup %2784  ;;  %2804 = vrcp.f32 %v1611_v54  ;;  %v2090_v27 = vmul.f32 -1.442695, %v3333_v50  ;;  %v3341_v48 = vadd.f32 %v1456_v41, %v3257_v51 }
 0x189   : > { %v2787_v55 = vpop.eup %2786  ;;  %2806 = vrcp.f32 %v1609_v33  ;;  %v2093_v16 = vmul.f32 -1.442695, %v3337_v1  ;;  %v1702_v51 = vmul.f32 %v2785_v11, %v3240_v46  ;;  %v2475_v5 = vpop.f32.mrb[72].mxu1 }
 0x18a   : > { %v1320_v9 = vadd.f32 %v2474_v43, %v1159_v53  ;;  %v2789_v3 = vpop.eup %2788  ;;  %2808 = vpow2.f32 %v2092_v40  ;;  %v2091_v23 = vmul.f32 -1.442695, %v3341_v48  ;;  %v2553_v34 = vpop.f32.mrb[72].mxu0  ;;  %v1700_v37 = vmul.f32 %v2787_v55, %v3243_v12 }
 0x18b   : > { %v2791_v62 = vpop.eup %2790  ;;  %v1703_v15 = vmul.f32 %v2789_v3, %v3247_v58  ;;  %2810 = vpow2.f32 %v2090_v27  ;;  %v3353_v20 = vadd.f32 %v2553_v34, %v1317_v19  ;;  %v2476_v53 = vpop.f32.mrb[73].mxu1  ;;  %v1172_v27 = vadd.f32 %v3120_v32, %v3127_v42 }
 0x18c   : > { %v2793_v17 = vpop.eup %2792  ;;  %v1701_v10 = vmul.f32 %v2791_v62, %v3251_v39  ;;  %2812 = vpow2.f32 %v2093_v16  ;;  %v1469_v25 = vpop.f32.mrb[73].mxu0  ;;  %v2477_v46 = vadd.f32 %v2476_v53, %v2475_v5  ;;  %v1175_v3 = vadd.f32 %v3122_v38, %v3127_v42 }
 0x18d   : > { %v2795_v8 = vpop.eup %2794  ;;  %v2196_v26 = vpack.c.bf16 %v1703_v15, %v1702_v51  ;;  %v1614_v7 = vadd.f32 1.0, %v2793_v17  ;;  %2814 = vpow2.f32 %v2091_v23  ;;  %v2478_v58 = vpop.f32.mrb[74].mxu1  ;;  %v2096_v12 = vmul.f32 -1.442695, %v3353_v20 }
 0x18e   : > { %v2554_v18 = vpop.f32.mrb[74].mxu0  ;;  %v2797_v60 = vpop.eup %2796  ;;  %v2191_v13 = vpack.c.bf16 %v1701_v10, %v1700_v37  ;;  %v1612_v61 = vadd.f32 1.0, %v2795_v8  ;;  %v3357_v39 = vadd.f32 %v1469_v25, %v3316_v0  ;;  %v1325_v36 = vadd.f32 %v2477_v46, %v1164_v57 }
 0x18f   : > { %v2479_v44 = vpop.f32.mrb[75].mxu1  ;;  %v1472_v45 = vpop.f32.mrb[75].mxu0  ;;  %2252 = vst [vmem:[%s3294_s29 + $0x28] sm:$0xff] %v2196_v26   ;;  %2816 = vrcp.f32 %v1614_v7  ;;  %v1615_v14 = vadd.f32 1.0, %v2797_v60  ;;  %v3360_v2 = vadd.f32 %v2554_v18, %v1320_v9 }
 0x190   : > { %v2799_v28 = vpop.eup %2798  ;;  %v2480_v4 = vadd.f32 %v2479_v44, %v2478_v58  ;;  %2251 = vst [vmem:[%s3294_s29 + $0x20] sm:$0xff] %v2191_v13   ;;  %2818 = vrcp.f32 %v1612_v61  ;;  %v2094_v52 = vmul.f32 -1.442695, %v3357_v39  ;;  %v3365_v54 = vadd.f32 %v1472_v45, %v3318_v21 }
 0x191   : > { %v2801_v24 = vpop.eup %2800  ;;  %v1613_v22 = vadd.f32 1.0, %v2799_v28  ;;  %2820 = vrcp.f32 %v1615_v14  ;;  %v2097_v40 = vmul.f32 -1.442695, %v3360_v2  ;;  %v2481_v21 = vpop.f32.mrb[76].mxu1 }
 0x192   : > { %v2803_v0 = vpop.eup %2802  ;;  %v2095_v33 = vmul.f32 -1.442695, %v3365_v54  ;;  %v1328_v43 = vadd.f32 %v2480_v4, %v1167_v56  ;;  %v1706_v19 = vmul.f32 %v2801_v24, %v3264_v29  ;;  %v2557_v16 = vpop.f32.mrb[76].mxu0 }
 0x193   : > { %v2805_v41 = vpop.eup %2804  ;;  %2822 = vrcp.f32 %v1613_v22  ;;  %v1704_v57 = vmul.f32 %v2803_v0, %v3267_v6  ;;  %v2482_v62 = vpop.f32.mrb[77].mxu1 }
 0x194   : > { %v2807_v11 = vpop.eup %2806  ;;  %v1707_v55 = vmul.f32 %v2805_v41, %v3271_v49  ;;  %2824 = vpow2.f32 %v2096_v12  ;;  %v1485_v56 = vpop.f32.mrb[77].mxu0  ;;  %v2483_v49 = vadd.f32 %v2482_v62, %v2481_v21 }
 0x195   : > { %v2809_v9 = vpop.eup %2808  ;;  %v1705_v23 = vmul.f32 %v2807_v11, %v3275_v47  ;;  %2826 = vpow2.f32 %v2094_v52  ;;  %v2484_v15 = vpop.f32.mrb[78].mxu1  ;;  %v3377_v38 = vadd.f32 %v1485_v56, %v1325_v36 }
 0x196   : > { %v2811_v32 = vpop.eup %2810  ;;  %v2206_v51 = vpack.c.bf16 %v1707_v55, %v1706_v19  ;;  %v1618_v29 = vadd.f32 1.0, %v2809_v9  ;;  %2828 = vpow2.f32 %v2097_v40  ;;  %v2558_v5 = vpop.f32.mrb[78].mxu0  ;;  %v1333_v53 = vadd.f32 %v2483_v49, %v1172_v27 }
 0x197   : > { %v2813_v34 = vpop.eup %2812  ;;  %v2201_v17 = vpack.c.bf16 %v1705_v23, %v1704_v57  ;;  %v1616_v37 = vadd.f32 1.0, %v2811_v32  ;;  %2830 = vpow2.f32 %v2095_v33  ;;  %v2485_v42 = vpop.f32.mrb[79].mxu1  ;;  %v2098_v26 = vmul.f32 -1.442695, %v3377_v38 }
 0x198   : > { %v1488_v6 = vpop.f32.mrb[79].mxu0  ;;  %v2815_v47 = vpop.eup %2814  ;;  %2254 = vst [vmem:[%s3294_s29 + $0x38] sm:$0xff] %v2206_v51   ;;  %2832 = vrcp.f32 %v1618_v29  ;;  %v1619_v10 = vadd.f32 1.0, %v2813_v34  ;;  %v2486_v25 = vadd.f32 %v2485_v42, %v2484_v15  ;;  %v3384_v58 = vadd.f32 %v2557_v16, %v1333_v53 }
 0x199   : > { %2253 = vst [vmem:[%s3294_s29 + $0x30] sm:$0xff] %v2201_v17   ;;  %2834 = vrcp.f32 %v1616_v37  ;;  %v1617_v8 = vadd.f32 1.0, %v2815_v47  ;;  %v3382_v7 = vadd.f32 %v1488_v6, %v1328_v43  ;;  %v2817_v46 = vpop.eup %2816 }
 0x19a   : > { %2836 = vrcp.f32 %v1619_v10  ;;  %v1336_v18 = vadd.f32 %v2486_v25, %v1175_v3  ;;  %v2819_v60 = vpop.eup %2818  ;;  %v2100_v12 = vmul.f32 -1.442695, %v3384_v58  ;;  %v1710_v28 = vmul.f32 %v2817_v46, %v3298_v35 }
 0x19b   : > { %2838 = vrcp.f32 %v1617_v8  ;;  %v2099_v13 = vmul.f32 -1.442695, %v3382_v7  ;;  %v2821_v61 = vpop.eup %2820  ;;  %v1708_v24 = vmul.f32 %v2819_v60, %v3301_v63 }
 0x19c   : > { %2840 = vpow2.f32 %v2098_v26  ;;  %v3388_v44 = vadd.f32 %v2558_v5, %v1336_v18  ;;  %v1711_v14 = vmul.f32 %v2821_v61, %v3306_v31 }
 0x19d   : > { %v2823_v45 = vpop.eup %2822  ;;  %2842 = vpow2.f32 %v2099_v13 }
 0x19e   : > { %v2825_v4 = vpop.eup %2824  ;;  %v1709_v22 = vmul.f32 %v2823_v45, %v3312_v59  ;;  %2844 = vpow2.f32 %v2100_v12  ;;  %v2101_v52 = vmul.f32 -1.442695, %v3388_v44  ;;  %v2216_v40 = vpack.c.bf16 %v1711_v14, %v1710_v28 }
 0x19f   : > { %v2827_v0 = vpop.eup %2826  ;;  %v1622_v36 = vadd.f32 1.0, %v2825_v4 }
 0x1a0   : > { %v2829_v41 = vpop.eup %2828  ;;  %v2211_v33 = vpack.c.bf16 %v1709_v22, %v1708_v24  ;;  %v1620_v43 = vadd.f32 1.0, %v2827_v0  ;;  %2846 = vpow2.f32 %v2101_v52  ;;  %2256 = vst [vmem:[%s3294_s29 + $0x48] sm:$0xff] %v2216_v40  }
 0x1a1   : > { %v2831_v35 = vpop.eup %2830  ;;  %2848 = vrcp.f32 %v1622_v36  ;;  %v1623_v31 = vadd.f32 1.0, %v2829_v41 }
 0x1a2   : > { %v2833_v11 = vpop.eup %2832  ;;  %2255 = vst [vmem:[%s3294_s29 + $0x40] sm:$0xff] %v2211_v33   ;;  %2850 = vrcp.f32 %v1620_v43  ;;  %v1621_v63 = vadd.f32 1.0, %v2831_v35 }
 0x1a3   : > { %v2835_v27 = vpop.eup %2834  ;;  %2852 = vrcp.f32 %v1623_v31  ;;  %v1714_v55 = vmul.f32 %v2833_v11, %v3328_v30 }
 0x1a4   : > { %v2837_v59 = vpop.eup %2836  ;;  %2854 = vrcp.f32 %v1621_v63  ;;  %v1712_v9 = vmul.f32 %v2835_v27, %v3333_v50 }
 0x1a5   : > { %v2839_v19 = vpop.eup %2838  ;;  %v1715_v21 = vmul.f32 %v2837_v59, %v3337_v1 }
 0x1a6   : > { %v2841_v16 = vpop.eup %2840  ;;  %v1713_v3 = vmul.f32 %v2839_v19, %v3341_v48 }
 0x1a7   : > { %v2843_v57 = vpop.eup %2842  ;;  %v2226_v23 = vpack.c.bf16 %v1715_v21, %v1714_v55  ;;  %v1624_v62 = vadd.f32 1.0, %v2841_v16 }
 0x1a8   : > { %v2845_v56 = vpop.eup %2844  ;;  %v2221_v32 = vpack.c.bf16 %v1713_v3, %v1712_v9  ;;  %v1625_v51 = vadd.f32 1.0, %v2843_v57 }
 0x1a9   : > { %2258 = vst [vmem:[%s3294_s29 + $0x58] sm:$0xff] %v2226_v23   ;;  %v1626_v29 = vadd.f32 1.0, %v2845_v56  ;;  %2856 = vrcp.f32 %v1624_v62 }
 0x1aa   : > { %v2847_v49 = vpop.eup %2846  ;;  %2257 = vst [vmem:[%s3294_s29 + $0x50] sm:$0xff] %v2221_v32   ;;  %2858 = vrcp.f32 %v1625_v51 }
 0x1ab   : > { %v2849_v30 = vpop.eup %2848  ;;  %2860 = vrcp.f32 %v1626_v29  ;;  %v1627_v1 = vadd.f32 1.0, %v2847_v49 }
 0x1ac   : > { %v2851_v50 = vpop.eup %2850  ;;  %v1718_v5 = vmul.f32 %v2849_v30, %v3353_v20 }
 0x1ad   : > { %v2853_v15 = vpop.eup %2852  ;;  %2862 = vrcp.f32 %v1627_v1  ;;  %v1716_v17 = vmul.f32 %v2851_v50, %v3357_v39 }
 0x1ae   : > { %v2855_v48 = vpop.eup %2854  ;;  %v1719_v34 = vmul.f32 %v2853_v15, %v3360_v2 }
 0x1af   : > { %v1717_v37 = vmul.f32 %v2855_v48, %v3365_v54 }
 0x1b0   : > { %v2236_v42 = vpack.c.bf16 %v1719_v34, %v1718_v5 }
 0x1b1   : > { %v2231_v6 = vpack.c.bf16 %v1717_v37, %v1716_v17 }
 0x1b2   : > { %2260 = vst [vmem:[%s3294_s29 + $0x68] sm:$0xff] %v2236_v42  }
 0x1b3   : > { %v2857_v47 = vpop.eup %2856  ;;  %2259 = vst [vmem:[%s3294_s29 + $0x60] sm:$0xff] %v2231_v6  }
 0x1b4   : > { %v2859_v10 = vpop.eup %2858  ;;  %v1720_v25 = vmul.f32 %v2857_v47, %v3377_v38 }
 0x1b5   : > { %v2861_v53 = vpop.eup %2860  ;;  %v1721_v8 = vmul.f32 %v2859_v10, %v3382_v7 }
 0x1b6   : > { %v1722_v2 = vmul.f32 %v2861_v53, %v3384_v58 }
 0x1b7   : > { %v2863_v20 = vpop.eup %2862  ;;  %v2241_v26 = vpack.c.bf16 %v1721_v8, %v1720_v25 }
 0x1b8   : > { %v1723_v39 = vmul.f32 %v2863_v20, %v3388_v44 }
 0x1b9   : > { %2261 = vst [vmem:[%s3294_s29 + $0x70] sm:$0xff] %v2241_v26  }
 0x1ba   : > { %v2246_v54 = vpack.c.bf16 %v1723_v39, %v1722_v2 }
 0x1bc   : > { %2262 = vst [vmem:[%s3294_s29 + $0x78] sm:$0xff] %v2246_v54  }
 0x1bd PF: > { %s13_s12 = sadd.s32 1, %s2870_s12  }
 0x1be   : > { %p10_p4 = scmp.ge.s32.totalorder %s13_s12, 4  }
 0x1c0   :  { %12 = sbr.rel (!%p10_p4) target bundleno = 1 (0x1), region = 62 }

// kernel: transformer_no_encoder_forward.5
= control target key start
LH: loop header
LB: loop body
LE: loop exit
PB: predicated region body
PF: predicated region fallthrough
CT: control target
= control target key end

     0   :  { %s2285_s18 = smov 0   ;;  %s2742_s0 = inlined_call_operand.vmem [shape: bf16[512,384], index: 0, kind: input, shape index: {}]   ;;  %s2743_s1 = inlined_call_operand.vmem [shape: bf16[384,128], index: 1, kind: input, shape index: {}]   ;;  %s2744_s2 = inlined_call_operand.vmem [shape: f32[1,128], index: 2, kind: input, shape index: {}]   ;;  %s2745_s3 = inlined_call_operand.vmem [shape: bf16[128,128], index: 3, kind: input, shape index: {}]   ;;  %s2746_s4 = inlined_call_operand.vmem [shape: f32[1,128], index: 4, kind: input, shape index: {}]   ;;  %s2747_s5 = inlined_call_operand.vmem [shape: f32[512,128], index: 5, kind: output, shape index: {}]  }
   0x1 LB: > { %s1633_s19 = sadd.s32 4294967295, %s2253_s18   ;;  %p1637_p0 = scmp.ge.s32.totalorder %s2253_s18, 1  ;;  %s2253_s18 = sphi %s2285_s18, %s15_s18  }
   0x2   : > { %p189_p1 = scmp.lt.s32.totalorder %s2253_s18, 3 }
   0x4   : > { %p190_p2 = pnand %p1637_p0, %p189_p1 }
   0x5   : > { %v2023_v0 = vld [vmem:[%s2743_s1 + $0x40] sm:$0xff] (!%p190_p2)   ;;  %v2025_v2 = vld [vmem:[%s2743_s1 + $0x48] sm:$0xff] (!%p190_p2)   ;;  %v2028_v5 = vld [vmem:[%s2743_s1 + $0x50] sm:$0xff] (!%p190_p2)   ;;  %s1638_s9 = sshll.u32 (!%p190_p2), %s1633_s19, 5 }
   0x6   : > { %193 = sbr.rel (%p190_p2) target bundleno = 627 (0x273), region = 40  ;;  %v2024_v1 = vld [vmem:[%s2743_s1] sm:$0xff] (!%p190_p2)   ;;  %1758 = vmatprep.subr.bf16.mxu0 (!%p190_p2), %v2023_v0  ;;  %v2027_v4 = vld [vmem:[%s2743_s1 + $0x8] sm:$0xff] (!%p190_p2)   ;;  %v2030_v7 = vld [vmem:[%s2743_s1 + $0x10] sm:$0xff] (!%p190_p2)   ;;  %p219_p3 = scmp.lt.s32.totalorder (!%p190_p2), %s1638_s9, 63 }
   0x7   : > { %1759 = vmatpush3.bf16.msra.mxu0 (!%p190_p2), %v2024_v1  ;;  %v2026_v3 = vld [vmem:[%s2743_s1 + $0x80] sm:$0xff] (!%p190_p2)   ;;  %v2029_v6 = vld [vmem:[%s2743_s1 + $0x88] sm:$0xff] (!%p190_p2)   ;;  %v2031_v8 = vld [vmem:[%s2743_s1 + $0x58] sm:$0xff] (!%p190_p2)  }
   0x8   : > { %1760 = vmatprep.subr.bf16.mxu0 (!%p190_p2), %v2025_v2  ;;  %1918 = vmatprep.subr.bf16.mxu1 (!%p190_p2), %v2026_v3  ;;  %v2032_v9 = vld [vmem:[%s2743_s1 + $0x90] sm:$0xff] (!%p190_p2)   ;;  %v2033_v10 = vld [vmem:[%s2743_s1 + $0x18] sm:$0xff] (!%p190_p2)   ;;  %v2034_v11 = vld [vmem:[%s2743_s1 + $0x60] sm:$0xff] (!%p190_p2)  }
   0x9   : > { %1919 = vmatpush3.bf16.msra.mxu1 (!%p190_p2), %v2026_v3  ;;  %v2035_v12 = vld [vmem:[%s2743_s1 + $0x98] sm:$0xff] (!%p190_p2)   ;;  %v2036_v13 = vld [vmem:[%s2743_s1 + $0x20] sm:$0xff] (!%p190_p2)   ;;  %v2037_v15 = vld [vmem:[%s2743_s1 + $0x68] sm:$0xff] (!%p190_p2)  }
   0xa   : > { %1920 = vmatprep.subr.bf16.mxu1 (!%p190_p2), %v2029_v6  ;;  %v2038_v14 = vld [vmem:[%s2743_s1 + $0xa0] sm:$0xff] (!%p190_p2)   ;;  %v2039_v16 = vld [vmem:[%s2743_s1 + $0x28] sm:$0xff] (!%p190_p2)   ;;  %v2040_v18 = vld [vmem:[%s2743_s1 + $0x70] sm:$0xff] (!%p190_p2)  }
   0xb   : > { %1761 = vmatpush3.bf16.msra.mxu0 (!%p190_p2), %v2027_v4  ;;  %v2041_v17 = vld [vmem:[%s2743_s1 + $0xa8] sm:$0xff] (!%p190_p2)   ;;  %v2042_v19 = vld [vmem:[%s2743_s1 + $0x30] sm:$0xff] (!%p190_p2)   ;;  %v2043_v20 = vld [vmem:[%s2743_s1 + $0x78] sm:$0xff] (!%p190_p2)  }
   0xc   : > { %1762 = vmatprep.subr.bf16.mxu0 (!%p190_p2), %v2028_v5  ;;  %v2044_v21 = vld [vmem:[%s2743_s1 + $0xb0] sm:$0xff] (!%p190_p2)   ;;  %v2045_v23 = vld [vmem:[%s2743_s1 + $0x38] sm:$0xff] (!%p190_p2)   ;;  %v2111_v3 = vld [vmem:[%s2745_s3] sm:$0xff] (!%p190_p2)  }
   0xd   : > { %1921 = vmatpush3.bf16.msra.mxu1 %v2029_v6  ;;  %s2749_s9 = smov (!%p219_p3, %s1638_s9), 63  ;;  %v2049_v25 = vld [vmem:[%s2743_s1 + $0xb8] sm:$0xff]   ;;  %v2112_v6 = vld [vmem:[%s2745_s3 + $0x8] sm:$0xff]  }
   0xe   : > { %1922 = vmatprep.subr.bf16.mxu1 %v2032_v9  ;;  %s2014_s29 = smul.u32 12, %s2749_s9  ;;  %s1641_s21 = sshll.u32 %s2749_s9, 3 }
   0xf   : > { %1763 = vmatpush3.bf16.msra.mxu0 %v2030_v7  ;;  %v2113_v7 = vld [vmem:[%s2745_s3 + $0x10] sm:$0xff]   ;;  %s2673_s26 = scalar_lea.vmem %s2747_s5, %s1641_s21 }
  0x10   : > { %1764 = vmatprep.subr.bf16.mxu0 %v2031_v8  ;;  %s2359_s16 = scalar_lea.vmem %s2742_s0, %s2014_s29 }
  0x11   : > { %1923 = vmatpush3.bf16.msra.mxu1 %v2032_v9  ;;  %v2048_v22 = vld [vmem:[%s2359_s16 + $0x4] ss:$12 sps:$4 sm:$0xff]   ;;  %v2050_v24 = vld [vmem:[%s2359_s16 + $0x8] ss:$12 sps:$4 sm:$0xff]   ;;  %v2046_v26 = vld [vmem:[%s2359_s16] ss:$12 sps:$4 sm:$0xff]  }
  0x12   : > { %1924 = vmatprep.subr.bf16.mxu1 %v2035_v12  ;;  %783 = vmatprep.mubr.bf16.mxu0 %v2048_v22  ;;  %v2052_v27 = vld [vmem:[%s2359_s16 + $0x1c] ss:$12 sps:$4 sm:$0xff]   ;;  %v2051_v28 = vld [vmem:[%s2359_s16 + $0x20] ss:$12 sps:$4 sm:$0xff]   ;;  %v2058_v29 = vld [vmem:[%s2359_s16 + $0x38] ss:$12 sps:$4 sm:$0xff]  }
  0x13   : > { %1765 = vmatpush3.bf16.msra.mxu0 %v2033_v10  ;;  %1934 = vmatprep.mubr.bf16.mxu1 %v2050_v24  ;;  %v2054_v30 = vld [vmem:[%s2359_s16 + $0x18] ss:$12 sps:$4 sm:$0xff]   ;;  %v2055_v31 = vld [vmem:[%s2359_s16 + $0x34] ss:$12 sps:$4 sm:$0xff]   ;;  %v2059_v32 = vld [vmem:[%s2359_s16 + $0x50] ss:$12 sps:$4 sm:$0xff]  }
  0x14   : > { %1766 = vmatprep.subr.bf16.mxu0 %v2034_v11  ;;  %v2066_v33 = vld [vmem:[%s2359_s16 + $0x68] ss:$12 sps:$4 sm:$0xff]   ;;  %v2057_v34 = vld [vmem:[%s2359_s16 + $0x30] ss:$12 sps:$4 sm:$0xff]   ;;  %v2060_v35 = vld [vmem:[%s2359_s16 + $0x4c] ss:$12 sps:$4 sm:$0xff]  }
  0x15   : > { %1925 = vmatpush3.bf16.msra.mxu1 %v2035_v12  ;;  %v2067_v36 = vld [vmem:[%s2359_s16 + $0x80] ss:$12 sps:$4 sm:$0xff]   ;;  %v2074_v37 = vld [vmem:[%s2359_s16 + $0x98] ss:$12 sps:$4 sm:$0xff]   ;;  %v2062_v38 = vld [vmem:[%s2359_s16 + $0x48] ss:$12 sps:$4 sm:$0xff]  }
  0x16   : > { %1926 = vmatprep.subr.bf16.mxu1 %v2038_v14  ;;  %v2063_v39 = vld [vmem:[%s2359_s16 + $0x64] ss:$12 sps:$4 sm:$0xff]   ;;  %v2082_v41 = vld [vmem:[%s2359_s16 + $0xc8] ss:$12 sps:$4 sm:$0xff]   ;;  %v2065_v42 = vld [vmem:[%s2359_s16 + $0x60] ss:$12 sps:$4 sm:$0xff]  }
  0x17   : > { %1767 = vmatpush3.bf16.msra.mxu0 %v2036_v13  ;;  %v2075_v40 = vld [vmem:[%s2359_s16 + $0xb0] ss:$12 sps:$4 sm:$0xff]   ;;  %v2083_v44 = vld [vmem:[%s2359_s16 + $0xe0] ss:$12 sps:$4 sm:$0xff]   ;;  %v2090_v45 = vld [vmem:[%s2359_s16 + $0xf8] ss:$12 sps:$4 sm:$0xff]  }
  0x18   : > { %1768 = vmatprep.subr.bf16.mxu0 %v2037_v15  ;;  %v2068_v43 = vld [vmem:[%s2359_s16 + $0x7c] ss:$12 sps:$4 sm:$0xff]   ;;  %v2070_v46 = vld [vmem:[%s2359_s16 + $0x78] ss:$12 sps:$4 sm:$0xff]   ;;  %v2071_v47 = vld [vmem:[%s2359_s16 + $0x94] ss:$12 sps:$4 sm:$0xff]  }
  0x19   : > { %1927 = vmatpush3.bf16.msra.mxu1 %v2038_v14  ;;  %v2091_v48 = vld [vmem:[%s2359_s16 + $0x110] ss:$12 sps:$4 sm:$0xff]   ;;  %v2098_v49 = vld [vmem:[%s2359_s16 + $0x128] ss:$12 sps:$4 sm:$0xff]   ;;  %v2076_v51 = vld [vmem:[%s2359_s16 + $0xac] ss:$12 sps:$4 sm:$0xff]  }
  0x1a   : > { %1928 = vmatprep.subr.bf16.mxu1 %v2041_v17  ;;  %v2073_v50 = vld [vmem:[%s2359_s16 + $0x90] ss:$12 sps:$4 sm:$0xff]   ;;  %v2099_v52 = vld [vmem:[%s2359_s16 + $0x140] ss:$12 sps:$4 sm:$0xff]   ;;  %v2106_v53 = vld [vmem:[%s2359_s16 + $0x158] ss:$12 sps:$4 sm:$0xff]  }
  0x1b   : > { %1769 = vmatpush3.bf16.msra.mxu0 %v2039_v16  ;;  %v2078_v54 = vld [vmem:[%s2359_s16 + $0xa8] ss:$12 sps:$4 sm:$0xff]   ;;  %v2079_v55 = vld [vmem:[%s2359_s16 + $0xc4] ss:$12 sps:$4 sm:$0xff]   ;;  %v2081_v57 = vld [vmem:[%s2359_s16 + $0xc0] ss:$12 sps:$4 sm:$0xff]  }
  0x1c   : > { %1770 = vmatprep.subr.bf16.mxu0 %v2040_v18  ;;  %v2107_v56 = vld [vmem:[%s2359_s16 + $0x170] ss:$12 sps:$4 sm:$0xff]   ;;  %v2086_v59 = vld [vmem:[%s2359_s16 + $0xd8] ss:$12 sps:$4 sm:$0xff]   ;;  %v2087_v60 = vld [vmem:[%s2359_s16 + $0xf4] ss:$12 sps:$4 sm:$0xff]  }
  0x1d   : > { %1929 = vmatpush3.bf16.msra.mxu1 %v2041_v17  ;;  %v2084_v58 = vld [vmem:[%s2359_s16 + $0xdc] ss:$12 sps:$4 sm:$0xff]   ;;  %v2092_v62 = vld [vmem:[%s2359_s16 + $0x10c] ss:$12 sps:$4 sm:$0xff]   ;;  %v2095_v0 = vld [vmem:[%s2359_s16 + $0x124] ss:$12 sps:$4 sm:$0xff]  }
  0x1e   : > { %1930 = vmatprep.subr.bf16.mxu1 %v2044_v21  ;;  %v2089_v61 = vld [vmem:[%s2359_s16 + $0xf0] ss:$12 sps:$4 sm:$0xff]   ;;  %v2094_v63 = vld [vmem:[%s2359_s16 + $0x108] ss:$12 sps:$4 sm:$0xff]   ;;  %v2097_v1 = vld [vmem:[%s2359_s16 + $0x120] ss:$12 sps:$4 sm:$0xff]  }
  0x1f   : > { %1771 = vmatpush3.bf16.msra.mxu0 %v2042_v19  ;;  %v2100_v2 = vld [vmem:[%s2359_s16 + $0x13c] ss:$12 sps:$4 sm:$0xff]   ;;  %v2102_v4 = vld [vmem:[%s2359_s16 + $0x138] ss:$12 sps:$4 sm:$0xff]   ;;  %v2103_v5 = vld [vmem:[%s2359_s16 + $0x154] ss:$12 sps:$4 sm:$0xff]  }
  0x20   : > { %1772 = vmatprep.subr.bf16.mxu0 %v2043_v20  ;;  %v2105_v8 = vld [vmem:[%s2359_s16 + $0x150] ss:$12 sps:$4 sm:$0xff]   ;;  %v2108_v9 = vld [vmem:[%s2359_s16 + $0x16c] ss:$12 sps:$4 sm:$0xff]   ;;  %v2115_v11 = vld [vmem:[%s2745_s3 + $0x20] sm:$0xff]  }
  0x21   : > { %1931 = vmatpush3.bf16.msra.mxu1 %v2044_v21  ;;  %v2114_v10 = vld [vmem:[%s2745_s3 + $0x18] sm:$0xff]   ;;  %v2110_v12 = vld [vmem:[%s2359_s16 + $0x168] ss:$12 sps:$4 sm:$0xff]   ;;  %v2448_v18 = vld [vmem:[%s2744_s2] ss:$0 sm:$0xff] }
  0x22   : > { %1932 = vmatprep.subr.bf16.mxu1 %v2049_v25  ;;  %v2116_v13 = vld [vmem:[%s2745_s3 + $0x28] sm:$0xff]   ;;  %v2117_v14 = vld [vmem:[%s2745_s3 + $0x30] sm:$0xff]   ;;  %v2118_v15 = vld [vmem:[%s2745_s3 + $0x38] sm:$0xff]  }
  0x23   : > { %1773 = vmatpush3.bf16.msra.mxu0 %v2045_v23 }
  0x25   : > { %1933 = vmatpush3.bf16.msra.mxu1 %v2049_v25 }
  0x26   : > { %784 = vmatmul.mubr.bf16.vlgmr.msra.gmra.mrb[0].mxu0 %v2046_v26  ;;  %1966 = vmatprep.subr.bf16.mxu1 %v2111_v3 }
  0x27   : > { %791 = vmatprep.mubr.bf16.mxu0 %v2052_v27 }
  0x28   : > { %1935 = vmatmul.mubr.bf16.vlgmr.msra.gmra.mrb[0].mxu1 %v2051_v28 }
  0x29   : > { %1938 = vmatprep.mubr.bf16.mxu1 %v2058_v29  ;;  %1967 = vmatpush3.bf16.msra.mxu1 %v2111_v3 }
  0x2a   : > { %1968 = vmatprep.subr.bf16.mxu1 %v2112_v6 }
  0x2d   : > { %1969 = vmatpush3.bf16.msra.mxu1 %v2112_v6 }
  0x2e   : > { %792 = vmatmul.mubr.bf16.gmra.mrb[4].mxu0 %v2054_v30  ;;  %1970 = vmatprep.subr.bf16.mxu1 %v2113_v7 }
  0x2f   : > { %799 = vmatprep.mubr.bf16.mxu0 %v2055_v31 }
  0x30   : > { %1939 = vmatmul.mubr.bf16.gmra.mrb[4].mxu1 %v2059_v32 }
  0x31   : > { %1942 = vmatprep.mubr.bf16.mxu1 %v2066_v33  ;;  %1971 = vmatpush3.bf16.msra.mxu1 %v2113_v7 }
  0x32   : > { %1972 = vmatprep.subr.bf16.mxu1 %v2114_v10 }
  0x35   : > { %1973 = vmatpush3.bf16.msra.mxu1 %v2114_v10 }
  0x36   : > { %800 = vmatmul.mubr.bf16.gmra.mrb[8].mxu0 %v2057_v34  ;;  %1974 = vmatprep.subr.bf16.mxu1 %v2115_v11 }
  0x37   : > { %807 = vmatprep.mubr.bf16.mxu0 %v2060_v35 }
  0x38   : > { %1943 = vmatmul.mubr.bf16.gmra.mrb[8].mxu1 %v2067_v36 }
  0x39   : > { %1946 = vmatprep.mubr.bf16.mxu1 %v2074_v37  ;;  %1975 = vmatpush3.bf16.msra.mxu1 %v2115_v11 }
  0x3a   : > { %1976 = vmatprep.subr.bf16.mxu1 %v2116_v13 }
  0x3d   : > { %1977 = vmatpush3.bf16.msra.mxu1 %v2116_v13 }
  0x3e   : > { %808 = vmatmul.mubr.bf16.gmra.mrb[12].mxu0 %v2062_v38  ;;  %1978 = vmatprep.subr.bf16.mxu1 %v2117_v14 }
  0x3f   : > { %815 = vmatprep.mubr.bf16.mxu0 %v2063_v39 }
  0x40   : > { %1947 = vmatmul.mubr.bf16.gmra.mrb[12].mxu1 %v2075_v40 }
  0x41   : > { %1950 = vmatprep.mubr.bf16.mxu1 %v2082_v41  ;;  %1979 = vmatpush3.bf16.msra.mxu1 %v2117_v14 }
  0x42   : > { %1980 = vmatprep.subr.bf16.mxu1 %v2118_v15 }
  0x45   : > { %1981 = vmatpush3.bf16.msra.mxu1 %v2118_v15 }
  0x46   : > { %816 = vmatmul.mubr.bf16.gmra.mrb[16].mxu0 %v2065_v42 }
  0x47   : > { %823 = vmatprep.mubr.bf16.mxu0 %v2068_v43 }
  0x48   : > { %1951 = vmatmul.mubr.bf16.gmra.mrb[16].mxu1 %v2083_v44 }
  0x49   : > { %1954 = vmatprep.mubr.bf16.mxu1 %v2090_v45 }
  0x4e   : > { %824 = vmatmul.mubr.bf16.gmra.mrb[20].mxu0 %v2070_v46 }
  0x4f   : > { %831 = vmatprep.mubr.bf16.mxu0 %v2071_v47 }
  0x50   : > { %1955 = vmatmul.mubr.bf16.gmra.mrb[20].mxu1 %v2091_v48 }
  0x51   : > { %1958 = vmatprep.mubr.bf16.mxu1 %v2098_v49 }
  0x56   : > { %832 = vmatmul.mubr.bf16.gmra.mrb[24].mxu0 %v2073_v50 }
  0x57   : > { %839 = vmatprep.mubr.bf16.mxu0 %v2076_v51 }
  0x58   : > { %1959 = vmatmul.mubr.bf16.gmra.mrb[24].mxu1 %v2099_v52 }
  0x59   : > { %1962 = vmatprep.mubr.bf16.mxu1 %v2106_v53 }
  0x5e   : > { %840 = vmatmul.mubr.bf16.gmra.mrb[28].mxu0 %v2078_v54 }
  0x5f   : > { %847 = vmatprep.mubr.bf16.mxu0 %v2079_v55 }
  0x60   : > { %1963 = vmatmul.mubr.bf16.gmra.mrb[28].mxu1 %v2107_v56 }
  0x66   : > { %848 = vmatmul.mubr.bf16.gmra.mrb[32].mxu0 %v2081_v57 }
  0x67   : > { %855 = vmatprep.mubr.bf16.mxu0 %v2084_v58 }
  0x6e   : > { %856 = vmatmul.mubr.bf16.gmra.mrb[36].mxu0 %v2086_v59 }
  0x6f   : > { %863 = vmatprep.mubr.bf16.mxu0 %v2087_v60 }
  0x76   : > { %864 = vmatmul.mubr.bf16.gmra.mrb[40].mxu0 %v2089_v61 }
  0x77   : > { %871 = vmatprep.mubr.bf16.mxu0 %v2092_v62 }
  0x7e   : > { %872 = vmatmul.mubr.bf16.gmra.mrb[44].mxu0 %v2094_v63 }
  0x7f   : > { %879 = vmatprep.mubr.bf16.mxu0 %v2095_v0 }
  0x86   : > { %880 = vmatmul.mubr.bf16.gmra.mrb[48].mxu0 %v2097_v1 }
  0x87   : > { %887 = vmatprep.mubr.bf16.mxu0 %v2100_v2 }
  0x8e   : > { %888 = vmatmul.mubr.bf16.gmra.mrb[52].mxu0 %v2102_v4 }
  0x8f   : > { %895 = vmatprep.mubr.bf16.mxu0 %v2103_v5 }
  0x96   : > { %896 = vmatmul.mubr.bf16.gmra.mrb[56].mxu0 %v2105_v8 }
  0x97   : > { %903 = vmatprep.mubr.bf16.mxu0 %v2108_v9 }
  0x9e   : > { %904 = vmatmul.mubr.bf16.gmra.mrb[60].mxu0 %v2110_v12 }
  0xf9   : > { %v1774_v16 = vpop.f32.mrb[0].mxu0 }
  0xfa   : > { %v1775_v17 = vpop.f32.mrb[1].mxu0 }
  0xfb   : > { %v1776_v19 = vadd.f32 %v1775_v17, %v1774_v16  ;;  %v1777_v20 = vpop.f32.mrb[2].mxu0  ;;  %v1936_v22 = vpop.f32.mrb[0].mxu1 }
  0xfc   : > { %v1778_v21 = vpop.f32.mrb[3].mxu0  ;;  %v946_v25 = vpop.f32.mrb[1].mxu1 }
  0xfd   : > { %v1779_v23 = vadd.f32 %v1778_v21, %v1777_v20  ;;  %v786_v24 = vadd.f32 %v1776_v19, %v2448_v18  ;;  %v1937_v26 = vpop.f32.mrb[2].mxu1 }
  0xfe   : > { %v949_v29 = vpop.f32.mrb[3].mxu1 }
  0xff   : > { %v2451_v27 = vadd.f32 %v946_v25, %v786_v24  ;;  %v789_v28 = vadd.f32 %v1779_v23, %v2448_v18 }
 0x101   : > { %v1715_v30 = vmul.f32 -1.442695, %v2451_v27  ;;  %v2455_v31 = vadd.f32 %v949_v29, %v789_v28  ;;  %v1780_v32 = vpop.f32.mrb[4].mxu0 }
 0x102   : > { %v1781_v33 = vpop.f32.mrb[5].mxu0 }
 0x103   : > { %2119 = vpow2.f32 %v1715_v30  ;;  %v1716_v34 = vmul.f32 -1.442695, %v2455_v31  ;;  %v1782_v35 = vadd.f32 %v1781_v33, %v1780_v32  ;;  %v1783_v36 = vpop.f32.mrb[6].mxu0  ;;  %v1940_v38 = vpop.f32.mrb[4].mxu1 }
 0x104   : > { %v1784_v37 = vpop.f32.mrb[7].mxu0  ;;  %v962_v41 = vpop.f32.mrb[5].mxu1 }
 0x105   : > { %2121 = vpow2.f32 %v1716_v34  ;;  %v794_v39 = vadd.f32 %v1782_v35, %v2448_v18  ;;  %v1785_v40 = vadd.f32 %v1784_v37, %v1783_v36  ;;  %v1941_v42 = vpop.f32.mrb[6].mxu1 }
 0x106   : > { %v965_v45 = vpop.f32.mrb[7].mxu1 }
 0x107   : > { %v2459_v43 = vadd.f32 %v1936_v22, %v794_v39  ;;  %v797_v44 = vadd.f32 %v1785_v40, %v2448_v18 }
 0x109   : > { %v1717_v46 = vmul.f32 -1.442695, %v2459_v43  ;;  %v2463_v47 = vadd.f32 %v1937_v26, %v797_v44  ;;  %v1786_v48 = vpop.f32.mrb[8].mxu0 }
 0x10a   : > { %v1787_v49 = vpop.f32.mrb[9].mxu0 }
 0x10b   : > { %2123 = vpow2.f32 %v1717_v46  ;;  %v1718_v50 = vmul.f32 -1.442695, %v2463_v47  ;;  %v1788_v51 = vadd.f32 %v1787_v49, %v1786_v48  ;;  %v1789_v52 = vpop.f32.mrb[10].mxu0  ;;  %v2466_v54 = vpop.f32.mrb[8].mxu1 }
 0x10c   : > { %v1790_v53 = vpop.f32.mrb[11].mxu0  ;;  %v978_v58 = vpop.f32.mrb[9].mxu1 }
 0x10d   : > { %v2120_v55 = vpop.eup %2119  ;;  %2125 = vpow2.f32 %v1718_v50  ;;  %v1791_v56 = vadd.f32 %v1790_v53, %v1789_v52  ;;  %v802_v57 = vadd.f32 %v1788_v51, %v2448_v18  ;;  %v2469_v60 = vpop.f32.mrb[10].mxu1 }
 0x10e   : > { %v1169_v59 = vadd.f32 1.0, %v2120_v55  ;;  %v981_v0 = vpop.f32.mrb[11].mxu1 }
 0x10f   : > { %v2122_v61 = vpop.eup %2121  ;;  %v2471_v62 = vadd.f32 %v962_v41, %v802_v57  ;;  %v805_v63 = vadd.f32 %v1791_v56, %v2448_v18 }
 0x110   : > { %2127 = vrcp.f32 %v1169_v59  ;;  %v1170_v1 = vadd.f32 1.0, %v2122_v61 }
 0x111   : > { %v1719_v2 = vmul.f32 -1.442695, %v2471_v62  ;;  %v2475_v3 = vadd.f32 %v965_v45, %v805_v63  ;;  %v1792_v4 = vpop.f32.mrb[12].mxu0 }
 0x112   : > { %2129 = vrcp.f32 %v1170_v1  ;;  %v1793_v5 = vpop.f32.mrb[13].mxu0 }
 0x113   : > { %2131 = vpow2.f32 %v1719_v2  ;;  %v1720_v6 = vmul.f32 -1.442695, %v2475_v3  ;;  %v1794_v7 = vadd.f32 %v1793_v5, %v1792_v4  ;;  %v1795_v8 = vpop.f32.mrb[14].mxu0  ;;  %v2478_v10 = vpop.f32.mrb[12].mxu1 }
 0x114   : > { %v1796_v9 = vpop.f32.mrb[15].mxu0  ;;  %v2481_v14 = vpop.f32.mrb[13].mxu1 }
 0x115   : > { %v2124_v11 = vpop.eup %2123  ;;  %2133 = vpow2.f32 %v1720_v6  ;;  %v810_v12 = vadd.f32 %v1794_v7, %v2448_v18  ;;  %v1797_v13 = vadd.f32 %v1796_v9, %v1795_v8  ;;  %v2483_v16 = vpop.f32.mrb[14].mxu1 }
 0x116   : > { %v1171_v15 = vadd.f32 1.0, %v2124_v11  ;;  %v2488_v21 = vpop.f32.mrb[15].mxu1 }
 0x117   : > { %v2126_v17 = vpop.eup %2125  ;;  %v2485_v19 = vadd.f32 %v1940_v38, %v810_v12  ;;  %v813_v20 = vadd.f32 %v1797_v13, %v2448_v18 }
 0x118   : > { %2135 = vrcp.f32 %v1171_v15  ;;  %v1172_v22 = vadd.f32 1.0, %v2126_v17 }
 0x119   : > { %v1721_v23 = vmul.f32 -1.442695, %v2485_v19  ;;  %v2491_v24 = vadd.f32 %v1941_v42, %v813_v20  ;;  %v1798_v25 = vpop.f32.mrb[16].mxu0 }
 0x11a   : > { %v2128_v26 = vpop.eup %2127  ;;  %2137 = vrcp.f32 %v1172_v22  ;;  %v1799_v28 = vpop.f32.mrb[17].mxu0 }
 0x11b   : > { %2139 = vpow2.f32 %v1721_v23  ;;  %v1722_v29 = vmul.f32 -1.442695, %v2491_v24  ;;  %v1800_v30 = vadd.f32 %v1799_v28, %v1798_v25  ;;  %v1801_v32 = vpop.f32.mrb[18].mxu0  ;;  %v1265_v34 = vmul.f32 %v2128_v26, %v2451_v27  ;;  %v2495_v36 = vpop.f32.mrb[16].mxu1 }
 0x11c   : > { %v2130_v33 = vpop.eup %2129  ;;  %v1802_v35 = vpop.f32.mrb[19].mxu0 }
 0x11d   : > { %v2132_v37 = vpop.eup %2131  ;;  %v1266_v38 = vmul.f32 %v2130_v33, %v2455_v31  ;;  %2141 = vpow2.f32 %v1722_v29  ;;  %v1803_v39 = vadd.f32 %v1802_v35, %v1801_v32  ;;  %v818_v40 = vadd.f32 %v1800_v30, %v2448_v18  ;;  %v2499_v41 = vpop.f32.mrb[17].mxu1 }
 0x11e   : > { %v1173_v42 = vadd.f32 1.0, %v2132_v37  ;;  %v2501_v44 = vpop.f32.mrb[18].mxu1 }
 0x11f   : > { %v2134_v45 = vpop.eup %2133  ;;  %v2503_v46 = vadd.f32 %v978_v58, %v818_v40  ;;  %v821_v27 = vadd.f32 %v1803_v39, %v2448_v18  ;;  %v1297_v48 = vpack.c.bf16 %v1266_v38, %v1265_v34  ;;  %v2506_v49 = vpop.f32.mrb[19].mxu1 }
 0x120   : > { %2143 = vrcp.f32 %v1173_v42  ;;  %v1174_v50 = vadd.f32 1.0, %v2134_v45 }
 0x121   : > { %v1723_v31 = vmul.f32 -1.442695, %v2503_v46  ;;  %v2509_v51 = vadd.f32 %v981_v0, %v821_v27  ;;  %v1804_v52 = vpop.f32.mrb[20].mxu0  ;;  %1982 = vmatprep.mubr.bf16.mxu1 %v1297_v48 }
 0x122   : > { %v2136_v53 = vpop.eup %2135  ;;  %2145 = vrcp.f32 %v1174_v50  ;;  %v1805_v55 = vpop.f32.mrb[21].mxu0 }
 0x123   : > { %2147 = vpow2.f32 %v1723_v31  ;;  %v1724_v56 = vmul.f32 -1.442695, %v2509_v51  ;;  %v1806_v57 = vadd.f32 %v1805_v55, %v1804_v52  ;;  %v1807_v58 = vpop.f32.mrb[22].mxu0  ;;  %v1267_v61 = vmul.f32 %v2136_v53, %v2459_v43  ;;  %v2513_v1 = vpop.f32.mrb[20].mxu1 }
 0x124   : > { %v2138_v59 = vpop.eup %2137  ;;  %v1808_v63 = vpop.f32.mrb[23].mxu0 }
 0x125   : > { %v2140_v2 = vpop.eup %2139  ;;  %v1268_v0 = vmul.f32 %v2138_v59, %v2463_v47  ;;  %2149 = vpow2.f32 %v1724_v56  ;;  %v826_v4 = vadd.f32 %v1806_v57, %v2448_v18  ;;  %v1809_v5 = vadd.f32 %v1808_v63, %v1807_v58  ;;  %v2517_v6 = vpop.f32.mrb[21].mxu1 }
 0x126   : > { %v1175_v7 = vadd.f32 1.0, %v2140_v2  ;;  %v2519_v8 = vpop.f32.mrb[22].mxu1 }
 0x127   : > { %v2142_v9 = vpop.eup %2141  ;;  %v1298_v11 = vpack.c.bf16 %v1268_v0, %v1267_v61  ;;  %v2522_v12 = vadd.f32 %v2466_v54, %v826_v4  ;;  %v829_v43 = vadd.f32 %v1809_v5, %v2448_v18  ;;  %v2525_v13 = vpop.f32.mrb[23].mxu1 }
 0x128   : > { %2151 = vrcp.f32 %v1175_v7  ;;  %v1176_v47 = vadd.f32 1.0, %v2142_v9 }
 0x129   : > { %v1725_v15 = vmul.f32 -1.442695, %v2522_v12  ;;  %v2529_v17 = vadd.f32 %v2469_v60, %v829_v43  ;;  %v1810_v20 = vpop.f32.mrb[24].mxu0  ;;  %1983 = vmatmul.mubr.bf16.vlgmr.msra.gmra.mrb[32].mxu1 %v1298_v11 }
 0x12a   : > { %v2144_v22 = vpop.eup %2143  ;;  %2153 = vrcp.f32 %v1176_v47  ;;  %v1811_v23 = vpop.f32.mrb[25].mxu0 }
 0x12b   : > { %2155 = vpow2.f32 %v1725_v15  ;;  %v1726_v54 = vmul.f32 -1.442695, %v2529_v17  ;;  %v1812_v25 = vadd.f32 %v1811_v23, %v1810_v20  ;;  %v1813_v26 = vpop.f32.mrb[26].mxu0  ;;  %v1269_v29 = vmul.f32 %v2144_v22, %v2471_v62  ;;  %v2533_v32 = vpop.f32.mrb[24].mxu1 }
 0x12c   : > { %v2146_v28 = vpop.eup %2145  ;;  %v1814_v30 = vpop.f32.mrb[27].mxu0 }
 0x12d   : > { %v2148_v33 = vpop.eup %2147  ;;  %v1270_v60 = vmul.f32 %v2146_v28, %v2475_v3  ;;  %2157 = vpow2.f32 %v1726_v54  ;;  %v1815_v34 = vadd.f32 %v1814_v30, %v1813_v26  ;;  %v834_v35 = vadd.f32 %v1812_v25, %v2448_v18  ;;  %v2537_v37 = vpop.f32.mrb[25].mxu1 }
 0x12e   : > { %v1177_v38 = vadd.f32 1.0, %v2148_v33  ;;  %v2539_v39 = vpop.f32.mrb[26].mxu1 }
 0x12f   : > { %v2150_v40 = vpop.eup %2149  ;;  %v2542_v42 = vadd.f32 %v2481_v14, %v834_v35  ;;  %v837_v62 = vadd.f32 %v1815_v34, %v2448_v18  ;;  %v1299_v45 = vpack.c.bf16 %v1270_v60, %v1269_v29  ;;  %v2545_v27 = vpop.f32.mrb[27].mxu1 }
 0x130   : > { %2159 = vrcp.f32 %v1177_v38  ;;  %v1178_v3 = vadd.f32 1.0, %v2150_v40 }
 0x131   : > { %v1727_v48 = vmul.f32 -1.442695, %v2542_v42  ;;  %v2549_v50 = vadd.f32 %v2488_v21, %v837_v62  ;;  %v1816_v31 = vpop.f32.mrb[28].mxu0  ;;  %1986 = vmatprep.mubr.bf16.mxu1 %v1299_v45 }
 0x132   : > { %v2152_v52 = vpop.eup %2151  ;;  %2161 = vrcp.f32 %v1178_v3  ;;  %v1817_v53 = vpop.f32.mrb[29].mxu0 }
 0x133   : > { %2163 = vpow2.f32 %v1727_v48  ;;  %v1728_v14 = vmul.f32 -1.442695, %v2549_v50  ;;  %v1818_v55 = vadd.f32 %v1817_v53, %v1816_v31  ;;  %v1819_v56 = vpop.f32.mrb[30].mxu0  ;;  %v1271_v59 = vmul.f32 %v2152_v52, %v2485_v19  ;;  %v2553_v61 = vpop.f32.mrb[28].mxu1 }
 0x134   : > { %v2154_v57 = vpop.eup %2153  ;;  %v1820_v58 = vpop.f32.mrb[31].mxu0 }
 0x135   : > { %v2156_v63 = vpop.eup %2155  ;;  %2165 = vpow2.f32 %v1728_v14  ;;  %v842_v21 = vadd.f32 %v1818_v55, %v2448_v18  ;;  %v1821_v2 = vadd.f32 %v1820_v58, %v1819_v56  ;;  %v1272_v0 = vmul.f32 %v2154_v57, %v2491_v24  ;;  %v2557_v4 = vpop.f32.mrb[29].mxu1 }
 0x136   : > { %v1179_v5 = vadd.f32 1.0, %v2156_v63  ;;  %v2559_v7 = vpop.f32.mrb[30].mxu1 }
 0x137   : > { %v2158_v9 = vpop.eup %2157  ;;  %v2562_v11 = vadd.f32 %v2478_v10, %v842_v21  ;;  %v845_v19 = vadd.f32 %v1821_v2, %v2448_v18  ;;  %v1300_v43 = vpack.c.bf16 %v1272_v0, %v1271_v59  ;;  %v2565_v47 = vpop.f32.mrb[31].mxu1 }
 0x138   : > { %2167 = vrcp.f32 %v1179_v5  ;;  %v1180_v15 = vadd.f32 1.0, %v2158_v9 }
 0x139   : > { %v1729_v20 = vmul.f32 -1.442695, %v2562_v11  ;;  %v2569_v24 = vadd.f32 %v2483_v16, %v845_v19  ;;  %v1822_v22 = vpop.f32.mrb[32].mxu0  ;;  %1987 = vmatmul.mubr.bf16.gmra.mrb[36].mxu1 %v1300_v43 }
 0x13a   : > { %v2160_v23 = vpop.eup %2159  ;;  %2169 = vrcp.f32 %v1180_v15  ;;  %v1823_v54 = vpop.f32.mrb[33].mxu0 }
 0x13b   : > { %2171 = vpow2.f32 %v1729_v20  ;;  %v1730_v10 = vmul.f32 -1.442695, %v2569_v24  ;;  %v1824_v25 = vadd.f32 %v1823_v54, %v1822_v22  ;;  %v1825_v26 = vpop.f32.mrb[34].mxu0  ;;  %v1273_v29 = vmul.f32 %v2160_v23, %v2503_v46 }
 0x13c   : > { %v2162_v28 = vpop.eup %2161  ;;  %v1826_v30 = vpop.f32.mrb[35].mxu0 }
 0x13d   : > { %v2164_v33 = vpop.eup %2163  ;;  %v1274_v60 = vmul.f32 %v2162_v28, %v2509_v51  ;;  %2173 = vpow2.f32 %v1730_v10  ;;  %v1827_v16 = vadd.f32 %v1826_v30, %v1825_v26  ;;  %v850_v34 = vadd.f32 %v1824_v25, %v2448_v18 }
 0x13e   : > { %v1181_v35 = vadd.f32 1.0, %v2164_v33 }
 0x13f   : > { %v2166_v38 = vpop.eup %2165  ;;  %v2576_v40 = vadd.f32 %v2499_v41, %v850_v34  ;;  %v853_v62 = vadd.f32 %v1827_v16, %v2448_v18  ;;  %v1301_v45 = vpack.c.bf16 %v1274_v60, %v1273_v29 }
 0x140   : > { %2175 = vrcp.f32 %v1181_v35  ;;  %v1182_v3 = vadd.f32 1.0, %v2166_v38 }
 0x141   : > { %v1731_v46 = vmul.f32 -1.442695, %v2576_v40  ;;  %v2581_v48 = vadd.f32 %v2506_v49, %v853_v62  ;;  %v1828_v51 = vpop.f32.mrb[36].mxu0  ;;  %1990 = vmatprep.mubr.bf16.mxu1 %v1301_v45 }
 0x142   : > { %v2168_v31 = vpop.eup %2167  ;;  %2177 = vrcp.f32 %v1182_v3  ;;  %v1829_v52 = vpop.f32.mrb[37].mxu0 }
 0x143   : > { %2179 = vpow2.f32 %v1731_v46  ;;  %v1732_v53 = vmul.f32 -1.442695, %v2581_v48  ;;  %v1830_v41 = vadd.f32 %v1829_v52, %v1828_v51  ;;  %v1831_v14 = vpop.f32.mrb[38].mxu0  ;;  %v1275_v57 = vmul.f32 %v2168_v31, %v2522_v12 }
 0x144   : > { %v2170_v55 = vpop.eup %2169  ;;  %v1832_v56 = vpop.f32.mrb[39].mxu0 }
 0x145   : > { %v2172_v58 = vpop.eup %2171  ;;  %2181 = vpow2.f32 %v1732_v53  ;;  %v858_v59 = vadd.f32 %v1830_v41, %v2448_v18  ;;  %v1833_v49 = vadd.f32 %v1832_v56, %v1831_v14  ;;  %v1276_v63 = vmul.f32 %v2170_v55, %v2529_v17 }
 0x146   : > { %v1183_v21 = vadd.f32 1.0, %v2172_v58 }
 0x147   : > { %v2174_v2 = vpop.eup %2173  ;;  %v2588_v0 = vadd.f32 %v2495_v36, %v858_v59  ;;  %v861_v5 = vadd.f32 %v1833_v49, %v2448_v18  ;;  %v1302_v9 = vpack.c.bf16 %v1276_v63, %v1275_v57 }
 0x148   : > { %2183 = vrcp.f32 %v1183_v21  ;;  %v1184_v19 = vadd.f32 1.0, %v2174_v2 }
 0x149   : > { %v1733_v43 = vmul.f32 -1.442695, %v2588_v0  ;;  %v2593_v12 = vadd.f32 %v2501_v44, %v861_v5  ;;  %v1834_v15 = vpop.f32.mrb[40].mxu0  ;;  %1991 = vmatmul.mubr.bf16.gmra.mrb[40].mxu1 %v1302_v9 }
 0x14a   : > { %v2176_v20 = vpop.eup %2175  ;;  %2185 = vrcp.f32 %v1184_v19  ;;  %v1835_v17 = vpop.f32.mrb[41].mxu0 }
 0x14b   : > { %2187 = vpow2.f32 %v1733_v43  ;;  %v1734_v22 = vmul.f32 -1.442695, %v2593_v12  ;;  %v1836_v36 = vadd.f32 %v1835_v17, %v1834_v15  ;;  %v1837_v23 = vpop.f32.mrb[42].mxu0  ;;  %v1277_v10 = vmul.f32 %v2176_v20, %v2542_v42 }
 0x14c   : > { %v2178_v54 = vpop.eup %2177  ;;  %v1838_v25 = vpop.f32.mrb[43].mxu0 }
 0x14d   : > { %v2180_v26 = vpop.eup %2179  ;;  %v1278_v28 = vmul.f32 %v2178_v54, %v2549_v50  ;;  %2189 = vpow2.f32 %v1734_v22  ;;  %v1839_v44 = vadd.f32 %v1838_v25, %v1837_v23  ;;  %v866_v29 = vadd.f32 %v1836_v36, %v2448_v18 }
 0x14e   : > { %v1185_v30 = vadd.f32 1.0, %v2180_v26 }
 0x14f   : > { %v2182_v33 = vpop.eup %2181  ;;  %v2600_v60 = vadd.f32 %v2517_v6, %v866_v29  ;;  %v869_v16 = vadd.f32 %v1839_v44, %v2448_v18  ;;  %v1303_v34 = vpack.c.bf16 %v1278_v28, %v1277_v10 }
 0x150   : > { %2191 = vrcp.f32 %v1185_v30  ;;  %v1186_v35 = vadd.f32 1.0, %v2182_v33 }
 0x151   : > { %v1735_v42 = vmul.f32 -1.442695, %v2600_v60  ;;  %v2605_v38 = vadd.f32 %v2525_v13, %v869_v16  ;;  %v1840_v50 = vpop.f32.mrb[44].mxu0  ;;  %1994 = vmatprep.mubr.bf16.mxu1 %v1303_v34 }
 0x152   : > { %v2184_v62 = vpop.eup %2183  ;;  %2193 = vrcp.f32 %v1186_v35  ;;  %v1841_v45 = vpop.f32.mrb[45].mxu0 }
 0x153   : > { %2195 = vpow2.f32 %v1735_v42  ;;  %v1736_v3 = vmul.f32 -1.442695, %v2605_v38  ;;  %v1842_v6 = vadd.f32 %v1841_v45, %v1840_v50  ;;  %v1843_v46 = vpop.f32.mrb[46].mxu0  ;;  %v1279_v52 = vmul.f32 %v2184_v62, %v2562_v11 }
 0x154   : > { %v2186_v51 = vpop.eup %2185  ;;  %v1844_v31 = vpop.f32.mrb[47].mxu0 }
 0x155   : > { %v2188_v53 = vpop.eup %2187  ;;  %2197 = vpow2.f32 %v1736_v3  ;;  %v874_v41 = vadd.f32 %v1842_v6, %v2448_v18  ;;  %v1845_v13 = vadd.f32 %v1844_v31, %v1843_v46  ;;  %v1280_v14 = vmul.f32 %v2186_v51, %v2569_v24 }
 0x156   : > { %v1187_v55 = vadd.f32 1.0, %v2188_v53 }
 0x157   : > { %v2190_v56 = vpop.eup %2189  ;;  %v2612_v57 = vadd.f32 %v2513_v1, %v874_v41  ;;  %v877_v58 = vadd.f32 %v1845_v13, %v2448_v18  ;;  %v1304_v59 = vpack.c.bf16 %v1280_v14, %v1279_v52 }
 0x158   : > { %2199 = vrcp.f32 %v1187_v55  ;;  %v1188_v49 = vadd.f32 1.0, %v2190_v56 }
 0x159   : > { %v1737_v63 = vmul.f32 -1.442695, %v2612_v57  ;;  %v2617_v11 = vadd.f32 %v2519_v8, %v877_v58  ;;  %v1846_v21 = vpop.f32.mrb[48].mxu0  ;;  %1995 = vmatmul.mubr.bf16.gmra.mrb[44].mxu1 %v1304_v59 }
 0x15a   : > { %v2192_v2 = vpop.eup %2191  ;;  %2201 = vrcp.f32 %v1188_v49  ;;  %v1847_v24 = vpop.f32.mrb[49].mxu0 }
 0x15b   : > { %2203 = vpow2.f32 %v1737_v63  ;;  %v1738_v5 = vmul.f32 -1.442695, %v2617_v11  ;;  %v1848_v1 = vadd.f32 %v1847_v24, %v1846_v21  ;;  %v1849_v9 = vpop.f32.mrb[50].mxu0  ;;  %v1281_v43 = vmul.f32 %v2192_v2, %v2576_v40 }
 0x15c   : > { %v2194_v19 = vpop.eup %2193  ;;  %v1850_v15 = vpop.f32.mrb[51].mxu0 }
 0x15d   : > { %v2196_v20 = vpop.eup %2195  ;;  %v1282_v17 = vmul.f32 %v2194_v19, %v2581_v48  ;;  %2205 = vpow2.f32 %v1738_v5  ;;  %v1851_v8 = vadd.f32 %v1850_v15, %v1849_v9  ;;  %v882_v22 = vadd.f32 %v1848_v1, %v2448_v18 }
 0x15e   : > { %v1189_v36 = vadd.f32 1.0, %v2196_v20 }
 0x15f   : > { %v2198_v23 = vpop.eup %2197  ;;  %v2624_v54 = vadd.f32 %v2537_v37, %v882_v22  ;;  %v885_v10 = vadd.f32 %v1851_v8, %v2448_v18  ;;  %v1305_v25 = vpack.c.bf16 %v1282_v17, %v1281_v43 }
 0x160   : > { %2207 = vrcp.f32 %v1189_v36  ;;  %v1190_v26 = vadd.f32 1.0, %v2198_v23 }
 0x161   : > { %v1739_v40 = vmul.f32 -1.442695, %v2624_v54  ;;  %v2629_v28 = vadd.f32 %v2545_v27, %v885_v10  ;;  %v1852_v48 = vpop.f32.mrb[52].mxu0  ;;  %1998 = vmatprep.mubr.bf16.mxu1 %v1305_v25 }
 0x162   : > { %v2200_v44 = vpop.eup %2199  ;;  %2209 = vrcp.f32 %v1190_v26  ;;  %v1853_v29 = vpop.f32.mrb[53].mxu0 }
 0x163   : > { %2211 = vpow2.f32 %v1739_v40  ;;  %v1740_v30 = vmul.f32 -1.442695, %v2629_v28  ;;  %v1854_v37 = vadd.f32 %v1853_v29, %v1852_v48  ;;  %v1855_v33 = vpop.f32.mrb[54].mxu0  ;;  %v1283_v35 = vmul.f32 %v2200_v44, %v2588_v0 }
 0x164   : > { %v2202_v16 = vpop.eup %2201  ;;  %v1856_v34 = vpop.f32.mrb[55].mxu0 }
 0x165   : > { %v2204_v42 = vpop.eup %2203  ;;  %2213 = vpow2.f32 %v1740_v30  ;;  %v890_v50 = vadd.f32 %v1854_v37, %v2448_v18  ;;  %v1857_v27 = vadd.f32 %v1856_v34, %v1855_v33  ;;  %v1284_v62 = vmul.f32 %v2202_v16, %v2593_v12 }
 0x166   : > { %v1191_v45 = vadd.f32 1.0, %v2204_v42 }
 0x167   : > { %v2206_v3 = vpop.eup %2205  ;;  %v2636_v6 = vadd.f32 %v2533_v32, %v890_v50  ;;  %v893_v46 = vadd.f32 %v1857_v27, %v2448_v18  ;;  %v1306_v51 = vpack.c.bf16 %v1284_v62, %v1283_v35 }
 0x168   : > { %2215 = vrcp.f32 %v1191_v45  ;;  %v1192_v31 = vadd.f32 1.0, %v2206_v3 }
 0x169   : > { %v1741_v52 = vmul.f32 -1.442695, %v2636_v6  ;;  %v2641_v0 = vadd.f32 %v2539_v39, %v893_v46  ;;  %v1858_v53 = vpop.f32.mrb[56].mxu0  ;;  %1999 = vmatmul.mubr.bf16.gmra.mrb[48].mxu1 %v1306_v51 }
 0x16a   : > { %v2208_v41 = vpop.eup %2207  ;;  %2217 = vrcp.f32 %v1192_v31  ;;  %v1859_v12 = vpop.f32.mrb[57].mxu0 }
 0x16b   : > { %2219 = vpow2.f32 %v1741_v52  ;;  %v1742_v13 = vmul.f32 -1.442695, %v2641_v0  ;;  %v1860_v32 = vadd.f32 %v1859_v12, %v1858_v53  ;;  %v1861_v14 = vpop.f32.mrb[58].mxu0  ;;  %v1285_v56 = vmul.f32 %v2208_v41, %v2600_v60 }
 0x16c   : > { %v2210_v55 = vpop.eup %2209  ;;  %v1862_v58 = vpop.f32.mrb[59].mxu0 }
 0x16d   : > { %v2212_v59 = vpop.eup %2211  ;;  %v1286_v49 = vmul.f32 %v2210_v55, %v2605_v38  ;;  %2221 = vpow2.f32 %v1742_v13  ;;  %v1863_v39 = vadd.f32 %v1862_v58, %v1861_v14  ;;  %v898_v63 = vadd.f32 %v1860_v32, %v2448_v18 }
 0x16e   : > { %v1193_v21 = vadd.f32 1.0, %v2212_v59 }
 0x16f   : > { %v2214_v2 = vpop.eup %2213  ;;  %v2648_v24 = vadd.f32 %v2557_v4, %v898_v63  ;;  %v901_v5 = vadd.f32 %v1863_v39, %v2448_v18  ;;  %v1307_v1 = vpack.c.bf16 %v1286_v49, %v1285_v56  ;;  %v2668_v56 = vld [vmem:[%s2746_s4] ss:$0 sm:$0xff] }
 0x170   : > { %2223 = vrcp.f32 %v1193_v21  ;;  %v1194_v9 = vadd.f32 1.0, %v2214_v2 }
 0x171   : > { %v1743_v60 = vmul.f32 -1.442695, %v2648_v24  ;;  %v1062_v19 = vadd.f32 %v2565_v47, %v901_v5  ;;  %v1864_v43 = vpop.f32.mrb[60].mxu0  ;;  %2002 = vmatprep.mubr.bf16.mxu1 %v1307_v1 }
 0x172   : > { %v2216_v38 = vpop.eup %2215  ;;  %2225 = vrcp.f32 %v1194_v9  ;;  %v1865_v15 = vpop.f32.mrb[61].mxu0 }
 0x173   : > { %2227 = vpow2.f32 %v1743_v60  ;;  %v1744_v20 = vmul.f32 -1.442695, %v1062_v19  ;;  %v1866_v17 = vadd.f32 %v1865_v15, %v1864_v43  ;;  %v1867_v8 = vpop.f32.mrb[62].mxu0  ;;  %v1287_v36 = vmul.f32 %v2216_v38, %v2612_v57 }
 0x174   : > { %v2218_v4 = vpop.eup %2217  ;;  %v1868_v22 = vpop.f32.mrb[63].mxu0 }
 0x175   : > { %v2220_v23 = vpop.eup %2219  ;;  %2229 = vpow2.f32 %v1744_v20  ;;  %v906_v10 = vadd.f32 %v1866_v17, %v2448_v18  ;;  %v1869_v25 = vadd.f32 %v1868_v22, %v1867_v8  ;;  %v1288_v47 = vmul.f32 %v2218_v4, %v2617_v11 }
 0x176   : > { %v1195_v26 = vadd.f32 1.0, %v2220_v23 }
 0x177   : > { %v2222_v40 = vpop.eup %2221  ;;  %v1067_v48 = vadd.f32 %v2553_v61, %v906_v10  ;;  %v909_v44 = vadd.f32 %v1869_v25, %v2448_v18  ;;  %v1308_v29 = vpack.c.bf16 %v1288_v47, %v1287_v36 }
 0x178   : > { %2231 = vrcp.f32 %v1195_v26  ;;  %v1196_v30 = vadd.f32 1.0, %v2222_v40 }
 0x179   : > { %v1745_v37 = vmul.f32 -1.442695, %v1067_v48  ;;  %v1070_v33 = vadd.f32 %v2559_v7, %v909_v44  ;;  %2003 = vmatmul.mubr.bf16.gmra.mrb[52].mxu1 %v1308_v29 }
 0x17a   : > { %v2224_v57 = vpop.eup %2223  ;;  %2233 = vrcp.f32 %v1196_v30 }
 0x17b   : > { %2235 = vpow2.f32 %v1745_v37  ;;  %v1746_v16 = vmul.f32 -1.442695, %v1070_v33  ;;  %v1289_v11 = vmul.f32 %v2224_v57, %v2624_v54 }
 0x17c   : > { %v2226_v34 = vpop.eup %2225 }
 0x17d   : > { %v2228_v35 = vpop.eup %2227  ;;  %v1290_v42 = vmul.f32 %v2226_v34, %v2629_v28  ;;  %2237 = vpow2.f32 %v1746_v16 }
 0x17e   : > { %v1197_v61 = vadd.f32 1.0, %v2228_v35 }
 0x17f   : > { %v2230_v18 = vpop.eup %2229  ;;  %v1309_v50 = vpack.c.bf16 %v1290_v42, %v1289_v11 }
 0x180   : > { %2239 = vrcp.f32 %v1197_v61  ;;  %v1198_v27 = vadd.f32 1.0, %v2230_v18 }
 0x181   : > { %2006 = vmatprep.mubr.bf16.mxu1 %v1309_v50 }
 0x182   : > { %v2232_v62 = vpop.eup %2231  ;;  %2241 = vrcp.f32 %v1198_v27 }
 0x183   : > { %v1291_v3 = vmul.f32 %v2232_v62, %v2636_v6 }
 0x184   : > { %v2234_v7 = vpop.eup %2233 }
 0x185   : > { %v2236_v45 = vpop.eup %2235  ;;  %v1292_v46 = vmul.f32 %v2234_v7, %v2641_v0 }
 0x186   : > { %v1199_v51 = vadd.f32 1.0, %v2236_v45 }
 0x187   : > { %v2238_v31 = vpop.eup %2237  ;;  %v1310_v54 = vpack.c.bf16 %v1292_v46, %v1291_v3 }
 0x188   : > { %2243 = vrcp.f32 %v1199_v51  ;;  %v1200_v28 = vadd.f32 1.0, %v2238_v31 }
 0x189   : > { %2007 = vmatmul.mubr.bf16.gmra.mrb[56].mxu1 %v1310_v54 }
 0x18a   : > { %v2240_v52 = vpop.eup %2239  ;;  %2245 = vrcp.f32 %v1200_v28 }
 0x18b   : > { %v1293_v41 = vmul.f32 %v2240_v52, %v2648_v24 }
 0x18c   : > { %v2242_v53 = vpop.eup %2241 }
 0x18d   : > { %v1294_v12 = vmul.f32 %v2242_v53, %v1062_v19 }
 0x18f   : > { %v1311_v13 = vpack.c.bf16 %v1294_v12, %v1293_v41 }
 0x191   : > { %2010 = vmatprep.mubr.bf16.mxu1 %v1311_v13 }
 0x192   : > { %v2244_v32 = vpop.eup %2243 }
 0x193   : > { %v1295_v6 = vmul.f32 %v2244_v32, %v1067_v48 }
 0x194   : > { %v2246_v14 = vpop.eup %2245 }
 0x195   : > { %v1296_v55 = vmul.f32 %v2246_v14, %v1070_v33 }
 0x197   : > { %v1312_v0 = vpack.c.bf16 %v1296_v55, %v1295_v6 }
 0x199   : > { %2011 = vmatmul.mubr.bf16.gmra.mrb[60].mxu1 %v1312_v0 }
 0x1fc   : > { %v1984_v58 = vpop.f32.mrb[32].mxu1 }
 0x1fd   : > { %v1427_v59 = vadd.f32 %v1984_v58, %v2668_v56  ;;  %v1418_v49 = vpop.f32.mrb[33].mxu1 }
 0x1fe   : > { %v1419_v39 = vadd.f32 %v2668_v56, %v1418_v49  ;;  %v1985_v63 = vpop.f32.mrb[34].mxu1 }
 0x1ff   : > { %1547 = vst [vmem:[%s2673_s26 + $0x10] sm:$0xff] %v1427_v59  ;;  %v1430_v21 = vadd.f32 %v1985_v63, %v2668_v56  ;;  %v1421_v2 = vpop.f32.mrb[35].mxu1 }
 0x200   : > { %1545 = vst [vmem:[%s2673_s26] sm:$0xff] %v1419_v39  ;;  %v1422_v24 = vadd.f32 %v2668_v56, %v1421_v2 }
 0x201   : > { %1548 = vst [vmem:[%s2673_s26 + $0x18] sm:$0xff] %v1430_v21 }
 0x202   : > { %1546 = vst [vmem:[%s2673_s26 + $0x8] sm:$0xff] %v1422_v24 }
 0x20c   : > { %v1988_v5 = vpop.f32.mrb[36].mxu1 }
 0x20d   : > { %v1443_v1 = vadd.f32 %v1988_v5, %v2668_v56  ;;  %v1434_v9 = vpop.f32.mrb[37].mxu1 }
 0x20e   : > { %v1435_v60 = vadd.f32 %v2668_v56, %v1434_v9  ;;  %v1989_v19 = vpop.f32.mrb[38].mxu1 }
 0x20f   : > { %1551 = vst [vmem:[%s2673_s26 + $0x30] sm:$0xff] %v1443_v1  ;;  %v1446_v43 = vadd.f32 %v1989_v19, %v2668_v56  ;;  %v1437_v38 = vpop.f32.mrb[39].mxu1 }
 0x210   : > { %1549 = vst [vmem:[%s2673_s26 + $0x20] sm:$0xff] %v1435_v60  ;;  %v1438_v15 = vadd.f32 %v2668_v56, %v1437_v38 }
 0x211   : > { %1552 = vst [vmem:[%s2673_s26 + $0x38] sm:$0xff] %v1446_v43 }
 0x212   : > { %1550 = vst [vmem:[%s2673_s26 + $0x28] sm:$0xff] %v1438_v15 }
 0x21c   : > { %v1992_v20 = vpop.f32.mrb[40].mxu1 }
 0x21d   : > { %v1459_v17 = vadd.f32 %v1992_v20, %v2668_v56  ;;  %v1450_v8 = vpop.f32.mrb[41].mxu1 }
 0x21e   : > { %v1451_v4 = vadd.f32 %v2668_v56, %v1450_v8  ;;  %v1993_v22 = vpop.f32.mrb[42].mxu1 }
 0x21f   : > { %1555 = vst [vmem:[%s2673_s26 + $0x50] sm:$0xff] %v1459_v17  ;;  %v1462_v36 = vadd.f32 %v1993_v22, %v2668_v56  ;;  %v1453_v23 = vpop.f32.mrb[43].mxu1 }
 0x220   : > { %1553 = vst [vmem:[%s2673_s26 + $0x40] sm:$0xff] %v1451_v4  ;;  %v1454_v10 = vadd.f32 %v2668_v56, %v1453_v23 }
 0x221   : > { %1556 = vst [vmem:[%s2673_s26 + $0x58] sm:$0xff] %v1462_v36 }
 0x222   : > { %1554 = vst [vmem:[%s2673_s26 + $0x48] sm:$0xff] %v1454_v10 }
 0x22c   : > { %v1996_v25 = vpop.f32.mrb[44].mxu1 }
 0x22d   : > { %v1475_v47 = vadd.f32 %v1996_v25, %v2668_v56  ;;  %v1466_v26 = vpop.f32.mrb[45].mxu1 }
 0x22e   : > { %v1467_v40 = vadd.f32 %v2668_v56, %v1466_v26  ;;  %v1997_v48 = vpop.f32.mrb[46].mxu1 }
 0x22f   : > { %1559 = vst [vmem:[%s2673_s26 + $0x70] sm:$0xff] %v1475_v47  ;;  %v1478_v44 = vadd.f32 %v1997_v48, %v2668_v56  ;;  %v1469_v29 = vpop.f32.mrb[47].mxu1 }
 0x230   : > { %1557 = vst [vmem:[%s2673_s26 + $0x60] sm:$0xff] %v1467_v40  ;;  %v1470_v30 = vadd.f32 %v2668_v56, %v1469_v29 }
 0x231   : > { %1560 = vst [vmem:[%s2673_s26 + $0x78] sm:$0xff] %v1478_v44 }
 0x232   : > { %1558 = vst [vmem:[%s2673_s26 + $0x68] sm:$0xff] %v1470_v30 }
 0x23c   : > { %v2000_v37 = vpop.f32.mrb[48].mxu1 }
 0x23d   : > { %v1491_v33 = vadd.f32 %v2000_v37, %v2668_v56  ;;  %v1482_v57 = vpop.f32.mrb[49].mxu1 }
 0x23e   : > { %v1483_v16 = vadd.f32 %v2668_v56, %v1482_v57  ;;  %v2001_v34 = vpop.f32.mrb[50].mxu1 }
 0x23f   : > { %1563 = vst [vmem:[%s2673_s26 + $0x90] sm:$0xff] %v1491_v33  ;;  %v1494_v35 = vadd.f32 %v2001_v34, %v2668_v56  ;;  %v1485_v11 = vpop.f32.mrb[51].mxu1 }
 0x240   : > { %1561 = vst [vmem:[%s2673_s26 + $0x80] sm:$0xff] %v1483_v16  ;;  %v1486_v42 = vadd.f32 %v2668_v56, %v1485_v11 }
 0x241   : > { %1564 = vst [vmem:[%s2673_s26 + $0x98] sm:$0xff] %v1494_v35 }
 0x242   : > { %1562 = vst [vmem:[%s2673_s26 + $0x88] sm:$0xff] %v1486_v42 }
 0x24c   : > { %v2004_v61 = vpop.f32.mrb[52].mxu1 }
 0x24d   : > { %v1507_v18 = vadd.f32 %v2004_v61, %v2668_v56  ;;  %v1498_v50 = vpop.f32.mrb[53].mxu1 }
 0x24e   : > { %v1499_v27 = vadd.f32 %v2668_v56, %v1498_v50  ;;  %v2005_v62 = vpop.f32.mrb[54].mxu1 }
 0x24f   : > { %1567 = vst [vmem:[%s2673_s26 + $0xb0] sm:$0xff] %v1507_v18  ;;  %v1510_v7 = vadd.f32 %v2005_v62, %v2668_v56  ;;  %v1501_v45 = vpop.f32.mrb[55].mxu1 }
 0x250   : > { %1565 = vst [vmem:[%s2673_s26 + $0xa0] sm:$0xff] %v1499_v27  ;;  %v1502_v3 = vadd.f32 %v2668_v56, %v1501_v45 }
 0x251   : > { %1568 = vst [vmem:[%s2673_s26 + $0xb8] sm:$0xff] %v1510_v7 }
 0x252   : > { %1566 = vst [vmem:[%s2673_s26 + $0xa8] sm:$0xff] %v1502_v3 }
 0x25c   : > { %v2008_v46 = vpop.f32.mrb[56].mxu1 }
 0x25d   : > { %v1523_v51 = vadd.f32 %v2008_v46, %v2668_v56  ;;  %v1514_v31 = vpop.f32.mrb[57].mxu1 }
 0x25e   : > { %v1515_v54 = vadd.f32 %v2668_v56, %v1514_v31  ;;  %v2009_v28 = vpop.f32.mrb[58].mxu1 }
 0x25f   : > { %1571 = vst [vmem:[%s2673_s26 + $0xd0] sm:$0xff] %v1523_v51  ;;  %v1526_v52 = vadd.f32 %v2009_v28, %v2668_v56  ;;  %v1517_v53 = vpop.f32.mrb[59].mxu1 }
 0x260   : > { %1569 = vst [vmem:[%s2673_s26 + $0xc0] sm:$0xff] %v1515_v54  ;;  %v1518_v41 = vadd.f32 %v2668_v56, %v1517_v53 }
 0x261   : > { %1572 = vst [vmem:[%s2673_s26 + $0xd8] sm:$0xff] %v1526_v52 }
 0x262   : > { %1570 = vst [vmem:[%s2673_s26 + $0xc8] sm:$0xff] %v1518_v41 }
 0x26c   : > { %v2012_v12 = vpop.f32.mrb[60].mxu1 }
 0x26d   : > { %v1539_v13 = vadd.f32 %v2012_v12, %v2668_v56  ;;  %v1530_v32 = vpop.f32.mrb[61].mxu1 }
 0x26e   : > { %v1531_v14 = vadd.f32 %v2668_v56, %v1530_v32  ;;  %v2013_v6 = vpop.f32.mrb[62].mxu1 }
 0x26f   : > { %1575 = vst [vmem:[%s2673_s26 + $0xf0] sm:$0xff] %v1539_v13  ;;  %v1542_v55 = vadd.f32 %v2013_v6, %v2668_v56  ;;  %v1533_v0 = vpop.f32.mrb[63].mxu1 }
 0x270   : > { %1573 = vst [vmem:[%s2673_s26 + $0xe0] sm:$0xff] %v1531_v14  ;;  %v1534_v58 = vadd.f32 %v2668_v56, %v1533_v0 }
 0x271   : > { %1576 = vst [vmem:[%s2673_s26 + $0xf8] sm:$0xff] %v1542_v55 }
 0x272   : > { %1574 = vst [vmem:[%s2673_s26 + $0xe8] sm:$0xff] %v1534_v58 }
 0x273 PF: > { %s15_s18 = sadd.s32 1, %s2253_s18  }
 0x274   : > { %p12_p4 = scmp.ge.s32.totalorder %s15_s18, 4  }
 0x276   :  { %14 = sbr.rel (!%p12_p4) target bundleno = 1 (0x1), region = 70 }

</bundles_post_ra>
